<compile_context>
chip_gen: v6e
topology: v6e:2x2x1
jax: 0.10.0
libtpu: 0.0.40
codegen_flags: <defaults>
</compile_context>

<pallas_src>
import functools

import jax
import jax.numpy as jnp
import numpy as np
from jax import lax
from jax.experimental import pallas as pl
from jax.experimental.pallas import tpu as pltpu


def _revealnet_fused_kernel(x_ref, w_ref, b_ref, m_ref, o_ref,
                            act_ref, im2col_ref, *, H, W, Bt, Cp, nc_in,
                            cout_last_p, acts):
    """Whole RevealNet forward for Bt batch images (one grid step).

    x_ref:      (1, nc_in, N)       raw input channels, N = Bt*H*W (f32)
    w_ref:      (L, Cp, 9*Cp)       packed conv weights, BN scale folded (bf16)
    b_ref:      (L, Cp, 1)          folded per-channel bias (f32)
    m_ref:      (9, 1, N)           0/1 border masks per 3x3 tap, tiled per image
    o_ref:      (1, cout_last_p, N) output (first nc rows are the real channels)
    act_ref:    (Cp, N) f32 VMEM    current layer activation
    im2col_ref: (9*Cp, N) bf16 VMEM reused im2col operand
    """
    N = Bt * H * W
    L = len(acts)

    # Zero-pad the input channels to Cp once, in VMEM (no HBM-side pad).
    act_ref[...] = jnp.zeros_like(act_ref)
    act_ref[pl.ds(0, nc_in), :] = x_ref[0]

    for l, act_fn in enumerate(acts):
        act = act_ref[...]                            # (Cp, N) f32, load once

        # Build im2col^T in the reused scratch: 9 rolled+masked copies of the
        # activation stacked on the sublane axis.  roll matches jnp.roll, so
        # tap[c, p] = act[c, (p + s) mod N]; wrap-around / out-of-image source
        # pixels (including taps that would cross image boundaries inside the
        # batched lane axis) are zeroed by the border mask == 'same' padding.
        for t in range(9):
            dy, dx = t // 3 - 1, t % 3 - 1
            s = dy * W + dx                           # flattened source offset
            tap = pltpu.roll(act, shift=(-s) % N, axis=1) if s != 0 else act
            if t != 4:                                # center-tap mask is all ones
                tap = tap * m_ref[t]
            im2col_ref[pl.ds(t * Cp, Cp), :] = tap.astype(jnp.bfloat16)

        last = (l == L - 1)
        m_rows = cout_last_p if last else Cp
        w_l = w_ref[l][0:m_rows, :]                   # (m_rows, 9*Cp) bf16
        b_l = b_ref[l][0:m_rows, :]                   # (m_rows, 1)    f32

        # One bf16 MXU matmul per layer, f32 accumulation, lane-dense N.
        y = jnp.dot(w_l, im2col_ref[...],
                    preferred_element_type=jnp.float32)        # (m_rows, N) f32
        y = y + b_l                                   # lane-broadcast bias
        if act_fn == "relu":
            act_ref[...] = jnp.maximum(y, 0.0)
        else:                                         # final layer: sigmoid (EUP)
            o_ref[0] = jax.nn.sigmoid(y).astype(o_ref.dtype)


def make_border_masks(H, W):
    """masks[t, 0, p] = 1 iff tap t's source pixel for output p is in-image."""
    p = np.arange(H * W)
    y, x = p // W, p % W
    m = np.zeros((9, 1, H * W), np.float32)
    for t in range(9):
        dy, dx = t // 3 - 1, t % 3 - 1
        m[t, 0] = ((y + dy >= 0) & (y + dy < H)
                   & (x + dx >= 0) & (x + dx < W)).astype(np.float32)
    return jnp.asarray(m)


def pack_params(params, Cp):
    """Pack per-layer (w, scale, bias) into padded, BN-folded kernel operands.

    w_packed[l, o, t*Cp + c] = w_l[ky, kx, c, o] * scale_l[o], t = ky*3 + kx.
    Weights are stored as bf16 (MXU-native); bias stays f32.
    """
    L = len(params)
    w_packed = np.zeros((L, Cp, 9 * Cp), np.float32)
    b_packed = np.zeros((L, Cp, 1), np.float32)
    acts = []
    for l, (w, scale, bias, act) in enumerate(params):
        w = np.asarray(w, np.float32)            # (3, 3, Cin, Cout)  HWIO
        scale = np.asarray(scale, np.float32)    # (Cout,)
        bias = np.asarray(bias, np.float32)      # (Cout,)
        cin, cout = w.shape[2], w.shape[3]
        wt = np.transpose(w, (3, 0, 1, 2)).reshape(cout, 9, cin)
        wt = wt * scale[:, None, None]           # fold BN scale into weights
        buf = np.zeros((Cp, 9, Cp), np.float32)
        buf[:cout, :, :cin] = wt
        w_packed[l] = buf.reshape(Cp, 9 * Cp)
        b_packed[l, :cout, 0] = bias
        acts.append(act)
    return (jnp.asarray(w_packed, jnp.bfloat16),
            jnp.asarray(b_packed, jnp.float32),
            tuple(acts))


def make_reveal_net(params, H, W, bt_max=16):
    """Pack params once; return a jitted forward(x_nchw) -> (B, nc, H, W)."""
    HW = H * W
    L = len(params)
    nc_in = int(params[0][0].shape[2])
    nc_out = int(params[-1][0].shape[3])

    # Pad every layer's channel dim to one common sublane-aligned width.
    c_max = max(max(w.shape[2], w.shape[3]) for (w, _, _, _) in params)
    Cp = max(8, ((c_max + 7) // 8) * 8)
    cout_last_p = max(8, ((nc_out + 7) // 8) * 8)

    w_packed, b_packed, acts = pack_params(params, Cp)   # cached device arrays
    masks_base = make_border_masks(H, W)                 # (9, 1, HW)

    @jax.jit
    def forward(x_nchw):
        B = x_nchw.shape[0]
        # Keep >= 2 "parallel" grid steps when B >= 2 (both v7x TCs busy), but
        # batch several images per step (fatter matmul N, fewer per-step
        # overheads) once B grows; cap Bt to bound VMEM.
        G = max(2 if B >= 2 else 1, -(-B // bt_max))
        Bt = -(-B // G)
        Bpad = G * Bt
        N = Bt * HW

        x = x_nchw.astype(jnp.float32).reshape(B, nc_in, HW)
        if Bpad > B:
            x = jnp.pad(x, ((0, Bpad - B), (0, 0), (0, 0)))
        # (G, Bt, C, HW) -> (G, C, Bt*HW): channel-major, images concatenated
        # on the (lane) spatial axis.  Channels are NOT padded in HBM.
        x = x.reshape(G, Bt, nc_in, HW).transpose(0, 2, 1, 3).reshape(G, nc_in, N)

        masks = jnp.tile(masks_base, (1, 1, Bt))          # (9, 1, N)

        kernel = functools.partial(
            _revealnet_fused_kernel, H=H, W=W, Bt=Bt, Cp=Cp, nc_in=nc_in,
            cout_last_p=cout_last_p, acts=acts)

        out = pl.pallas_call(
            kernel,
            out_shape=jax.ShapeDtypeStruct((G, cout_last_p, N), jnp.float32),
            grid_spec=pltpu.PrefetchScalarGridSpec(
                num_scalar_prefetch=0,
                grid=(G,),
                in_specs=[
                    pl.BlockSpec((1, nc_in, N), lambda g: (g, 0, 0)),    # input
                    pl.BlockSpec((L, Cp, 9 * Cp), lambda g: (0, 0, 0)),  # weights
                    pl.BlockSpec((L, Cp, 1), lambda g: (0, 0, 0)),       # bias
                    pl.BlockSpec((9, 1, N), lambda g: (0, 0, 0)),        # masks
                ],
                out_specs=pl.BlockSpec((1, cout_last_p, N),
                                       lambda g: (g, 0, 0)),
                scratch_shapes=[
                    pltpu.VMEM((Cp, N), jnp.float32),         # activation
                    pltpu.VMEM((9 * Cp, N), jnp.bfloat16),    # reused im2col
                ],
            ),
            compiler_params=pltpu.CompilerParams(
                dimension_semantics=("parallel",),
            ),
        )(x, w_packed, b_packed, masks)

        out = out.reshape(G, cout_last_p, Bt, HW).transpose(0, 2, 1, 3)
        out = out.reshape(Bpad, cout_last_p, HW)[:B, :nc_out]
        return out.reshape(B, nc_out, H, W)

    return forward


def init_params(key, nc=3, nhf=8):
    """Deterministic synthetic parameters matching RevealNet's layer shapes."""
    eps = 1e-5
    layer_channels = [
        (nc, nhf), (nhf, nhf * 2), (nhf * 2, nhf * 4),
        (nhf * 4, nhf * 2), (nhf * 2, nhf), (nhf, nc),
    ]
    params = []
    for i, (cin, cout) in enumerate(layer_channels):
        key, k1, k2, k3, k4, k5, k6 = jax.random.split(key, 7)
        w = 0.1 * jax.random.normal(k1, (3, 3, cin, cout), jnp.float32)
        b_conv = 0.1 * jax.random.normal(k2, (cout,), jnp.float32)
        if i < 5:
            # Conv -> BatchNorm(eval) -> ReLU: fold BN into per-channel scale/bias.
            gamma = 1.0 + 0.1 * jax.random.normal(k3, (cout,), jnp.float32)
            beta = 0.1 * jax.random.normal(k4, (cout,), jnp.float32)
            r_mean = 0.1 * jax.random.normal(k5, (cout,), jnp.float32)
            r_var = jnp.abs(jax.random.normal(k6, (cout,), jnp.float32)) + 0.5
            s = gamma / jnp.sqrt(r_var + eps)
            bias = (b_conv - r_mean) * s + beta
            act = "relu"
        else:
            # Final Conv -> Sigmoid (no BN).
            s = jnp.ones((cout,), jnp.float32)
            bias = b_conv
            act = "sigmoid"
        params.append((w, s, bias, act))
    return params


def reveal_net_reference(x_nchw, params):
    """Pure-JAX f32 reference (lax.conv) for correctness checking."""
    x = jnp.transpose(x_nchw, (0, 2, 3, 1)).astype(jnp.float32)
    for (w, s, b, act) in params:
        y = lax.conv_general_dilated(
            x, w, window_strides=(1, 1), padding="SAME",
            dimension_numbers=("NHWC", "HWIO", "NHWC"),
            preferred_element_type=jnp.float32,
        )
        y = y * s.reshape(1, 1, 1, -1) + b.reshape(1, 1, 1, -1)
        if act == "relu":
            y = jnp.maximum(y, 0.0)
        else:
            y = jax.nn.sigmoid(y)
        x = y
    return jnp.transpose(x, (0, 3, 1, 2))


if __name__ == "__main__":
    key = jax.random.PRNGKey(0)
    k_params, k_input = jax.random.split(key)

    B, NC, NHF, H, W = 2, 3, 8, 16, 16
    params = init_params(k_params, nc=NC, nhf=NHF)
    x = jax.random.normal(k_input, (B, NC, H, W), jnp.float32)

    forward = make_reveal_net(params, H, W)
    out = jax.block_until_ready(forward(x))
    assert out.shape == (B, NC, H, W), out.shape

    ref = jax.block_until_ready(reveal_net_reference(x, params))
    # bf16 matmul operands with f32 accumulation vs. an f32 reference:
    # 2e-2 comfortably covers bf16 rounding over 6 layers while still
    # catching any structural / padding / BN-folding bug (~0.1+ errors).
    np.testing.assert_allclose(np.asarray(out), np.asarray(ref),
                               rtol=2e-2, atol=2e-2)

    print("KERNEL_OK")
</pallas_src>

<mosaic_0001>
module attributes {stable_mosaic.version = 11 : i64} {
  func.func @_revealnet_fused_kernel(%arg0: i32, %arg1: memref<1x3x256xf32, #tpu.memory_space<vmem>>, %arg2: memref<6x32x288xbf16, #tpu.memory_space<vmem>>, %arg3: memref<6x32x1xf32, #tpu.memory_space<vmem>>, %arg4: memref<9x1x256xf32, #tpu.memory_space<vmem>>, %arg5: memref<1x8x256xf32, #tpu.memory_space<vmem>>, %arg6: memref<32x256xf32, #tpu.memory_space<vmem>>, %arg7: memref<288x256xbf16, #tpu.memory_space<vmem>>) attributes {dimension_semantics = [#tpu.dimension_semantics<parallel>], iteration_bounds = array<i64: 2>, scalar_prefetch = 0 : i64, scratch_operands = 2 : i64, tpu.core_type = #tpu.core_type<tc>, window_params = [{transform_indices = @transform_0, window_bounds = array<i64: 1, 3, 256>}, {pipeline_mode = #tpu.pipeline_mode<synchronous>, transform_indices = @transform_1, window_bounds = array<i64: 6, 32, 288>}, {pipeline_mode = #tpu.pipeline_mode<synchronous>, transform_indices = @transform_2, window_bounds = array<i64: 6, 32, 1>}, {pipeline_mode = #tpu.pipeline_mode<synchronous>, transform_indices = @transform_3, window_bounds = array<i64: 9, 1, 256>}, {transform_indices = @transform_4, window_bounds = array<i64: 1, 8, 256>}]} {
    %cst = arith.constant 0.000000e+00 : f32
    %0 = vector.broadcast %cst : f32 to vector<32x256xf32>
    %c0 = arith.constant 0 : index
    %c0_0 = arith.constant 0 : index
    %1 = vector.load %arg6[%c0, %c0_0] : memref<32x256xf32, #tpu.memory_space<vmem>>, vector<32x256xf32>
    tpu.vector_store %arg6[%c0, %c0_0], %0 {strides = array<i32>} : memref<32x256xf32, #tpu.memory_space<vmem>>, vector<32x256xf32>,
    %c0_1 = arith.constant 0 : index
    %c0_2 = arith.constant 0 : index
    %c0_3 = arith.constant 0 : index
    %2 = vector.load %arg1[%c0_1, %c0_2, %c0_3] : memref<1x3x256xf32, #tpu.memory_space<vmem>>, vector<1x3x256xf32>
    %3 = vector.shape_cast %2 : vector<1x3x256xf32> to vector<3x256xf32>
    %c0_4 = arith.constant 0 : index
    %c0_5 = arith.constant 0 : index
    %4 = vector.load %arg6[%c0_4, %c0_5] : memref<32x256xf32, #tpu.memory_space<vmem>>, vector<3x256xf32>
    tpu.vector_store %arg6[%c0_4, %c0_5], %3 {strides = array<i32>} : memref<32x256xf32, #tpu.memory_space<vmem>>, vector<3x256xf32>,
    %c0_6 = arith.constant 0 : index
    %c0_7 = arith.constant 0 : index
    %5 = vector.load %arg6[%c0_6, %c0_7] : memref<32x256xf32, #tpu.memory_space<vmem>>, vector<32x256xf32>
    %c17_i32 = arith.constant 17 : i32
    %6 = tpu.dynamic_rotate %5 by %c17_i32 dim 1 : vector<32x256xf32>, i32 -> vector<32x256xf32>
    %c0_8 = arith.constant 0 : index
    %c0_9 = arith.constant 0 : index
    %c0_10 = arith.constant 0 : index
    %7 = vector.load %arg4[%c0_8, %c0_9, %c0_10] : memref<9x1x256xf32, #tpu.memory_space<vmem>>, vector<1x1x256xf32>
    %8 = vector.shape_cast %7 : vector<1x1x256xf32> to vector<1x256xf32>
    %9 = vector.broadcast %8 : vector<1x256xf32> to vector<32x256xf32>
    %10 = arith.mulf %6, %9 : vector<32x256xf32>
    %11 = arith.truncf %10 : vector<32x256xf32> to vector<32x256xbf16>
    %c0_11 = arith.constant 0 : index
    %c0_12 = arith.constant 0 : index
    %12 = vector.load %arg7[%c0_11, %c0_12] : memref<288x256xbf16, #tpu.memory_space<vmem>>, vector<32x256xbf16>
    tpu.vector_store %arg7[%c0_11, %c0_12], %11 {strides = array<i32>} : memref<288x256xbf16, #tpu.memory_space<vmem>>, vector<32x256xbf16>,
    %c16_i32 = arith.constant 16 : i32
    %13 = tpu.dynamic_rotate %5 by %c16_i32 dim 1 : vector<32x256xf32>, i32 -> vector<32x256xf32>
    %c1 = arith.constant 1 : index
    %c0_13 = arith.constant 0 : index
    %c0_14 = arith.constant 0 : index
    %14 = vector.load %arg4[%c1, %c0_13, %c0_14] : memref<9x1x256xf32, #tpu.memory_space<vmem>>, vector<1x1x256xf32>
    %15 = vector.shape_cast %14 : vector<1x1x256xf32> to vector<1x256xf32>
    %16 = vector.broadcast %15 : vector<1x256xf32> to vector<32x256xf32>
    %17 = arith.mulf %13, %16 : vector<32x256xf32>
    %18 = arith.truncf %17 : vector<32x256xf32> to vector<32x256xbf16>
    %c32 = arith.constant 32 : index
    %c0_15 = arith.constant 0 : index
    %19 = vector.load %arg7[%c32, %c0_15] : memref<288x256xbf16, #tpu.memory_space<vmem>>, vector<32x256xbf16>
    tpu.vector_store %arg7[%c32, %c0_15], %18 {strides = array<i32>} : memref<288x256xbf16, #tpu.memory_space<vmem>>, vector<32x256xbf16>,
    %c15_i32 = arith.constant 15 : i32
    %20 = tpu.dynamic_rotate %5 by %c15_i32 dim 1 : vector<32x256xf32>, i32 -> vector<32x256xf32>
    %c2 = arith.constant 2 : index
    %c0_16 = arith.constant 0 : index
    %c0_17 = arith.constant 0 : index
    %21 = vector.load %arg4[%c2, %c0_16, %c0_17] : memref<9x1x256xf32, #tpu.memory_space<vmem>>, vector<1x1x256xf32>
    %22 = vector.shape_cast %21 : vector<1x1x256xf32> to vector<1x256xf32>
    %23 = vector.broadcast %22 : vector<1x256xf32> to vector<32x256xf32>
    %24 = arith.mulf %20, %23 : vector<32x256xf32>
    %25 = arith.truncf %24 : vector<32x256xf32> to vector<32x256xbf16>
    %c64 = arith.constant 64 : index
    %c0_18 = arith.constant 0 : index
    %26 = vector.load %arg7[%c64, %c0_18] : memref<288x256xbf16, #tpu.memory_space<vmem>>, vector<32x256xbf16>
    tpu.vector_store %arg7[%c64, %c0_18], %25 {strides = array<i32>} : memref<288x256xbf16, #tpu.memory_space<vmem>>, vector<32x256xbf16>,
    %c1_i32 = arith.constant 1 : i32
    %27 = tpu.dynamic_rotate %5 by %c1_i32 dim 1 : vector<32x256xf32>, i32 -> vector<32x256xf32>
    %c3 = arith.constant 3 : index
    %c0_19 = arith.constant 0 : index
    %c0_20 = arith.constant 0 : index
    %28 = vector.load %arg4[%c3, %c0_19, %c0_20] : memref<9x1x256xf32, #tpu.memory_space<vmem>>, vector<1x1x256xf32>
    %29 = vector.shape_cast %28 : vector<1x1x256xf32> to vector<1x256xf32>
    %30 = vector.broadcast %29 : vector<1x256xf32> to vector<32x256xf32>
    %31 = arith.mulf %27, %30 : vector<32x256xf32>
    %32 = arith.truncf %31 : vector<32x256xf32> to vector<32x256xbf16>
    %c96 = arith.constant 96 : index
    %c0_21 = arith.constant 0 : index
    %33 = vector.load %arg7[%c96, %c0_21] : memref<288x256xbf16, #tpu.memory_space<vmem>>, vector<32x256xbf16>
    tpu.vector_store %arg7[%c96, %c0_21], %32 {strides = array<i32>} : memref<288x256xbf16, #tpu.memory_space<vmem>>, vector<32x256xbf16>,
    %34 = arith.truncf %5 : vector<32x256xf32> to vector<32x256xbf16>
    %c128 = arith.constant 128 : index
    %c0_22 = arith.constant 0 : index
    %35 = vector.load %arg7[%c128, %c0_22] : memref<288x256xbf16, #tpu.memory_space<vmem>>, vector<32x256xbf16>
    tpu.vector_store %arg7[%c128, %c0_22], %34 {strides = array<i32>} : memref<288x256xbf16, #tpu.memory_space<vmem>>, vector<32x256xbf16>,
    %c255_i32 = arith.constant 255 : i32
    %36 = tpu.dynamic_rotate %5 by %c255_i32 dim 1 : vector<32x256xf32>, i32 -> vector<32x256xf32>
    %c5 = arith.constant 5 : index
    %c0_23 = arith.constant 0 : index
    %c0_24 = arith.constant 0 : index
    %37 = vector.load %arg4[%c5, %c0_23, %c0_24] : memref<9x1x256xf32, #tpu.memory_space<vmem>>, vector<1x1x256xf32>
    %38 = vector.shape_cast %37 : vector<1x1x256xf32> to vector<1x256xf32>
    %39 = vector.broadcast %38 : vector<1x256xf32> to vector<32x256xf32>
    %40 = arith.mulf %36, %39 : vector<32x256xf32>
    %41 = arith.truncf %40 : vector<32x256xf32> to vector<32x256xbf16>
    %c160 = arith.constant 160 : index
    %c0_25 = arith.constant 0 : index
    %42 = vector.load %arg7[%c160, %c0_25] : memref<288x256xbf16, #tpu.memory_space<vmem>>, vector<32x256xbf16>
    tpu.vector_store %arg7[%c160, %c0_25], %41 {strides = array<i32>} : memref<288x256xbf16, #tpu.memory_space<vmem>>, vector<32x256xbf16>,
    %c241_i32 = arith.constant 241 : i32
    %43 = tpu.dynamic_rotate %5 by %c241_i32 dim 1 : vector<32x256xf32>, i32 -> vector<32x256xf32>
    %c6 = arith.constant 6 : index
    %c0_26 = arith.constant 0 : index
    %c0_27 = arith.constant 0 : index
    %44 = vector.load %arg4[%c6, %c0_26, %c0_27] : memref<9x1x256xf32, #tpu.memory_space<vmem>>, vector<1x1x256xf32>
    %45 = vector.shape_cast %44 : vector<1x1x256xf32> to vector<1x256xf32>
    %46 = vector.broadcast %45 : vector<1x256xf32> to vector<32x256xf32>
    %47 = arith.mulf %43, %46 : vector<32x256xf32>
    %48 = arith.truncf %47 : vector<32x256xf32> to vector<32x256xbf16>
    %c192 = arith.constant 192 : index
    %c0_28 = arith.constant 0 : index
    %49 = vector.load %arg7[%c192, %c0_28] : memref<288x256xbf16, #tpu.memory_space<vmem>>, vector<32x256xbf16>
    tpu.vector_store %arg7[%c192, %c0_28], %48 {strides = array<i32>} : memref<288x256xbf16, #tpu.memory_space<vmem>>, vector<32x256xbf16>,
    %c240_i32 = arith.constant 240 : i32
    %50 = tpu.dynamic_rotate %5 by %c240_i32 dim 1 : vector<32x256xf32>, i32 -> vector<32x256xf32>
    %c7 = arith.constant 7 : index
    %c0_29 = arith.constant 0 : index
    %c0_30 = arith.constant 0 : index
    %51 = vector.load %arg4[%c7, %c0_29, %c0_30] : memref<9x1x256xf32, #tpu.memory_space<vmem>>, vector<1x1x256xf32>
    %52 = vector.shape_cast %51 : vector<1x1x256xf32> to vector<1x256xf32>
    %53 = vector.broadcast %52 : vector<1x256xf32> to vector<32x256xf32>
    %54 = arith.mulf %50, %53 : vector<32x256xf32>
    %55 = arith.truncf %54 : vector<32x256xf32> to vector<32x256xbf16>
    %c224 = arith.constant 224 : index
    %c0_31 = arith.constant 0 : index
    %56 = vector.load %arg7[%c224, %c0_31] : memref<288x256xbf16, #tpu.memory_space<vmem>>, vector<32x256xbf16>
    tpu.vector_store %arg7[%c224, %c0_31], %55 {strides = array<i32>} : memref<288x256xbf16, #tpu.memory_space<vmem>>, vector<32x256xbf16>,
    %c239_i32 = arith.constant 239 : i32
    %57 = tpu.dynamic_rotate %5 by %c239_i32 dim 1 : vector<32x256xf32>, i32 -> vector<32x256xf32>
    %c8 = arith.constant 8 : index
    %c0_32 = arith.constant 0 : index
    %c0_33 = arith.constant 0 : index
    %58 = vector.load %arg4[%c8, %c0_32, %c0_33] : memref<9x1x256xf32, #tpu.memory_space<vmem>>, vector<1x1x256xf32>
    %59 = vector.shape_cast %58 : vector<1x1x256xf32> to vector<1x256xf32>
    %60 = vector.broadcast %59 : vector<1x256xf32> to vector<32x256xf32>
    %61 = arith.mulf %57, %60 : vector<32x256xf32>
    %62 = arith.truncf %61 : vector<32x256xf32> to vector<32x256xbf16>
    %c256 = arith.constant 256 : index
    %c0_34 = arith.constant 0 : index
    %63 = vector.load %arg7[%c256, %c0_34] : memref<288x256xbf16, #tpu.memory_space<vmem>>, vector<32x256xbf16>
    tpu.vector_store %arg7[%c256, %c0_34], %62 {strides = array<i32>} : memref<288x256xbf16, #tpu.memory_space<vmem>>, vector<32x256xbf16>,
    %c0_35 = arith.constant 0 : index
    %c0_36 = arith.constant 0 : index
    %c0_37 = arith.constant 0 : index
    %64 = vector.load %arg2[%c0_35, %c0_36, %c0_37] : memref<6x32x288xbf16, #tpu.memory_space<vmem>>, vector<1x32x288xbf16>
    %65 = vector.shape_cast %64 : vector<1x32x288xbf16> to vector<32x288xbf16>
    %c0_38 = arith.constant 0 : index
    %c0_39 = arith.constant 0 : index
    %c0_40 = arith.constant 0 : index
    %66 = vector.load %arg3[%c0_38, %c0_39, %c0_40] : memref<6x32x1xf32, #tpu.memory_space<vmem>>, vector<1x32x1xf32>
    %67 = vector.shape_cast %66 : vector<1x32x1xf32> to vector<32x1xf32>
    %c0_41 = arith.constant 0 : index
    %c0_42 = arith.constant 0 : index
    %68 = vector.load %arg7[%c0_41, %c0_42] : memref<288x256xbf16, #tpu.memory_space<vmem>>, vector<288x256xbf16>
    %cst_43 = arith.constant dense<0.000000e+00> : vector<32x256xf32>
    %69 = tpu.matmul %65, %68, %cst_43 {dimension_numbers = #tpu.dot_dimension_numbers<[1], [0], [0], [1], [0, 0, 1, 1], [], []>} : vector<32x288xbf16>, vector<288x256xbf16>, vector<32x256xf32> -> vector<32x256xf32>
    %70 = vector.broadcast %67 : vector<32x1xf32> to vector<32x256xf32>
    %71 = arith.addf %69, %70 : vector<32x256xf32>
    %cst_44 = arith.constant 0.000000e+00 : f32
    %72 = vector.broadcast %cst_44 : f32 to vector<32x256xf32>
    %73 = arith.maximumf %71, %72 : vector<32x256xf32>
    %c0_45 = arith.constant 0 : index
    %c0_46 = arith.constant 0 : index
    %74 = vector.load %arg6[%c0_45, %c0_46] : memref<32x256xf32, #tpu.memory_space<vmem>>, vector<32x256xf32>
    tpu.vector_store %arg6[%c0_45, %c0_46], %73 {strides = array<i32>} : memref<32x256xf32, #tpu.memory_space<vmem>>, vector<32x256xf32>,
    %c0_47 = arith.constant 0 : index
    %c0_48 = arith.constant 0 : index
    %75 = vector.load %arg6[%c0_47, %c0_48] : memref<32x256xf32, #tpu.memory_space<vmem>>, vector<32x256xf32>
    %c17_i32_49 = arith.constant 17 : i32
    %76 = tpu.dynamic_rotate %75 by %c17_i32_49 dim 1 : vector<32x256xf32>, i32 -> vector<32x256xf32>
    %c0_50 = arith.constant 0 : index
    %c0_51 = arith.constant 0 : index
    %c0_52 = arith.constant 0 : index
    %77 = vector.load %arg4[%c0_50, %c0_51, %c0_52] : memref<9x1x256xf32, #tpu.memory_space<vmem>>, vector<1x1x256xf32>
    %78 = vector.shape_cast %77 : vector<1x1x256xf32> to vector<1x256xf32>
    %79 = vector.broadcast %78 : vector<1x256xf32> to vector<32x256xf32>
    %80 = arith.mulf %76, %79 : vector<32x256xf32>
    %81 = arith.truncf %80 : vector<32x256xf32> to vector<32x256xbf16>
    %c0_53 = arith.constant 0 : index
    %c0_54 = arith.constant 0 : index
    %82 = vector.load %arg7[%c0_53, %c0_54] : memref<288x256xbf16, #tpu.memory_space<vmem>>, vector<32x256xbf16>
    tpu.vector_store %arg7[%c0_53, %c0_54], %81 {strides = array<i32>} : memref<288x256xbf16, #tpu.memory_space<vmem>>, vector<32x256xbf16>,
    %c16_i32_55 = arith.constant 16 : i32
    %83 = tpu.dynamic_rotate %75 by %c16_i32_55 dim 1 : vector<32x256xf32>, i32 -> vector<32x256xf32>
    %c1_56 = arith.constant 1 : index
    %c0_57 = arith.constant 0 : index
    %c0_58 = arith.constant 0 : index
    %84 = vector.load %arg4[%c1_56, %c0_57, %c0_58] : memref<9x1x256xf32, #tpu.memory_space<vmem>>, vector<1x1x256xf32>
    %85 = vector.shape_cast %84 : vector<1x1x256xf32> to vector<1x256xf32>
    %86 = vector.broadcast %85 : vector<1x256xf32> to vector<32x256xf32>
    %87 = arith.mulf %83, %86 : vector<32x256xf32>
    %88 = arith.truncf %87 : vector<32x256xf32> to vector<32x256xbf16>
    %c32_59 = arith.constant 32 : index
    %c0_60 = arith.constant 0 : index
    %89 = vector.load %arg7[%c32_59, %c0_60] : memref<288x256xbf16, #tpu.memory_space<vmem>>, vector<32x256xbf16>
    tpu.vector_store %arg7[%c32_59, %c0_60], %88 {strides = array<i32>} : memref<288x256xbf16, #tpu.memory_space<vmem>>, vector<32x256xbf16>,
    %c15_i32_61 = arith.constant 15 : i32
    %90 = tpu.dynamic_rotate %75 by %c15_i32_61 dim 1 : vector<32x256xf32>, i32 -> vector<32x256xf32>
    %c2_62 = arith.constant 2 : index
    %c0_63 = arith.constant 0 : index
    %c0_64 = arith.constant 0 : index
    %91 = vector.load %arg4[%c2_62, %c0_63, %c0_64] : memref<9x1x256xf32, #tpu.memory_space<vmem>>, vector<1x1x256xf32>
    %92 = vector.shape_cast %91 : vector<1x1x256xf32> to vector<1x256xf32>
    %93 = vector.broadcast %92 : vector<1x256xf32> to vector<32x256xf32>
    %94 = arith.mulf %90, %93 : vector<32x256xf32>
    %95 = arith.truncf %94 : vector<32x256xf32> to vector<32x256xbf16>
    %c64_65 = arith.constant 64 : index
    %c0_66 = arith.constant 0 : index
    %96 = vector.load %arg7[%c64_65, %c0_66] : memref<288x256xbf16, #tpu.memory_space<vmem>>, vector<32x256xbf16>
    tpu.vector_store %arg7[%c64_65, %c0_66], %95 {strides = array<i32>} : memref<288x256xbf16, #tpu.memory_space<vmem>>, vector<32x256xbf16>,
    %c1_i32_67 = arith.constant 1 : i32
    %97 = tpu.dynamic_rotate %75 by %c1_i32_67 dim 1 : vector<32x256xf32>, i32 -> vector<32x256xf32>
    %c3_68 = arith.constant 3 : index
    %c0_69 = arith.constant 0 : index
    %c0_70 = arith.constant 0 : index
    %98 = vector.load %arg4[%c3_68, %c0_69, %c0_70] : memref<9x1x256xf32, #tpu.memory_space<vmem>>, vector<1x1x256xf32>
    %99 = vector.shape_cast %98 : vector<1x1x256xf32> to vector<1x256xf32>
    %100 = vector.broadcast %99 : vector<1x256xf32> to vector<32x256xf32>
    %101 = arith.mulf %97, %100 : vector<32x256xf32>
    %102 = arith.truncf %101 : vector<32x256xf32> to vector<32x256xbf16>
    %c96_71 = arith.constant 96 : index
    %c0_72 = arith.constant 0 : index
    %103 = vector.load %arg7[%c96_71, %c0_72] : memref<288x256xbf16, #tpu.memory_space<vmem>>, vector<32x256xbf16>
    tpu.vector_store %arg7[%c96_71, %c0_72], %102 {strides = array<i32>} : memref<288x256xbf16, #tpu.memory_space<vmem>>, vector<32x256xbf16>,
    %104 = arith.truncf %75 : vector<32x256xf32> to vector<32x256xbf16>
    %c128_73 = arith.constant 128 : index
    %c0_74 = arith.constant 0 : index
    %105 = vector.load %arg7[%c128_73, %c0_74] : memref<288x256xbf16, #tpu.memory_space<vmem>>, vector<32x256xbf16>
    tpu.vector_store %arg7[%c128_73, %c0_74], %104 {strides = array<i32>} : memref<288x256xbf16, #tpu.memory_space<vmem>>, vector<32x256xbf16>,
    %c255_i32_75 = arith.constant 255 : i32
    %106 = tpu.dynamic_rotate %75 by %c255_i32_75 dim 1 : vector<32x256xf32>, i32 -> vector<32x256xf32>
    %c5_76 = arith.constant 5 : index
    %c0_77 = arith.constant 0 : index
    %c0_78 = arith.constant 0 : index
    %107 = vector.load %arg4[%c5_76, %c0_77, %c0_78] : memref<9x1x256xf32, #tpu.memory_space<vmem>>, vector<1x1x256xf32>
    %108 = vector.shape_cast %107 : vector<1x1x256xf32> to vector<1x256xf32>
    %109 = vector.broadcast %108 : vector<1x256xf32> to vector<32x256xf32>
    %110 = arith.mulf %106, %109 : vector<32x256xf32>
    %111 = arith.truncf %110 : vector<32x256xf32> to vector<32x256xbf16>
    %c160_79 = arith.constant 160 : index
    %c0_80 = arith.constant 0 : index
    %112 = vector.load %arg7[%c160_79, %c0_80] : memref<288x256xbf16, #tpu.memory_space<vmem>>, vector<32x256xbf16>
    tpu.vector_store %arg7[%c160_79, %c0_80], %111 {strides = array<i32>} : memref<288x256xbf16, #tpu.memory_space<vmem>>, vector<32x256xbf16>,
    %c241_i32_81 = arith.constant 241 : i32
    %113 = tpu.dynamic_rotate %75 by %c241_i32_81 dim 1 : vector<32x256xf32>, i32 -> vector<32x256xf32>
    %c6_82 = arith.constant 6 : index
    %c0_83 = arith.constant 0 : index
    %c0_84 = arith.constant 0 : index
    %114 = vector.load %arg4[%c6_82, %c0_83, %c0_84] : memref<9x1x256xf32, #tpu.memory_space<vmem>>, vector<1x1x256xf32>
    %115 = vector.shape_cast %114 : vector<1x1x256xf32> to vector<1x256xf32>
    %116 = vector.broadcast %115 : vector<1x256xf32> to vector<32x256xf32>
    %117 = arith.mulf %113, %116 : vector<32x256xf32>
    %118 = arith.truncf %117 : vector<32x256xf32> to vector<32x256xbf16>
    %c192_85 = arith.constant 192 : index
    %c0_86 = arith.constant 0 : index
    %119 = vector.load %arg7[%c192_85, %c0_86] : memref<288x256xbf16, #tpu.memory_space<vmem>>, vector<32x256xbf16>
    tpu.vector_store %arg7[%c192_85, %c0_86], %118 {strides = array<i32>} : memref<288x256xbf16, #tpu.memory_space<vmem>>, vector<32x256xbf16>,
    %c240_i32_87 = arith.constant 240 : i32
    %120 = tpu.dynamic_rotate %75 by %c240_i32_87 dim 1 : vector<32x256xf32>, i32 -> vector<32x256xf32>
    %c7_88 = arith.constant 7 : index
    %c0_89 = arith.constant 0 : index
    %c0_90 = arith.constant 0 : index
    %121 = vector.load %arg4[%c7_88, %c0_89, %c0_90] : memref<9x1x256xf32, #tpu.memory_space<vmem>>, vector<1x1x256xf32>
    %122 = vector.shape_cast %121 : vector<1x1x256xf32> to vector<1x256xf32>
    %123 = vector.broadcast %122 : vector<1x256xf32> to vector<32x256xf32>
    %124 = arith.mulf %120, %123 : vector<32x256xf32>
    %125 = arith.truncf %124 : vector<32x256xf32> to vector<32x256xbf16>
    %c224_91 = arith.constant 224 : index
    %c0_92 = arith.constant 0 : index
    %126 = vector.load %arg7[%c224_91, %c0_92] : memref<288x256xbf16, #tpu.memory_space<vmem>>, vector<32x256xbf16>
    tpu.vector_store %arg7[%c224_91, %c0_92], %125 {strides = array<i32>} : memref<288x256xbf16, #tpu.memory_space<vmem>>, vector<32x256xbf16>,
    %c239_i32_93 = arith.constant 239 : i32
    %127 = tpu.dynamic_rotate %75 by %c239_i32_93 dim 1 : vector<32x256xf32>, i32 -> vector<32x256xf32>
    %c8_94 = arith.constant 8 : index
    %c0_95 = arith.constant 0 : index
    %c0_96 = arith.constant 0 : index
    %128 = vector.load %arg4[%c8_94, %c0_95, %c0_96] : memref<9x1x256xf32, #tpu.memory_space<vmem>>, vector<1x1x256xf32>
    %129 = vector.shape_cast %128 : vector<1x1x256xf32> to vector<1x256xf32>
    %130 = vector.broadcast %129 : vector<1x256xf32> to vector<32x256xf32>
    %131 = arith.mulf %127, %130 : vector<32x256xf32>
    %132 = arith.truncf %131 : vector<32x256xf32> to vector<32x256xbf16>
    %c256_97 = arith.constant 256 : index
    %c0_98 = arith.constant 0 : index
    %133 = vector.load %arg7[%c256_97, %c0_98] : memref<288x256xbf16, #tpu.memory_space<vmem>>, vector<32x256xbf16>
    tpu.vector_store %arg7[%c256_97, %c0_98], %132 {strides = array<i32>} : memref<288x256xbf16, #tpu.memory_space<vmem>>, vector<32x256xbf16>,
    %c1_99 = arith.constant 1 : index
    %c0_100 = arith.constant 0 : index
    %c0_101 = arith.constant 0 : index
    %134 = vector.load %arg2[%c1_99, %c0_100, %c0_101] : memref<6x32x288xbf16, #tpu.memory_space<vmem>>, vector<1x32x288xbf16>
    %135 = vector.shape_cast %134 : vector<1x32x288xbf16> to vector<32x288xbf16>
    %c1_102 = arith.constant 1 : index
    %c0_103 = arith.constant 0 : index
    %c0_104 = arith.constant 0 : index
    %136 = vector.load %arg3[%c1_102, %c0_103, %c0_104] : memref<6x32x1xf32, #tpu.memory_space<vmem>>, vector<1x32x1xf32>
    %137 = vector.shape_cast %136 : vector<1x32x1xf32> to vector<32x1xf32>
    %c0_105 = arith.constant 0 : index
    %c0_106 = arith.constant 0 : index
    %138 = vector.load %arg7[%c0_105, %c0_106] : memref<288x256xbf16, #tpu.memory_space<vmem>>, vector<288x256xbf16>
    %cst_107 = arith.constant dense<0.000000e+00> : vector<32x256xf32>
    %139 = tpu.matmul %135, %138, %cst_107 {dimension_numbers = #tpu.dot_dimension_numbers<[1], [0], [0], [1], [0, 0, 1, 1], [], []>} : vector<32x288xbf16>, vector<288x256xbf16>, vector<32x256xf32> -> vector<32x256xf32>
    %140 = vector.broadcast %137 : vector<32x1xf32> to vector<32x256xf32>
    %141 = arith.addf %139, %140 : vector<32x256xf32>
    %cst_108 = arith.constant 0.000000e+00 : f32
    %142 = vector.broadcast %cst_108 : f32 to vector<32x256xf32>
    %143 = arith.maximumf %141, %142 : vector<32x256xf32>
    %c0_109 = arith.constant 0 : index
    %c0_110 = arith.constant 0 : index
    %144 = vector.load %arg6[%c0_109, %c0_110] : memref<32x256xf32, #tpu.memory_space<vmem>>, vector<32x256xf32>
    tpu.vector_store %arg6[%c0_109, %c0_110], %143 {strides = array<i32>} : memref<32x256xf32, #tpu.memory_space<vmem>>, vector<32x256xf32>,
    %c0_111 = arith.constant 0 : index
    %c0_112 = arith.constant 0 : index
    %145 = vector.load %arg6[%c0_111, %c0_112] : memref<32x256xf32, #tpu.memory_space<vmem>>, vector<32x256xf32>
    %c17_i32_113 = arith.constant 17 : i32
    %146 = tpu.dynamic_rotate %145 by %c17_i32_113 dim 1 : vector<32x256xf32>, i32 -> vector<32x256xf32>
    %c0_114 = arith.constant 0 : index
    %c0_115 = arith.constant 0 : index
    %c0_116 = arith.constant 0 : index
    %147 = vector.load %arg4[%c0_114, %c0_115, %c0_116] : memref<9x1x256xf32, #tpu.memory_space<vmem>>, vector<1x1x256xf32>
    %148 = vector.shape_cast %147 : vector<1x1x256xf32> to vector<1x256xf32>
    %149 = vector.broadcast %148 : vector<1x256xf32> to vector<32x256xf32>
    %150 = arith.mulf %146, %149 : vector<32x256xf32>
    %151 = arith.truncf %150 : vector<32x256xf32> to vector<32x256xbf16>
    %c0_117 = arith.constant 0 : index
    %c0_118 = arith.constant 0 : index
    %152 = vector.load %arg7[%c0_117, %c0_118] : memref<288x256xbf16, #tpu.memory_space<vmem>>, vector<32x256xbf16>
    tpu.vector_store %arg7[%c0_117, %c0_118], %151 {strides = array<i32>} : memref<288x256xbf16, #tpu.memory_space<vmem>>, vector<32x256xbf16>,
    %c16_i32_119 = arith.constant 16 : i32
    %153 = tpu.dynamic_rotate %145 by %c16_i32_119 dim 1 : vector<32x256xf32>, i32 -> vector<32x256xf32>
    %c1_120 = arith.constant 1 : index
    %c0_121 = arith.constant 0 : index
    %c0_122 = arith.constant 0 : index
    %154 = vector.load %arg4[%c1_120, %c0_121, %c0_122] : memref<9x1x256xf32, #tpu.memory_space<vmem>>, vector<1x1x256xf32>
    %155 = vector.shape_cast %154 : vector<1x1x256xf32> to vector<1x256xf32>
    %156 = vector.broadcast %155 : vector<1x256xf32> to vector<32x256xf32>
    %157 = arith.mulf %153, %156 : vector<32x256xf32>
    %158 = arith.truncf %157 : vector<32x256xf32> to vector<32x256xbf16>
    %c32_123 = arith.constant 32 : index
    %c0_124 = arith.constant 0 : index
    %159 = vector.load %arg7[%c32_123, %c0_124] : memref<288x256xbf16, #tpu.memory_space<vmem>>, vector<32x256xbf16>
    tpu.vector_store %arg7[%c32_123, %c0_124], %158 {strides = array<i32>} : memref<288x256xbf16, #tpu.memory_space<vmem>>, vector<32x256xbf16>,
    %c15_i32_125 = arith.constant 15 : i32
    %160 = tpu.dynamic_rotate %145 by %c15_i32_125 dim 1 : vector<32x256xf32>, i32 -> vector<32x256xf32>
    %c2_126 = arith.constant 2 : index
    %c0_127 = arith.constant 0 : index
    %c0_128 = arith.constant 0 : index
    %161 = vector.load %arg4[%c2_126, %c0_127, %c0_128] : memref<9x1x256xf32, #tpu.memory_space<vmem>>, vector<1x1x256xf32>
    %162 = vector.shape_cast %161 : vector<1x1x256xf32> to vector<1x256xf32>
    %163 = vector.broadcast %162 : vector<1x256xf32> to vector<32x256xf32>
    %164 = arith.mulf %160, %163 : vector<32x256xf32>
    %165 = arith.truncf %164 : vector<32x256xf32> to vector<32x256xbf16>
    %c64_129 = arith.constant 64 : index
    %c0_130 = arith.constant 0 : index
    %166 = vector.load %arg7[%c64_129, %c0_130] : memref<288x256xbf16, #tpu.memory_space<vmem>>, vector<32x256xbf16>
    tpu.vector_store %arg7[%c64_129, %c0_130], %165 {strides = array<i32>} : memref<288x256xbf16, #tpu.memory_space<vmem>>, vector<32x256xbf16>,
    %c1_i32_131 = arith.constant 1 : i32
    %167 = tpu.dynamic_rotate %145 by %c1_i32_131 dim 1 : vector<32x256xf32>, i32 -> vector<32x256xf32>
    %c3_132 = arith.constant 3 : index
    %c0_133 = arith.constant 0 : index
    %c0_134 = arith.constant 0 : index
    %168 = vector.load %arg4[%c3_132, %c0_133, %c0_134] : memref<9x1x256xf32, #tpu.memory_space<vmem>>, vector<1x1x256xf32>
    %169 = vector.shape_cast %168 : vector<1x1x256xf32> to vector<1x256xf32>
    %170 = vector.broadcast %169 : vector<1x256xf32> to vector<32x256xf32>
    %171 = arith.mulf %167, %170 : vector<32x256xf32>
    %172 = arith.truncf %171 : vector<32x256xf32> to vector<32x256xbf16>
    %c96_135 = arith.constant 96 : index
    %c0_136 = arith.constant 0 : index
    %173 = vector.load %arg7[%c96_135, %c0_136] : memref<288x256xbf16, #tpu.memory_space<vmem>>, vector<32x256xbf16>
    tpu.vector_store %arg7[%c96_135, %c0_136], %172 {strides = array<i32>} : memref<288x256xbf16, #tpu.memory_space<vmem>>, vector<32x256xbf16>,
    %174 = arith.truncf %145 : vector<32x256xf32> to vector<32x256xbf16>
    %c128_137 = arith.constant 128 : index
    %c0_138 = arith.constant 0 : index
    %175 = vector.load %arg7[%c128_137, %c0_138] : memref<288x256xbf16, #tpu.memory_space<vmem>>, vector<32x256xbf16>
    tpu.vector_store %arg7[%c128_137, %c0_138], %174 {strides = array<i32>} : memref<288x256xbf16, #tpu.memory_space<vmem>>, vector<32x256xbf16>,
    %c255_i32_139 = arith.constant 255 : i32
    %176 = tpu.dynamic_rotate %145 by %c255_i32_139 dim 1 : vector<32x256xf32>, i32 -> vector<32x256xf32>
    %c5_140 = arith.constant 5 : index
    %c0_141 = arith.constant 0 : index
    %c0_142 = arith.constant 0 : index
    %177 = vector.load %arg4[%c5_140, %c0_141, %c0_142] : memref<9x1x256xf32, #tpu.memory_space<vmem>>, vector<1x1x256xf32>
    %178 = vector.shape_cast %177 : vector<1x1x256xf32> to vector<1x256xf32>
    %179 = vector.broadcast %178 : vector<1x256xf32> to vector<32x256xf32>
    %180 = arith.mulf %176, %179 : vector<32x256xf32>
    %181 = arith.truncf %180 : vector<32x256xf32> to vector<32x256xbf16>
    %c160_143 = arith.constant 160 : index
    %c0_144 = arith.constant 0 : index
    %182 = vector.load %arg7[%c160_143, %c0_144] : memref<288x256xbf16, #tpu.memory_space<vmem>>, vector<32x256xbf16>
    tpu.vector_store %arg7[%c160_143, %c0_144], %181 {strides = array<i32>} : memref<288x256xbf16, #tpu.memory_space<vmem>>, vector<32x256xbf16>,
    %c241_i32_145 = arith.constant 241 : i32
    %183 = tpu.dynamic_rotate %145 by %c241_i32_145 dim 1 : vector<32x256xf32>, i32 -> vector<32x256xf32>
    %c6_146 = arith.constant 6 : index
    %c0_147 = arith.constant 0 : index
    %c0_148 = arith.constant 0 : index
    %184 = vector.load %arg4[%c6_146, %c0_147, %c0_148] : memref<9x1x256xf32, #tpu.memory_space<vmem>>, vector<1x1x256xf32>
    %185 = vector.shape_cast %184 : vector<1x1x256xf32> to vector<1x256xf32>
    %186 = vector.broadcast %185 : vector<1x256xf32> to vector<32x256xf32>
    %187 = arith.mulf %183, %186 : vector<32x256xf32>
    %188 = arith.truncf %187 : vector<32x256xf32> to vector<32x256xbf16>
    %c192_149 = arith.constant 192 : index
    %c0_150 = arith.constant 0 : index
    %189 = vector.load %arg7[%c192_149, %c0_150] : memref<288x256xbf16, #tpu.memory_space<vmem>>, vector<32x256xbf16>
    tpu.vector_store %arg7[%c192_149, %c0_150], %188 {strides = array<i32>} : memref<288x256xbf16, #tpu.memory_space<vmem>>, vector<32x256xbf16>,
    %c240_i32_151 = arith.constant 240 : i32
    %190 = tpu.dynamic_rotate %145 by %c240_i32_151 dim 1 : vector<32x256xf32>, i32 -> vector<32x256xf32>
    %c7_152 = arith.constant 7 : index
    %c0_153 = arith.constant 0 : index
    %c0_154 = arith.constant 0 : index
    %191 = vector.load %arg4[%c7_152, %c0_153, %c0_154] : memref<9x1x256xf32, #tpu.memory_space<vmem>>, vector<1x1x256xf32>
    %192 = vector.shape_cast %191 : vector<1x1x256xf32> to vector<1x256xf32>
    %193 = vector.broadcast %192 : vector<1x256xf32> to vector<32x256xf32>
    %194 = arith.mulf %190, %193 : vector<32x256xf32>
    %195 = arith.truncf %194 : vector<32x256xf32> to vector<32x256xbf16>
    %c224_155 = arith.constant 224 : index
    %c0_156 = arith.constant 0 : index
    %196 = vector.load %arg7[%c224_155, %c0_156] : memref<288x256xbf16, #tpu.memory_space<vmem>>, vector<32x256xbf16>
    tpu.vector_store %arg7[%c224_155, %c0_156], %195 {strides = array<i32>} : memref<288x256xbf16, #tpu.memory_space<vmem>>, vector<32x256xbf16>,
    %c239_i32_157 = arith.constant 239 : i32
    %197 = tpu.dynamic_rotate %145 by %c239_i32_157 dim 1 : vector<32x256xf32>, i32 -> vector<32x256xf32>
    %c8_158 = arith.constant 8 : index
    %c0_159 = arith.constant 0 : index
    %c0_160 = arith.constant 0 : index
    %198 = vector.load %arg4[%c8_158, %c0_159, %c0_160] : memref<9x1x256xf32, #tpu.memory_space<vmem>>, vector<1x1x256xf32>
    %199 = vector.shape_cast %198 : vector<1x1x256xf32> to vector<1x256xf32>
    %200 = vector.broadcast %199 : vector<1x256xf32> to vector<32x256xf32>
    %201 = arith.mulf %197, %200 : vector<32x256xf32>
    %202 = arith.truncf %201 : vector<32x256xf32> to vector<32x256xbf16>
    %c256_161 = arith.constant 256 : index
    %c0_162 = arith.constant 0 : index
    %203 = vector.load %arg7[%c256_161, %c0_162] : memref<288x256xbf16, #tpu.memory_space<vmem>>, vector<32x256xbf16>
    tpu.vector_store %arg7[%c256_161, %c0_162], %202 {strides = array<i32>} : memref<288x256xbf16, #tpu.memory_space<vmem>>, vector<32x256xbf16>,
    %c2_163 = arith.constant 2 : index
    %c0_164 = arith.constant 0 : index
    %c0_165 = arith.constant 0 : index
    %204 = vector.load %arg2[%c2_163, %c0_164, %c0_165] : memref<6x32x288xbf16, #tpu.memory_space<vmem>>, vector<1x32x288xbf16>
    %205 = vector.shape_cast %204 : vector<1x32x288xbf16> to vector<32x288xbf16>
    %c2_166 = arith.constant 2 : index
    %c0_167 = arith.constant 0 : index
    %c0_168 = arith.constant 0 : index
    %206 = vector.load %arg3[%c2_166, %c0_167, %c0_168] : memref<6x32x1xf32, #tpu.memory_space<vmem>>, vector<1x32x1xf32>
    %207 = vector.shape_cast %206 : vector<1x32x1xf32> to vector<32x1xf32>
    %c0_169 = arith.constant 0 : index
    %c0_170 = arith.constant 0 : index
    %208 = vector.load %arg7[%c0_169, %c0_170] : memref<288x256xbf16, #tpu.memory_space<vmem>>, vector<288x256xbf16>
    %cst_171 = arith.constant dense<0.000000e+00> : vector<32x256xf32>
    %209 = tpu.matmul %205, %208, %cst_171 {dimension_numbers = #tpu.dot_dimension_numbers<[1], [0], [0], [1], [0, 0, 1, 1], [], []>} : vector<32x288xbf16>, vector<288x256xbf16>, vector<32x256xf32> -> vector<32x256xf32>
    %210 = vector.broadcast %207 : vector<32x1xf32> to vector<32x256xf32>
    %211 = arith.addf %209, %210 : vector<32x256xf32>
    %cst_172 = arith.constant 0.000000e+00 : f32
    %212 = vector.broadcast %cst_172 : f32 to vector<32x256xf32>
    %213 = arith.maximumf %211, %212 : vector<32x256xf32>
    %c0_173 = arith.constant 0 : index
    %c0_174 = arith.constant 0 : index
    %214 = vector.load %arg6[%c0_173, %c0_174] : memref<32x256xf32, #tpu.memory_space<vmem>>, vector<32x256xf32>
    tpu.vector_store %arg6[%c0_173, %c0_174], %213 {strides = array<i32>} : memref<32x256xf32, #tpu.memory_space<vmem>>, vector<32x256xf32>,
    %c0_175 = arith.constant 0 : index
    %c0_176 = arith.constant 0 : index
    %215 = vector.load %arg6[%c0_175, %c0_176] : memref<32x256xf32, #tpu.memory_space<vmem>>, vector<32x256xf32>
    %c17_i32_177 = arith.constant 17 : i32
    %216 = tpu.dynamic_rotate %215 by %c17_i32_177 dim 1 : vector<32x256xf32>, i32 -> vector<32x256xf32>
    %c0_178 = arith.constant 0 : index
    %c0_179 = arith.constant 0 : index
    %c0_180 = arith.constant 0 : index
    %217 = vector.load %arg4[%c0_178, %c0_179, %c0_180] : memref<9x1x256xf32, #tpu.memory_space<vmem>>, vector<1x1x256xf32>
    %218 = vector.shape_cast %217 : vector<1x1x256xf32> to vector<1x256xf32>
    %219 = vector.broadcast %218 : vector<1x256xf32> to vector<32x256xf32>
    %220 = arith.mulf %216, %219 : vector<32x256xf32>
    %221 = arith.truncf %220 : vector<32x256xf32> to vector<32x256xbf16>
    %c0_181 = arith.constant 0 : index
    %c0_182 = arith.constant 0 : index
    %222 = vector.load %arg7[%c0_181, %c0_182] : memref<288x256xbf16, #tpu.memory_space<vmem>>, vector<32x256xbf16>
    tpu.vector_store %arg7[%c0_181, %c0_182], %221 {strides = array<i32>} : memref<288x256xbf16, #tpu.memory_space<vmem>>, vector<32x256xbf16>,
    %c16_i32_183 = arith.constant 16 : i32
    %223 = tpu.dynamic_rotate %215 by %c16_i32_183 dim 1 : vector<32x256xf32>, i32 -> vector<32x256xf32>
    %c1_184 = arith.constant 1 : index
    %c0_185 = arith.constant 0 : index
    %c0_186 = arith.constant 0 : index
    %224 = vector.load %arg4[%c1_184, %c0_185, %c0_186] : memref<9x1x256xf32, #tpu.memory_space<vmem>>, vector<1x1x256xf32>
    %225 = vector.shape_cast %224 : vector<1x1x256xf32> to vector<1x256xf32>
    %226 = vector.broadcast %225 : vector<1x256xf32> to vector<32x256xf32>
    %227 = arith.mulf %223, %226 : vector<32x256xf32>
    %228 = arith.truncf %227 : vector<32x256xf32> to vector<32x256xbf16>
    %c32_187 = arith.constant 32 : index
    %c0_188 = arith.constant 0 : index
    %229 = vector.load %arg7[%c32_187, %c0_188] : memref<288x256xbf16, #tpu.memory_space<vmem>>, vector<32x256xbf16>
    tpu.vector_store %arg7[%c32_187, %c0_188], %228 {strides = array<i32>} : memref<288x256xbf16, #tpu.memory_space<vmem>>, vector<32x256xbf16>,
    %c15_i32_189 = arith.constant 15 : i32
    %230 = tpu.dynamic_rotate %215 by %c15_i32_189 dim 1 : vector<32x256xf32>, i32 -> vector<32x256xf32>
    %c2_190 = arith.constant 2 : index
    %c0_191 = arith.constant 0 : index
    %c0_192 = arith.constant 0 : index
    %231 = vector.load %arg4[%c2_190, %c0_191, %c0_192] : memref<9x1x256xf32, #tpu.memory_space<vmem>>, vector<1x1x256xf32>
    %232 = vector.shape_cast %231 : vector<1x1x256xf32> to vector<1x256xf32>
    %233 = vector.broadcast %232 : vector<1x256xf32> to vector<32x256xf32>
    %234 = arith.mulf %230, %233 : vector<32x256xf32>
    %235 = arith.truncf %234 : vector<32x256xf32> to vector<32x256xbf16>
    %c64_193 = arith.constant 64 : index
    %c0_194 = arith.constant 0 : index
    %236 = vector.load %arg7[%c64_193, %c0_194] : memref<288x256xbf16, #tpu.memory_space<vmem>>, vector<32x256xbf16>
    tpu.vector_store %arg7[%c64_193, %c0_194], %235 {strides = array<i32>} : memref<288x256xbf16, #tpu.memory_space<vmem>>, vector<32x256xbf16>,
    %c1_i32_195 = arith.constant 1 : i32
    %237 = tpu.dynamic_rotate %215 by %c1_i32_195 dim 1 : vector<32x256xf32>, i32 -> vector<32x256xf32>
    %c3_196 = arith.constant 3 : index
    %c0_197 = arith.constant 0 : index
    %c0_198 = arith.constant 0 : index
    %238 = vector.load %arg4[%c3_196, %c0_197, %c0_198] : memref<9x1x256xf32, #tpu.memory_space<vmem>>, vector<1x1x256xf32>
    %239 = vector.shape_cast %238 : vector<1x1x256xf32> to vector<1x256xf32>
    %240 = vector.broadcast %239 : vector<1x256xf32> to vector<32x256xf32>
    %241 = arith.mulf %237, %240 : vector<32x256xf32>
    %242 = arith.truncf %241 : vector<32x256xf32> to vector<32x256xbf16>
    %c96_199 = arith.constant 96 : index
    %c0_200 = arith.constant 0 : index
    %243 = vector.load %arg7[%c96_199, %c0_200] : memref<288x256xbf16, #tpu.memory_space<vmem>>, vector<32x256xbf16>
    tpu.vector_store %arg7[%c96_199, %c0_200], %242 {strides = array<i32>} : memref<288x256xbf16, #tpu.memory_space<vmem>>, vector<32x256xbf16>,
    %244 = arith.truncf %215 : vector<32x256xf32> to vector<32x256xbf16>
    %c128_201 = arith.constant 128 : index
    %c0_202 = arith.constant 0 : index
    %245 = vector.load %arg7[%c128_201, %c0_202] : memref<288x256xbf16, #tpu.memory_space<vmem>>, vector<32x256xbf16>
    tpu.vector_store %arg7[%c128_201, %c0_202], %244 {strides = array<i32>} : memref<288x256xbf16, #tpu.memory_space<vmem>>, vector<32x256xbf16>,
    %c255_i32_203 = arith.constant 255 : i32
    %246 = tpu.dynamic_rotate %215 by %c255_i32_203 dim 1 : vector<32x256xf32>, i32 -> vector<32x256xf32>
    %c5_204 = arith.constant 5 : index
    %c0_205 = arith.constant 0 : index
    %c0_206 = arith.constant 0 : index
    %247 = vector.load %arg4[%c5_204, %c0_205, %c0_206] : memref<9x1x256xf32, #tpu.memory_space<vmem>>, vector<1x1x256xf32>
    %248 = vector.shape_cast %247 : vector<1x1x256xf32> to vector<1x256xf32>
    %249 = vector.broadcast %248 : vector<1x256xf32> to vector<32x256xf32>
    %250 = arith.mulf %246, %249 : vector<32x256xf32>
    %251 = arith.truncf %250 : vector<32x256xf32> to vector<32x256xbf16>
    %c160_207 = arith.constant 160 : index
    %c0_208 = arith.constant 0 : index
    %252 = vector.load %arg7[%c160_207, %c0_208] : memref<288x256xbf16, #tpu.memory_space<vmem>>, vector<32x256xbf16>
    tpu.vector_store %arg7[%c160_207, %c0_208], %251 {strides = array<i32>} : memref<288x256xbf16, #tpu.memory_space<vmem>>, vector<32x256xbf16>,
    %c241_i32_209 = arith.constant 241 : i32
    %253 = tpu.dynamic_rotate %215 by %c241_i32_209 dim 1 : vector<32x256xf32>, i32 -> vector<32x256xf32>
    %c6_210 = arith.constant 6 : index
    %c0_211 = arith.constant 0 : index
    %c0_212 = arith.constant 0 : index
    %254 = vector.load %arg4[%c6_210, %c0_211, %c0_212] : memref<9x1x256xf32, #tpu.memory_space<vmem>>, vector<1x1x256xf32>
    %255 = vector.shape_cast %254 : vector<1x1x256xf32> to vector<1x256xf32>
    %256 = vector.broadcast %255 : vector<1x256xf32> to vector<32x256xf32>
    %257 = arith.mulf %253, %256 : vector<32x256xf32>
    %258 = arith.truncf %257 : vector<32x256xf32> to vector<32x256xbf16>
    %c192_213 = arith.constant 192 : index
    %c0_214 = arith.constant 0 : index
    %259 = vector.load %arg7[%c192_213, %c0_214] : memref<288x256xbf16, #tpu.memory_space<vmem>>, vector<32x256xbf16>
    tpu.vector_store %arg7[%c192_213, %c0_214], %258 {strides = array<i32>} : memref<288x256xbf16, #tpu.memory_space<vmem>>, vector<32x256xbf16>,
    %c240_i32_215 = arith.constant 240 : i32
    %260 = tpu.dynamic_rotate %215 by %c240_i32_215 dim 1 : vector<32x256xf32>, i32 -> vector<32x256xf32>
    %c7_216 = arith.constant 7 : index
    %c0_217 = arith.constant 0 : index
    %c0_218 = arith.constant 0 : index
    %261 = vector.load %arg4[%c7_216, %c0_217, %c0_218] : memref<9x1x256xf32, #tpu.memory_space<vmem>>, vector<1x1x256xf32>
    %262 = vector.shape_cast %261 : vector<1x1x256xf32> to vector<1x256xf32>
    %263 = vector.broadcast %262 : vector<1x256xf32> to vector<32x256xf32>
    %264 = arith.mulf %260, %263 : vector<32x256xf32>
    %265 = arith.truncf %264 : vector<32x256xf32> to vector<32x256xbf16>
    %c224_219 = arith.constant 224 : index
    %c0_220 = arith.constant 0 : index
    %266 = vector.load %arg7[%c224_219, %c0_220] : memref<288x256xbf16, #tpu.memory_space<vmem>>, vector<32x256xbf16>
    tpu.vector_store %arg7[%c224_219, %c0_220], %265 {strides = array<i32>} : memref<288x256xbf16, #tpu.memory_space<vmem>>, vector<32x256xbf16>,
    %c239_i32_221 = arith.constant 239 : i32
    %267 = tpu.dynamic_rotate %215 by %c239_i32_221 dim 1 : vector<32x256xf32>, i32 -> vector<32x256xf32>
    %c8_222 = arith.constant 8 : index
    %c0_223 = arith.constant 0 : index
    %c0_224 = arith.constant 0 : index
    %268 = vector.load %arg4[%c8_222, %c0_223, %c0_224] : memref<9x1x256xf32, #tpu.memory_space<vmem>>, vector<1x1x256xf32>
    %269 = vector.shape_cast %268 : vector<1x1x256xf32> to vector<1x256xf32>
    %270 = vector.broadcast %269 : vector<1x256xf32> to vector<32x256xf32>
    %271 = arith.mulf %267, %270 : vector<32x256xf32>
    %272 = arith.truncf %271 : vector<32x256xf32> to vector<32x256xbf16>
    %c256_225 = arith.constant 256 : index
    %c0_226 = arith.constant 0 : index
    %273 = vector.load %arg7[%c256_225, %c0_226] : memref<288x256xbf16, #tpu.memory_space<vmem>>, vector<32x256xbf16>
    tpu.vector_store %arg7[%c256_225, %c0_226], %272 {strides = array<i32>} : memref<288x256xbf16, #tpu.memory_space<vmem>>, vector<32x256xbf16>,
    %c3_227 = arith.constant 3 : index
    %c0_228 = arith.constant 0 : index
    %c0_229 = arith.constant 0 : index
    %274 = vector.load %arg2[%c3_227, %c0_228, %c0_229] : memref<6x32x288xbf16, #tpu.memory_space<vmem>>, vector<1x32x288xbf16>
    %275 = vector.shape_cast %274 : vector<1x32x288xbf16> to vector<32x288xbf16>
    %c3_230 = arith.constant 3 : index
    %c0_231 = arith.constant 0 : index
    %c0_232 = arith.constant 0 : index
    %276 = vector.load %arg3[%c3_230, %c0_231, %c0_232] : memref<6x32x1xf32, #tpu.memory_space<vmem>>, vector<1x32x1xf32>
    %277 = vector.shape_cast %276 : vector<1x32x1xf32> to vector<32x1xf32>
    %c0_233 = arith.constant 0 : index
    %c0_234 = arith.constant 0 : index
    %278 = vector.load %arg7[%c0_233, %c0_234] : memref<288x256xbf16, #tpu.memory_space<vmem>>, vector<288x256xbf16>
    %cst_235 = arith.constant dense<0.000000e+00> : vector<32x256xf32>
    %279 = tpu.matmul %275, %278, %cst_235 {dimension_numbers = #tpu.dot_dimension_numbers<[1], [0], [0], [1], [0, 0, 1, 1], [], []>} : vector<32x288xbf16>, vector<288x256xbf16>, vector<32x256xf32> -> vector<32x256xf32>
    %280 = vector.broadcast %277 : vector<32x1xf32> to vector<32x256xf32>
    %281 = arith.addf %279, %280 : vector<32x256xf32>
    %cst_236 = arith.constant 0.000000e+00 : f32
    %282 = vector.broadcast %cst_236 : f32 to vector<32x256xf32>
    %283 = arith.maximumf %281, %282 : vector<32x256xf32>
    %c0_237 = arith.constant 0 : index
    %c0_238 = arith.constant 0 : index
    %284 = vector.load %arg6[%c0_237, %c0_238] : memref<32x256xf32, #tpu.memory_space<vmem>>, vector<32x256xf32>
    tpu.vector_store %arg6[%c0_237, %c0_238], %283 {strides = array<i32>} : memref<32x256xf32, #tpu.memory_space<vmem>>, vector<32x256xf32>,
    %c0_239 = arith.constant 0 : index
    %c0_240 = arith.constant 0 : index
    %285 = vector.load %arg6[%c0_239, %c0_240] : memref<32x256xf32, #tpu.memory_space<vmem>>, vector<32x256xf32>
    %c17_i32_241 = arith.constant 17 : i32
    %286 = tpu.dynamic_rotate %285 by %c17_i32_241 dim 1 : vector<32x256xf32>, i32 -> vector<32x256xf32>
    %c0_242 = arith.constant 0 : index
    %c0_243 = arith.constant 0 : index
    %c0_244 = arith.constant 0 : index
    %287 = vector.load %arg4[%c0_242, %c0_243, %c0_244] : memref<9x1x256xf32, #tpu.memory_space<vmem>>, vector<1x1x256xf32>
    %288 = vector.shape_cast %287 : vector<1x1x256xf32> to vector<1x256xf32>
    %289 = vector.broadcast %288 : vector<1x256xf32> to vector<32x256xf32>
    %290 = arith.mulf %286, %289 : vector<32x256xf32>
    %291 = arith.truncf %290 : vector<32x256xf32> to vector<32x256xbf16>
    %c0_245 = arith.constant 0 : index
    %c0_246 = arith.constant 0 : index
    %292 = vector.load %arg7[%c0_245, %c0_246] : memref<288x256xbf16, #tpu.memory_space<vmem>>, vector<32x256xbf16>
    tpu.vector_store %arg7[%c0_245, %c0_246], %291 {strides = array<i32>} : memref<288x256xbf16, #tpu.memory_space<vmem>>, vector<32x256xbf16>,
    %c16_i32_247 = arith.constant 16 : i32
    %293 = tpu.dynamic_rotate %285 by %c16_i32_247 dim 1 : vector<32x256xf32>, i32 -> vector<32x256xf32>
    %c1_248 = arith.constant 1 : index
    %c0_249 = arith.constant 0 : index
    %c0_250 = arith.constant 0 : index
    %294 = vector.load %arg4[%c1_248, %c0_249, %c0_250] : memref<9x1x256xf32, #tpu.memory_space<vmem>>, vector<1x1x256xf32>
    %295 = vector.shape_cast %294 : vector<1x1x256xf32> to vector<1x256xf32>
    %296 = vector.broadcast %295 : vector<1x256xf32> to vector<32x256xf32>
    %297 = arith.mulf %293, %296 : vector<32x256xf32>
    %298 = arith.truncf %297 : vector<32x256xf32> to vector<32x256xbf16>
    %c32_251 = arith.constant 32 : index
    %c0_252 = arith.constant 0 : index
    %299 = vector.load %arg7[%c32_251, %c0_252] : memref<288x256xbf16, #tpu.memory_space<vmem>>, vector<32x256xbf16>
    tpu.vector_store %arg7[%c32_251, %c0_252], %298 {strides = array<i32>} : memref<288x256xbf16, #tpu.memory_space<vmem>>, vector<32x256xbf16>,
    %c15_i32_253 = arith.constant 15 : i32
    %300 = tpu.dynamic_rotate %285 by %c15_i32_253 dim 1 : vector<32x256xf32>, i32 -> vector<32x256xf32>
    %c2_254 = arith.constant 2 : index
    %c0_255 = arith.constant 0 : index
    %c0_256 = arith.constant 0 : index
    %301 = vector.load %arg4[%c2_254, %c0_255, %c0_256] : memref<9x1x256xf32, #tpu.memory_space<vmem>>, vector<1x1x256xf32>
    %302 = vector.shape_cast %301 : vector<1x1x256xf32> to vector<1x256xf32>
    %303 = vector.broadcast %302 : vector<1x256xf32> to vector<32x256xf32>
    %304 = arith.mulf %300, %303 : vector<32x256xf32>
    %305 = arith.truncf %304 : vector<32x256xf32> to vector<32x256xbf16>
    %c64_257 = arith.constant 64 : index
    %c0_258 = arith.constant 0 : index
    %306 = vector.load %arg7[%c64_257, %c0_258] : memref<288x256xbf16, #tpu.memory_space<vmem>>, vector<32x256xbf16>
    tpu.vector_store %arg7[%c64_257, %c0_258], %305 {strides = array<i32>} : memref<288x256xbf16, #tpu.memory_space<vmem>>, vector<32x256xbf16>,
    %c1_i32_259 = arith.constant 1 : i32
    %307 = tpu.dynamic_rotate %285 by %c1_i32_259 dim 1 : vector<32x256xf32>, i32 -> vector<32x256xf32>
    %c3_260 = arith.constant 3 : index
    %c0_261 = arith.constant 0 : index
    %c0_262 = arith.constant 0 : index
    %308 = vector.load %arg4[%c3_260, %c0_261, %c0_262] : memref<9x1x256xf32, #tpu.memory_space<vmem>>, vector<1x1x256xf32>
    %309 = vector.shape_cast %308 : vector<1x1x256xf32> to vector<1x256xf32>
    %310 = vector.broadcast %309 : vector<1x256xf32> to vector<32x256xf32>
    %311 = arith.mulf %307, %310 : vector<32x256xf32>
    %312 = arith.truncf %311 : vector<32x256xf32> to vector<32x256xbf16>
    %c96_263 = arith.constant 96 : index
    %c0_264 = arith.constant 0 : index
    %313 = vector.load %arg7[%c96_263, %c0_264] : memref<288x256xbf16, #tpu.memory_space<vmem>>, vector<32x256xbf16>
    tpu.vector_store %arg7[%c96_263, %c0_264], %312 {strides = array<i32>} : memref<288x256xbf16, #tpu.memory_space<vmem>>, vector<32x256xbf16>,
    %314 = arith.truncf %285 : vector<32x256xf32> to vector<32x256xbf16>
    %c128_265 = arith.constant 128 : index
    %c0_266 = arith.constant 0 : index
    %315 = vector.load %arg7[%c128_265, %c0_266] : memref<288x256xbf16, #tpu.memory_space<vmem>>, vector<32x256xbf16>
    tpu.vector_store %arg7[%c128_265, %c0_266], %314 {strides = array<i32>} : memref<288x256xbf16, #tpu.memory_space<vmem>>, vector<32x256xbf16>,
    %c255_i32_267 = arith.constant 255 : i32
    %316 = tpu.dynamic_rotate %285 by %c255_i32_267 dim 1 : vector<32x256xf32>, i32 -> vector<32x256xf32>
    %c5_268 = arith.constant 5 : index
    %c0_269 = arith.constant 0 : index
    %c0_270 = arith.constant 0 : index
    %317 = vector.load %arg4[%c5_268, %c0_269, %c0_270] : memref<9x1x256xf32, #tpu.memory_space<vmem>>, vector<1x1x256xf32>
    %318 = vector.shape_cast %317 : vector<1x1x256xf32> to vector<1x256xf32>
    %319 = vector.broadcast %318 : vector<1x256xf32> to vector<32x256xf32>
    %320 = arith.mulf %316, %319 : vector<32x256xf32>
    %321 = arith.truncf %320 : vector<32x256xf32> to vector<32x256xbf16>
    %c160_271 = arith.constant 160 : index
    %c0_272 = arith.constant 0 : index
    %322 = vector.load %arg7[%c160_271, %c0_272] : memref<288x256xbf16, #tpu.memory_space<vmem>>, vector<32x256xbf16>
    tpu.vector_store %arg7[%c160_271, %c0_272], %321 {strides = array<i32>} : memref<288x256xbf16, #tpu.memory_space<vmem>>, vector<32x256xbf16>,
    %c241_i32_273 = arith.constant 241 : i32
    %323 = tpu.dynamic_rotate %285 by %c241_i32_273 dim 1 : vector<32x256xf32>, i32 -> vector<32x256xf32>
    %c6_274 = arith.constant 6 : index
    %c0_275 = arith.constant 0 : index
    %c0_276 = arith.constant 0 : index
    %324 = vector.load %arg4[%c6_274, %c0_275, %c0_276] : memref<9x1x256xf32, #tpu.memory_space<vmem>>, vector<1x1x256xf32>
    %325 = vector.shape_cast %324 : vector<1x1x256xf32> to vector<1x256xf32>
    %326 = vector.broadcast %325 : vector<1x256xf32> to vector<32x256xf32>
    %327 = arith.mulf %323, %326 : vector<32x256xf32>
    %328 = arith.truncf %327 : vector<32x256xf32> to vector<32x256xbf16>
    %c192_277 = arith.constant 192 : index
    %c0_278 = arith.constant 0 : index
    %329 = vector.load %arg7[%c192_277, %c0_278] : memref<288x256xbf16, #tpu.memory_space<vmem>>, vector<32x256xbf16>
    tpu.vector_store %arg7[%c192_277, %c0_278], %328 {strides = array<i32>} : memref<288x256xbf16, #tpu.memory_space<vmem>>, vector<32x256xbf16>,
    %c240_i32_279 = arith.constant 240 : i32
    %330 = tpu.dynamic_rotate %285 by %c240_i32_279 dim 1 : vector<32x256xf32>, i32 -> vector<32x256xf32>
    %c7_280 = arith.constant 7 : index
    %c0_281 = arith.constant 0 : index
    %c0_282 = arith.constant 0 : index
    %331 = vector.load %arg4[%c7_280, %c0_281, %c0_282] : memref<9x1x256xf32, #tpu.memory_space<vmem>>, vector<1x1x256xf32>
    %332 = vector.shape_cast %331 : vector<1x1x256xf32> to vector<1x256xf32>
    %333 = vector.broadcast %332 : vector<1x256xf32> to vector<32x256xf32>
    %334 = arith.mulf %330, %333 : vector<32x256xf32>
    %335 = arith.truncf %334 : vector<32x256xf32> to vector<32x256xbf16>
    %c224_283 = arith.constant 224 : index
    %c0_284 = arith.constant 0 : index
    %336 = vector.load %arg7[%c224_283, %c0_284] : memref<288x256xbf16, #tpu.memory_space<vmem>>, vector<32x256xbf16>
    tpu.vector_store %arg7[%c224_283, %c0_284], %335 {strides = array<i32>} : memref<288x256xbf16, #tpu.memory_space<vmem>>, vector<32x256xbf16>,
    %c239_i32_285 = arith.constant 239 : i32
    %337 = tpu.dynamic_rotate %285 by %c239_i32_285 dim 1 : vector<32x256xf32>, i32 -> vector<32x256xf32>
    %c8_286 = arith.constant 8 : index
    %c0_287 = arith.constant 0 : index
    %c0_288 = arith.constant 0 : index
    %338 = vector.load %arg4[%c8_286, %c0_287, %c0_288] : memref<9x1x256xf32, #tpu.memory_space<vmem>>, vector<1x1x256xf32>
    %339 = vector.shape_cast %338 : vector<1x1x256xf32> to vector<1x256xf32>
    %340 = vector.broadcast %339 : vector<1x256xf32> to vector<32x256xf32>
    %341 = arith.mulf %337, %340 : vector<32x256xf32>
    %342 = arith.truncf %341 : vector<32x256xf32> to vector<32x256xbf16>
    %c256_289 = arith.constant 256 : index
    %c0_290 = arith.constant 0 : index
    %343 = vector.load %arg7[%c256_289, %c0_290] : memref<288x256xbf16, #tpu.memory_space<vmem>>, vector<32x256xbf16>
    tpu.vector_store %arg7[%c256_289, %c0_290], %342 {strides = array<i32>} : memref<288x256xbf16, #tpu.memory_space<vmem>>, vector<32x256xbf16>,
    %c4 = arith.constant 4 : index
    %c0_291 = arith.constant 0 : index
    %c0_292 = arith.constant 0 : index
    %344 = vector.load %arg2[%c4, %c0_291, %c0_292] : memref<6x32x288xbf16, #tpu.memory_space<vmem>>, vector<1x32x288xbf16>
    %345 = vector.shape_cast %344 : vector<1x32x288xbf16> to vector<32x288xbf16>
    %c4_293 = arith.constant 4 : index
    %c0_294 = arith.constant 0 : index
    %c0_295 = arith.constant 0 : index
    %346 = vector.load %arg3[%c4_293, %c0_294, %c0_295] : memref<6x32x1xf32, #tpu.memory_space<vmem>>, vector<1x32x1xf32>
    %347 = vector.shape_cast %346 : vector<1x32x1xf32> to vector<32x1xf32>
    %c0_296 = arith.constant 0 : index
    %c0_297 = arith.constant 0 : index
    %348 = vector.load %arg7[%c0_296, %c0_297] : memref<288x256xbf16, #tpu.memory_space<vmem>>, vector<288x256xbf16>
    %cst_298 = arith.constant dense<0.000000e+00> : vector<32x256xf32>
    %349 = tpu.matmul %345, %348, %cst_298 {dimension_numbers = #tpu.dot_dimension_numbers<[1], [0], [0], [1], [0, 0, 1, 1], [], []>} : vector<32x288xbf16>, vector<288x256xbf16>, vector<32x256xf32> -> vector<32x256xf32>
    %350 = vector.broadcast %347 : vector<32x1xf32> to vector<32x256xf32>
    %351 = arith.addf %349, %350 : vector<32x256xf32>
    %cst_299 = arith.constant 0.000000e+00 : f32
    %352 = vector.broadcast %cst_299 : f32 to vector<32x256xf32>
    %353 = arith.maximumf %351, %352 : vector<32x256xf32>
    %c0_300 = arith.constant 0 : index
    %c0_301 = arith.constant 0 : index
    %354 = vector.load %arg6[%c0_300, %c0_301] : memref<32x256xf32, #tpu.memory_space<vmem>>, vector<32x256xf32>
    tpu.vector_store %arg6[%c0_300, %c0_301], %353 {strides = array<i32>} : memref<32x256xf32, #tpu.memory_space<vmem>>, vector<32x256xf32>,
    %c0_302 = arith.constant 0 : index
    %c0_303 = arith.constant 0 : index
    %355 = vector.load %arg6[%c0_302, %c0_303] : memref<32x256xf32, #tpu.memory_space<vmem>>, vector<32x256xf32>
    %c17_i32_304 = arith.constant 17 : i32
    %356 = tpu.dynamic_rotate %355 by %c17_i32_304 dim 1 : vector<32x256xf32>, i32 -> vector<32x256xf32>
    %c0_305 = arith.constant 0 : index
    %c0_306 = arith.constant 0 : index
    %c0_307 = arith.constant 0 : index
    %357 = vector.load %arg4[%c0_305, %c0_306, %c0_307] : memref<9x1x256xf32, #tpu.memory_space<vmem>>, vector<1x1x256xf32>
    %358 = vector.shape_cast %357 : vector<1x1x256xf32> to vector<1x256xf32>
    %359 = vector.broadcast %358 : vector<1x256xf32> to vector<32x256xf32>
    %360 = arith.mulf %356, %359 : vector<32x256xf32>
    %361 = arith.truncf %360 : vector<32x256xf32> to vector<32x256xbf16>
    %c0_308 = arith.constant 0 : index
    %c0_309 = arith.constant 0 : index
    %362 = vector.load %arg7[%c0_308, %c0_309] : memref<288x256xbf16, #tpu.memory_space<vmem>>, vector<32x256xbf16>
    tpu.vector_store %arg7[%c0_308, %c0_309], %361 {strides = array<i32>} : memref<288x256xbf16, #tpu.memory_space<vmem>>, vector<32x256xbf16>,
    %c16_i32_310 = arith.constant 16 : i32
    %363 = tpu.dynamic_rotate %355 by %c16_i32_310 dim 1 : vector<32x256xf32>, i32 -> vector<32x256xf32>
    %c1_311 = arith.constant 1 : index
    %c0_312 = arith.constant 0 : index
    %c0_313 = arith.constant 0 : index
    %364 = vector.load %arg4[%c1_311, %c0_312, %c0_313] : memref<9x1x256xf32, #tpu.memory_space<vmem>>, vector<1x1x256xf32>
    %365 = vector.shape_cast %364 : vector<1x1x256xf32> to vector<1x256xf32>
    %366 = vector.broadcast %365 : vector<1x256xf32> to vector<32x256xf32>
    %367 = arith.mulf %363, %366 : vector<32x256xf32>
    %368 = arith.truncf %367 : vector<32x256xf32> to vector<32x256xbf16>
    %c32_314 = arith.constant 32 : index
    %c0_315 = arith.constant 0 : index
    %369 = vector.load %arg7[%c32_314, %c0_315] : memref<288x256xbf16, #tpu.memory_space<vmem>>, vector<32x256xbf16>
    tpu.vector_store %arg7[%c32_314, %c0_315], %368 {strides = array<i32>} : memref<288x256xbf16, #tpu.memory_space<vmem>>, vector<32x256xbf16>,
    %c15_i32_316 = arith.constant 15 : i32
    %370 = tpu.dynamic_rotate %355 by %c15_i32_316 dim 1 : vector<32x256xf32>, i32 -> vector<32x256xf32>
    %c2_317 = arith.constant 2 : index
    %c0_318 = arith.constant 0 : index
    %c0_319 = arith.constant 0 : index
    %371 = vector.load %arg4[%c2_317, %c0_318, %c0_319] : memref<9x1x256xf32, #tpu.memory_space<vmem>>, vector<1x1x256xf32>
    %372 = vector.shape_cast %371 : vector<1x1x256xf32> to vector<1x256xf32>
    %373 = vector.broadcast %372 : vector<1x256xf32> to vector<32x256xf32>
    %374 = arith.mulf %370, %373 : vector<32x256xf32>
    %375 = arith.truncf %374 : vector<32x256xf32> to vector<32x256xbf16>
    %c64_320 = arith.constant 64 : index
    %c0_321 = arith.constant 0 : index
    %376 = vector.load %arg7[%c64_320, %c0_321] : memref<288x256xbf16, #tpu.memory_space<vmem>>, vector<32x256xbf16>
    tpu.vector_store %arg7[%c64_320, %c0_321], %375 {strides = array<i32>} : memref<288x256xbf16, #tpu.memory_space<vmem>>, vector<32x256xbf16>,
    %c1_i32_322 = arith.constant 1 : i32
    %377 = tpu.dynamic_rotate %355 by %c1_i32_322 dim 1 : vector<32x256xf32>, i32 -> vector<32x256xf32>
    %c3_323 = arith.constant 3 : index
    %c0_324 = arith.constant 0 : index
    %c0_325 = arith.constant 0 : index
    %378 = vector.load %arg4[%c3_323, %c0_324, %c0_325] : memref<9x1x256xf32, #tpu.memory_space<vmem>>, vector<1x1x256xf32>
    %379 = vector.shape_cast %378 : vector<1x1x256xf32> to vector<1x256xf32>
    %380 = vector.broadcast %379 : vector<1x256xf32> to vector<32x256xf32>
    %381 = arith.mulf %377, %380 : vector<32x256xf32>
    %382 = arith.truncf %381 : vector<32x256xf32> to vector<32x256xbf16>
    %c96_326 = arith.constant 96 : index
    %c0_327 = arith.constant 0 : index
    %383 = vector.load %arg7[%c96_326, %c0_327] : memref<288x256xbf16, #tpu.memory_space<vmem>>, vector<32x256xbf16>
    tpu.vector_store %arg7[%c96_326, %c0_327], %382 {strides = array<i32>} : memref<288x256xbf16, #tpu.memory_space<vmem>>, vector<32x256xbf16>,
    %384 = arith.truncf %355 : vector<32x256xf32> to vector<32x256xbf16>
    %c128_328 = arith.constant 128 : index
    %c0_329 = arith.constant 0 : index
    %385 = vector.load %arg7[%c128_328, %c0_329] : memref<288x256xbf16, #tpu.memory_space<vmem>>, vector<32x256xbf16>
    tpu.vector_store %arg7[%c128_328, %c0_329], %384 {strides = array<i32>} : memref<288x256xbf16, #tpu.memory_space<vmem>>, vector<32x256xbf16>,
    %c255_i32_330 = arith.constant 255 : i32
    %386 = tpu.dynamic_rotate %355 by %c255_i32_330 dim 1 : vector<32x256xf32>, i32 -> vector<32x256xf32>
    %c5_331 = arith.constant 5 : index
    %c0_332 = arith.constant 0 : index
    %c0_333 = arith.constant 0 : index
    %387 = vector.load %arg4[%c5_331, %c0_332, %c0_333] : memref<9x1x256xf32, #tpu.memory_space<vmem>>, vector<1x1x256xf32>
    %388 = vector.shape_cast %387 : vector<1x1x256xf32> to vector<1x256xf32>
    %389 = vector.broadcast %388 : vector<1x256xf32> to vector<32x256xf32>
    %390 = arith.mulf %386, %389 : vector<32x256xf32>
    %391 = arith.truncf %390 : vector<32x256xf32> to vector<32x256xbf16>
    %c160_334 = arith.constant 160 : index
    %c0_335 = arith.constant 0 : index
    %392 = vector.load %arg7[%c160_334, %c0_335] : memref<288x256xbf16, #tpu.memory_space<vmem>>, vector<32x256xbf16>
    tpu.vector_store %arg7[%c160_334, %c0_335], %391 {strides = array<i32>} : memref<288x256xbf16, #tpu.memory_space<vmem>>, vector<32x256xbf16>,
    %c241_i32_336 = arith.constant 241 : i32
    %393 = tpu.dynamic_rotate %355 by %c241_i32_336 dim 1 : vector<32x256xf32>, i32 -> vector<32x256xf32>
    %c6_337 = arith.constant 6 : index
    %c0_338 = arith.constant 0 : index
    %c0_339 = arith.constant 0 : index
    %394 = vector.load %arg4[%c6_337, %c0_338, %c0_339] : memref<9x1x256xf32, #tpu.memory_space<vmem>>, vector<1x1x256xf32>
    %395 = vector.shape_cast %394 : vector<1x1x256xf32> to vector<1x256xf32>
    %396 = vector.broadcast %395 : vector<1x256xf32> to vector<32x256xf32>
    %397 = arith.mulf %393, %396 : vector<32x256xf32>
    %398 = arith.truncf %397 : vector<32x256xf32> to vector<32x256xbf16>
    %c192_340 = arith.constant 192 : index
    %c0_341 = arith.constant 0 : index
    %399 = vector.load %arg7[%c192_340, %c0_341] : memref<288x256xbf16, #tpu.memory_space<vmem>>, vector<32x256xbf16>
    tpu.vector_store %arg7[%c192_340, %c0_341], %398 {strides = array<i32>} : memref<288x256xbf16, #tpu.memory_space<vmem>>, vector<32x256xbf16>,
    %c240_i32_342 = arith.constant 240 : i32
    %400 = tpu.dynamic_rotate %355 by %c240_i32_342 dim 1 : vector<32x256xf32>, i32 -> vector<32x256xf32>
    %c7_343 = arith.constant 7 : index
    %c0_344 = arith.constant 0 : index
    %c0_345 = arith.constant 0 : index
    %401 = vector.load %arg4[%c7_343, %c0_344, %c0_345] : memref<9x1x256xf32, #tpu.memory_space<vmem>>, vector<1x1x256xf32>
    %402 = vector.shape_cast %401 : vector<1x1x256xf32> to vector<1x256xf32>
    %403 = vector.broadcast %402 : vector<1x256xf32> to vector<32x256xf32>
    %404 = arith.mulf %400, %403 : vector<32x256xf32>
    %405 = arith.truncf %404 : vector<32x256xf32> to vector<32x256xbf16>
    %c224_346 = arith.constant 224 : index
    %c0_347 = arith.constant 0 : index
    %406 = vector.load %arg7[%c224_346, %c0_347] : memref<288x256xbf16, #tpu.memory_space<vmem>>, vector<32x256xbf16>
    tpu.vector_store %arg7[%c224_346, %c0_347], %405 {strides = array<i32>} : memref<288x256xbf16, #tpu.memory_space<vmem>>, vector<32x256xbf16>,
    %c239_i32_348 = arith.constant 239 : i32
    %407 = tpu.dynamic_rotate %355 by %c239_i32_348 dim 1 : vector<32x256xf32>, i32 -> vector<32x256xf32>
    %c8_349 = arith.constant 8 : index
    %c0_350 = arith.constant 0 : index
    %c0_351 = arith.constant 0 : index
    %408 = vector.load %arg4[%c8_349, %c0_350, %c0_351] : memref<9x1x256xf32, #tpu.memory_space<vmem>>, vector<1x1x256xf32>
    %409 = vector.shape_cast %408 : vector<1x1x256xf32> to vector<1x256xf32>
    %410 = vector.broadcast %409 : vector<1x256xf32> to vector<32x256xf32>
    %411 = arith.mulf %407, %410 : vector<32x256xf32>
    %412 = arith.truncf %411 : vector<32x256xf32> to vector<32x256xbf16>
    %c256_352 = arith.constant 256 : index
    %c0_353 = arith.constant 0 : index
    %413 = vector.load %arg7[%c256_352, %c0_353] : memref<288x256xbf16, #tpu.memory_space<vmem>>, vector<32x256xbf16>
    tpu.vector_store %arg7[%c256_352, %c0_353], %412 {strides = array<i32>} : memref<288x256xbf16, #tpu.memory_space<vmem>>, vector<32x256xbf16>,
    %c5_354 = arith.constant 5 : index
    %c0_355 = arith.constant 0 : index
    %c0_356 = arith.constant 0 : index
    %414 = vector.load %arg2[%c5_354, %c0_355, %c0_356] : memref<6x32x288xbf16, #tpu.memory_space<vmem>>, vector<1x32x288xbf16>
    %415 = vector.shape_cast %414 : vector<1x32x288xbf16> to vector<32x288xbf16>
    %416 = vector.extract_strided_slice %415 {offsets = [0, 0], sizes = [8, 288], strides = [1, 1]} : vector<32x288xbf16> to vector<8x288xbf16>
    %c5_357 = arith.constant 5 : index
    %c0_358 = arith.constant 0 : index
    %c0_359 = arith.constant 0 : index
    %417 = vector.load %arg3[%c5_357, %c0_358, %c0_359] : memref<6x32x1xf32, #tpu.memory_space<vmem>>, vector<1x32x1xf32>
    %418 = vector.shape_cast %417 : vector<1x32x1xf32> to vector<32x1xf32>
    %419 = vector.extract_strided_slice %418 {offsets = [0, 0], sizes = [8, 1], strides = [1, 1]} : vector<32x1xf32> to vector<8x1xf32>
    %c0_360 = arith.constant 0 : index
    %c0_361 = arith.constant 0 : index
    %420 = vector.load %arg7[%c0_360, %c0_361] : memref<288x256xbf16, #tpu.memory_space<vmem>>, vector<288x256xbf16>
    %cst_362 = arith.constant dense<0.000000e+00> : vector<8x256xf32>
    %421 = tpu.matmul %416, %420, %cst_362 {dimension_numbers = #tpu.dot_dimension_numbers<[1], [0], [0], [1], [0, 0, 1, 1], [], []>} : vector<8x288xbf16>, vector<288x256xbf16>, vector<8x256xf32> -> vector<8x256xf32>
    %422 = vector.broadcast %419 : vector<8x1xf32> to vector<8x256xf32>
    %423 = arith.addf %421, %422 : vector<8x256xf32>
    %424 = arith.negf %423 : vector<8x256xf32>
    %425 = math.exp %424 : vector<8x256xf32>
    %cst_363 = arith.constant 1.000000e+00 : f32
    %426 = vector.broadcast %cst_363 : f32 to vector<8x256xf32>
    %427 = arith.addf %426, %425 : vector<8x256xf32>
    %428 = arith.divf %426, %427 : vector<8x256xf32>
    %c0_364 = arith.constant 0 : index
    %c0_365 = arith.constant 0 : index
    %c0_366 = arith.constant 0 : index
    %429 = vector.load %arg5[%c0_364, %c0_365, %c0_366] : memref<1x8x256xf32, #tpu.memory_space<vmem>>, vector<1x8x256xf32>
    %430 = vector.shape_cast %429 : vector<1x8x256xf32> to vector<8x256xf32>
    %431 = vector.shape_cast %428 : vector<8x256xf32> to vector<1x8x256xf32>
    tpu.vector_store %arg5[%c0_364, %c0_365, %c0_366], %431 {strides = array<i32>} : memref<1x8x256xf32, #tpu.memory_space<vmem>>, vector<1x8x256xf32>,
    return
  }
  func.func @transform_0(%arg0: i32) -> (i32, i32, i32) {
    %c0_i32 = arith.constant 0 : i32
    %c0_i32_0 = arith.constant 0 : i32
    %c0_i32_1 = arith.constant 0 : i32
    return %arg0, %c0_i32, %c0_i32_0 : i32, i32, i32
  }
  func.func @transform_1(%arg0: i32) -> (i32, i32, i32) {
    %c0_i32 = arith.constant 0 : i32
    %c0_i32_0 = arith.constant 0 : i32
    %c0_i32_1 = arith.constant 0 : i32
    %c0_i32_2 = arith.constant 0 : i32
    return %c0_i32, %c0_i32_0, %c0_i32_1 : i32, i32, i32
  }
  func.func @transform_2(%arg0: i32) -> (i32, i32, i32) {
    %c0_i32 = arith.constant 0 : i32
    %c0_i32_0 = arith.constant 0 : i32
    %c0_i32_1 = arith.constant 0 : i32
    %c0_i32_2 = arith.constant 0 : i32
    return %c0_i32, %c0_i32_0, %c0_i32_1 : i32, i32, i32
  }
  func.func @transform_3(%arg0: i32) -> (i32, i32, i32) {
    %c0_i32 = arith.constant 0 : i32
    %c0_i32_0 = arith.constant 0 : i32
    %c0_i32_1 = arith.constant 0 : i32
    %c0_i32_2 = arith.constant 0 : i32
    return %c0_i32, %c0_i32_0, %c0_i32_1 : i32, i32, i32
  }
  func.func @transform_4(%arg0: i32) -> (i32, i32, i32) {
    %c0_i32 = arith.constant 0 : i32
    %c0_i32_0 = arith.constant 0 : i32
    %c0_i32_1 = arith.constant 0 : i32
    return %arg0, %c0_i32, %c0_i32_0 : i32, i32, i32
  }
}

</mosaic_0001>

<bundles_post_ra>
// kernel: forward.1
= control target key start
LH: loop header
LB: loop body
LE: loop exit
PB: predicated region body
PF: predicated region fallthrough
CT: control target
= control target key end

     0   :  { %9 = vsyncpa [#allocation5], 0  ;;  %s10248_s0 = inlined_call_operand.vmem [shape: f32[2,3,256], index: 0, kind: input, shape index: {}]   ;;  %s10249_s1 = inlined_call_operand.hbm [shape: bf16[6,32,288], index: 1, kind: input, shape index: {}]   ;;  %s10250_s2 = inlined_call_operand.hbm [shape: f32[6,32,1], index: 2, kind: input, shape index: {}]   ;;  %s10251_s3 = inlined_call_operand.vmem [shape: f32[9,1,256], index: 3, kind: input, shape index: {}]   ;;  %s10252_s4 = inlined_call_operand.vmem [shape: f32[2,8,256], index: 4, kind: output, shape index: {}]  }
   0x1   :  { %10 = vsyncpa [#allocation7], 0  ;;  %s7559_s15 = smov 0  }
   0x2 LB: > { %s7517_s16 = smov [#allocation4]   ;;  %s7565_s18 = sadd.s32 4294967295, %s7515_s15   ;;  %s7515_s15 = sphi %s7559_s15, %s16_s15  }
   0x3   : > { %s148_s17 = sshll.u32 %s7517_s16, 4  ;;  %p6385_p0 = scmp.ge.s32.totalorder %s7515_s15, 1  ;;  %s149_s17 = int_to_ptr.vmem [resolvable:$true] %s148_s17 }
   0x4   : > { %p136_p1 = scmp.lt.s32.totalorder %s7515_s15, 3  ;;  %p7367_p3 = scmp.eq.s32.totalorder %s7565_s18, 0 }
   0x5   : > { %s7518_s20 = smov [#allocation6]   ;;  %s7460_s23 = scalar_lea.vmem %s149_s17, 4608 }
   0x6   : > { %p7569_p2 = pnand %p6385_p0, %p136_p1  ;;  %s161_s21 = sshll.u32 %s7518_s20, 4  ;;  %s162_s21 = int_to_ptr.vmem [resolvable:$true] %s161_s21 }
   0x7   : > { %p7461_p7 = scmp.ne.s32.totalorder %s149_s17, %s7460_s23  ;;  %p7468_p10 = scmp.lt.s32.totalorder %s149_s17, %s149_s17 }
   0x8   : > { %p7360_p4 = pneg %p7569_p2  ;;  %p7469_p11 = scmp.lt.s32.totalorder %s7460_s23, %s7460_s23 }
   0xa   : > { %p7578_p5 = pnand %p7367_p3, %p7360_p4  ;;  %p7470_p12 = por %p7469_p11, %p7468_p10 }
   0xc   : > { %p7451_p6 = pneg %p7578_p5 }
   0xe   : > { %p7463_p8 = pnand %p7461_p7, %p7451_p6 }
  0x10   : > { %p7464_p9 = pneg %p7463_p8 }
  0x12   : > { %p7471_p13 = pnand %p7470_p12, %p7464_p9 }
  0x14   : > { %7474 = shalt.err (!%p7471_p13)
}
  0x15   : > { %s7519_s24 = smov 192   ;;  %s7520_s25 = smov 12  }
  0x16   : > { %7363 = dma.hbm_to_vmem [thread:$0]  (!%p7578_p5), %s10249_s1, 4608, %s149_s17, [#allocation5], %s7519_s24, %s7519_s24, %s7520_s25  }
  0x17   : > { %s7486_s28 = scalar_lea.vmem %s162_s21, 3072  ;;  %p7494_p7 = scmp.lt.s32.totalorder %s162_s21, %s162_s21 }
  0x18   : > { %p7487_p0 = scmp.ne.s32.totalorder %s162_s21, %s7486_s28  ;;  %p7495_p8 = scmp.lt.s32.totalorder %s7486_s28, %s7486_s28 }
  0x1a   : > { %p7489_p1 = pnand %p7487_p0, %p7451_p6  ;;  %p7496_p10 = por %p7495_p8, %p7494_p7 }
  0x1c   : > { %p7490_p4 = pneg %p7489_p1 }
  0x1e   : > { %p7497_p9 = pnand %p7496_p10, %p7490_p4 }
  0x20   : > { %7500 = shalt.err (!%p7497_p9)
}
  0x21   : > { %s7521_s29 = smov 128   ;;  %s7522_s30 = smov 8  }
  0x22   : > { %7366 = dma.hbm_to_vmem [thread:$0]  (!%p7578_p5), %s10250_s2, 3072, %s162_s21, [#allocation7], %s7521_s29, %s7521_s29, %s7522_s30  }
  0x23   : > { %188 = sbr.rel (%p7569_p2) target bundleno = 2768 (0xad0), region = 36 }
  0x28   : > { %7506 = dma.done.wait (%p7367_p3), [#allocation5], 4608  }
  0x29   : > { %7508 = vsyncadd (%p7367_p3), [#allocation5], 4294962688 }
  0x2a   : > { %7510 = dma.done.wait (%p7367_p3), [#allocation7], 3072  }
  0x2b   : > { %7512 = vsyncadd (%p7367_p3), [#allocation7], 4294964224  ;;  %v7523_v0 = vmov 0.0   ;;  %s7524_s7 = smov 1   ;;  %p218_p2 = scmp.lt.s32.totalorder %s7565_s18, 1  ;;  %v267_v5 = vlaneseq  ;;  %v7532_v26 = vmov 0  }
  0x2c   : > { %486 = vrot.lane.b32.xlu1 %v7523_v0, %s7524_s7  ;;  %229 = vst [vmem:[#allocation2 + $0x30] sm:$0xff] %v7523_v0  ;;  %230 = vst [vmem:[#allocation2] sm:$0xff] %v7523_v0  ;;  %478 = vrot.lane.b32.xlu0 %v7523_v0, %s7524_s7  ;;  %s7525_s12 = smov 15   ;;  %s7526_s13 = smov 16   ;;  %v6410_v10 = vld [vmem:[%s10251_s3 + $0x6] sm:$0x3] }
  0x2d   : > { %s10280_s18 = smov (!%p218_p2, %s7565_s18), 1  ;;  %s7527_s14 = smov 17   ;;  %v281_v6 = vshrl.u32 %v267_v5, 7  ;;  %v7734_v7 = vand.u32 127, %v267_v5  ;;  %v7400_v11 = vld [vmem:[#allocation4 + $0x4] ss:$12 sps:$4 sm:$0xff]   ;;  %1242 = vmatprep.mubr.bf16.mxu1 %v7532_v26  ;;  %7396 = vset.pattern.permute.xlu1 %v7532_v26 }
  0x2e   : > { %s6918_s8 = sshll.u32 %s10280_s18, 3  ;;  %s7528_s16 = smov 112   ;;  %1189 = vmatprep.mubr.bf16.mxu0 %v7400_v11  ;;  %7395 = vset.pattern.permute.xlu0 %v7532_v26  ;;  %v6405_v34 = vld [vmem:[%s10251_s3 + $0x4] sm:$0x3]  ;;  %v883_v35 = vld [vmem:[#allocation6 + $0x18] sm:$0xff]  ;;  %v882_v36 = vld [vmem:[#allocation6 + $0x10] sm:$0xff] }
  0x2f   : > { %s222_s11 = scalar_lea.vmem %s10248_s0, %s6918_s8  ;;  %s7529_s17 = smov 113   ;;  %v7736_v8 = vsub.s32 0, %v281_v6  ;;  %v7738_v9 = vsub.s32 1, %v281_v6  ;;  %vm490_vm0 = vcmp.lt.s32.totalorder %v7734_v7, 1  ;;  %vm416_vm1 = vcmp.lt.s32.totalorder %v7734_v7, 15  ;;  %v880_v40 = vld [vmem:[#allocation6] sm:$0xff] }
  0x30   : > { %488 = vrot.lane.b32.xlu1 %v7523_v0, %s7524_s7  ;;  %480 = vrot.lane.b32.xlu0 %v7523_v0, %s7524_s7  ;;  %v237_v1 = vld [vmem:[%s222_s11] sm:$0x77]  ;;  %s7530_s19 = smov 127   ;;  %s7531_s22 = smov 111   ;;  %v881_v41 = vld [vmem:[#allocation6 + $0x8] sm:$0xff]  ;;  %vm342_vm2 = vcmp.lt.s32.totalorder %v7734_v7, 16 }
  0x31   : > { %v239_v2 = vcombine.high %v237_v1, %v237_v1  ;;  %241 = vst [vmem:[#allocation2 + $0x30] sm:$0x7] %v237_v1  ;;  %v509_v14 = vrot.slane %v6410_v10, %v7738_v9  ;;  %v505_v15 = vrot.slane %v6410_v10, %v7736_v8  ;;  %v431_v44 = vrot.slane %v6405_v34, %v7736_v8  ;;  %s6919_s29 = sshll.u32 %s10280_s18, 4 }
  0x32   : > { %v435_v45 = vrot.slane %v6405_v34, %v7738_v9  ;;  %vm269_vm3 = vcmp.lt.s32.totalorder %v7734_v7, 17  ;;  %vm740_vm4 = vcmp.lt.s32.totalorder %v7734_v7, 112  ;;  %vm666_vm5 = vcmp.lt.s32.totalorder %v7734_v7, 113  ;;  %s227_s6 = scalar_lea.vmem %s10252_s4, %s6919_s29 }
  0x33   : > { %242 = vst [vmem:[#allocation2] sm:$0x7] %v239_v2  ;;  %vm592_vm6 = vcmp.lt.s32.totalorder %v7734_v7, 127  ;;  %vm814_vm7 = vcmp.lt.s32.totalorder %v7734_v7, 111  ;;  %vm1150_vm8 = vcmask 261120  }
  0x34   : > { %404 = vrot.lane.b32.xlu0 %v7523_v0, %s7525_s12  ;;  %476 = vrot.lane.b32.xlu1 %v7523_v0, %s7524_s7 }
  0x38   : > { %484 = vrot.lane.b32.xlu1 %v7523_v0, %s7524_s7  ;;  %v7634_v3 = vld [vmem:[#allocation2 + $0x30] sm:$0xff] }
  0x39   : > { %474 = vrot.lane.b32.xlu0 %v7634_v3, %s7524_s7 }
  0x3a   : > { %v7640_v4 = vld [vmem:[#allocation2] sm:$0xff] }
  0x3c   : > { %406 = vrot.lane.b32.xlu1 %v7523_v0, %s7525_s12 }
  0x3d   : > { %482 = vrot.lane.b32.xlu0 %v7640_v4, %s7524_s7 }
  0x40   : > { %414 = vrot.lane.b32.xlu1 %v7523_v0, %s7525_s12 }
  0x41   : > { %412 = vrot.lane.b32.xlu0 %v7523_v0, %s7525_s12 }
  0x44   : > { %402 = vrot.lane.b32.xlu1 %v7523_v0, %s7525_s12 }
  0x45   : > { %400 = vrot.lane.b32.xlu0 %v7634_v3, %s7525_s12 }
  0x48   : > { %410 = vrot.lane.b32.xlu1 %v7523_v0, %s7525_s12 }
  0x49   : > { %408 = vrot.lane.b32.xlu0 %v7640_v4, %s7525_s12 }
  0x4c   : > { %332 = vrot.lane.b32.xlu1 %v7523_v0, %s7526_s13 }
  0x4d   : > { %330 = vrot.lane.b32.xlu0 %v7523_v0, %s7526_s13 }
  0x50   : > { %340 = vrot.lane.b32.xlu1 %v7523_v0, %s7526_s13 }
  0x51   : > { %338 = vrot.lane.b32.xlu0 %v7523_v0, %s7526_s13 }
  0x54   : > { %328 = vrot.lane.b32.xlu1 %v7523_v0, %s7526_s13 }
  0x55   : > { %326 = vrot.lane.b32.xlu0 %v7634_v3, %s7526_s13 }
  0x58   : > { %336 = vrot.lane.b32.xlu1 %v7523_v0, %s7526_s13 }
  0x59   : > { %334 = vrot.lane.b32.xlu0 %v7640_v4, %s7526_s13 }
  0x5c   : > { %257 = vrot.lane.b32.xlu1 %v7523_v0, %s7527_s14 }
  0x5d   : > { %255 = vrot.lane.b32.xlu0 %v7523_v0, %s7527_s14 }
  0x60   : > { %265 = vrot.lane.b32.xlu1 %v7523_v0, %s7527_s14 }
  0x61   : > { %263 = vrot.lane.b32.xlu0 %v7523_v0, %s7527_s14 }
  0x64   : > { %253 = vrot.lane.b32.xlu1 %v7523_v0, %s7527_s14 }
  0x65   : > { %251 = vrot.lane.b32.xlu0 %v7634_v3, %s7527_s14 }
  0x68   : > { %261 = vrot.lane.b32.xlu1 %v7523_v0, %s7527_s14 }
  0x69   : > { %259 = vrot.lane.b32.xlu0 %v7640_v4, %s7527_s14 }
  0x6c   : > { %730 = vrot.lane.b32.xlu1 %v7523_v0, %s7528_s16 }
  0x6d   : > { %728 = vrot.lane.b32.xlu0 %v7523_v0, %s7528_s16 }
  0x70   : > { %738 = vrot.lane.b32.xlu1 %v7523_v0, %s7528_s16 }
  0x71   : > { %736 = vrot.lane.b32.xlu0 %v7523_v0, %s7528_s16 }
  0x74   : > { %726 = vrot.lane.b32.xlu1 %v7523_v0, %s7528_s16 }
  0x75   : > { %724 = vrot.lane.b32.xlu0 %v7634_v3, %s7528_s16 }
  0x78   : > { %734 = vrot.lane.b32.xlu1 %v7523_v0, %s7528_s16 }
  0x79   : > { %732 = vrot.lane.b32.xlu0 %v7640_v4, %s7528_s16 }
  0x7c   : > { %656 = vrot.lane.b32.xlu1 %v7523_v0, %s7529_s17 }
  0x7d   : > { %654 = vrot.lane.b32.xlu0 %v7523_v0, %s7529_s17 }
  0x80   : > { %664 = vrot.lane.b32.xlu1 %v7523_v0, %s7529_s17 }
  0x81   : > { %662 = vrot.lane.b32.xlu0 %v7523_v0, %s7529_s17 }
  0x84   : > { %652 = vrot.lane.b32.xlu1 %v7523_v0, %s7529_s17 }
  0x85   : > { %650 = vrot.lane.b32.xlu0 %v7634_v3, %s7529_s17 }
  0x88   : > { %660 = vrot.lane.b32.xlu1 %v7523_v0, %s7529_s17 }
  0x89   : > { %658 = vrot.lane.b32.xlu0 %v7640_v4, %s7529_s17 }
  0x8c   : > { %582 = vrot.lane.b32.xlu1 %v7523_v0, %s7530_s19 }
  0x8d   : > { %580 = vrot.lane.b32.xlu0 %v7523_v0, %s7530_s19 }
  0x90   : > { %590 = vrot.lane.b32.xlu1 %v7523_v0, %s7530_s19 }
  0x91   : > { %588 = vrot.lane.b32.xlu0 %v7523_v0, %s7530_s19 }
  0x94   : > { %578 = vrot.lane.b32.xlu1 %v7523_v0, %s7530_s19 }
  0x95   : > { %576 = vrot.lane.b32.xlu0 %v7634_v3, %s7530_s19 }
  0x98   : > { %586 = vrot.lane.b32.xlu1 %v7523_v0, %s7530_s19 }
  0x99   : > { %584 = vrot.lane.b32.xlu0 %v7640_v4, %s7530_s19 }
  0x9c   : > { %804 = vrot.lane.b32.xlu1 %v7523_v0, %s7531_s22 }
  0x9d   : > { %802 = vrot.lane.b32.xlu0 %v7523_v0, %s7531_s22 }
  0x9e   : > { %v487_v12 = vpop.permute.xlu1 %486  ;;  %v479_v13 = vpop.permute.xlu0 %478 }
  0x9f   : > { %v497_v16 = vsel %vm490_vm0, %v487_v12, %v479_v13  ;;  %v493_v17 = vsel %vm490_vm0, %v479_v13, %v487_v12 }
  0xa0   : > { %812 = vrot.lane.b32.xlu1 %v7523_v0, %s7531_s22  ;;  %v517_v20 = vmul.f32 %v509_v14, %v493_v17  ;;  %v516_v21 = vmul.f32 %v505_v15, %v497_v16 }
  0xa1   : > { %810 = vrot.lane.b32.xlu0 %v7523_v0, %s7531_s22 }
  0xa2   : > { %v489_v18 = vpop.permute.xlu1 %488  ;;  %v481_v19 = vpop.permute.xlu0 %480 }
  0xa3   : > { %v498_v22 = vsel %vm490_vm0, %v489_v18, %v481_v19  ;;  %v494_v23 = vsel %vm490_vm0, %v481_v19, %v489_v18  ;;  %v6400_v19 = vld [vmem:[%s10251_s3 + $0x2] sm:$0x3] }
  0xa4   : > { %800 = vrot.lane.b32.xlu1 %v7523_v0, %s7531_s22  ;;  %v519_v24 = vmul.f32 %v509_v14, %v494_v23  ;;  %v518_v25 = vmul.f32 %v505_v15, %v498_v22 }
  0xa5   : > { %798 = vrot.lane.b32.xlu0 %v7634_v3, %s7531_s22 }
  0xa6   : > { %v477_v27 = vpop.permute.xlu1 %476  ;;  %v7151_v28 = vpack.c.bf16 %v519_v24, %v517_v20  ;;  %v7150_v29 = vpack.c.bf16 %v518_v25, %v516_v21  ;;  %v405_v30 = vpop.permute.xlu0 %404  ;;  %v357_v24 = vrot.slane %v6400_v19, %v7736_v8  ;;  %v361_v25 = vrot.slane %v6400_v19, %v7738_v9 }
  0xa8   : > { %1157 = vmatprep.subr.bf16.mxu0 %v7151_v28  ;;  %808 = vrot.lane.b32.xlu1 %v7523_v0, %s7531_s22 }
  0xa9   : > { %1158 = vmatpush1.bf16.msra.mxu0 %v7150_v29  ;;  %806 = vrot.lane.b32.xlu0 %v7640_v4, %s7531_s22 }
  0xaa   : > { %v485_v31 = vpop.permute.xlu1 %484 }
  0xab   : > { %v475_v32 = vpop.permute.xlu0 %474  ;;  %v492_v37 = vsel %vm490_vm0, %v477_v27, %v485_v31  ;;  %v496_v38 = vsel %vm490_vm0, %v485_v31, %v477_v27 }
  0xac   : > { %937 = vperm.xlu1 %7396, %v883_v35   ;;  %v514_v47 = vmul.f32 %v505_v15, %v496_v38  ;;  %v515_v48 = vmul.f32 %v509_v14, %v492_v37 }
  0xad   : > { %932 = vperm.xlu0 %7395, %v882_v36  }
  0xae   : > { %v407_v33 = vpop.permute.xlu1 %406 }
  0xaf   : > { %v483_v39 = vpop.permute.xlu0 %482 }
  0xb0   : > { %v491_v42 = vsel %vm490_vm0, %v475_v32, %v483_v39  ;;  %v495_v43 = vsel %vm490_vm0, %v483_v39, %v475_v32  ;;  %922 = vperm.xlu1 %7396, %v880_v40  }
  0xb1   : > { %v512_v49 = vmul.f32 %v505_v15, %v495_v43  ;;  %v513_v50 = vmul.f32 %v509_v14, %v491_v42  ;;  %927 = vperm.xlu0 %7395, %v881_v41  }
  0xb2   : > { %v415_v46 = vpop.permute.xlu1 %414 }
  0xb3   : > { %v420_v51 = vsel %vm416_vm1, %v407_v33, %v415_v46  ;;  %v424_v52 = vsel %vm416_vm1, %v415_v46, %v407_v33  ;;  %v413_v53 = vpop.permute.xlu0 %412  ;;  %v7149_v54 = vpack.c.bf16 %v515_v48, %v513_v50  ;;  %v7148_v55 = vpack.c.bf16 %v514_v47, %v512_v49 }
  0xb4   : > { %v419_v56 = vsel %vm416_vm1, %v405_v30, %v413_v53  ;;  %v423_v57 = vsel %vm416_vm1, %v413_v53, %v405_v30  ;;  %v444_v59 = vmul.f32 %v431_v44, %v424_v52  ;;  %v445_v60 = vmul.f32 %v435_v45, %v420_v51  ;;  %v278_v51 = vld [vmem:[%s10251_s3] sm:$0x3] }
  0xb5   : > { %v442_v61 = vmul.f32 %v431_v44, %v423_v57  ;;  %v443_v62 = vmul.f32 %v435_v45, %v419_v56  ;;  %1159 = vmatprep.subr.bf16.mxu0 %v7149_v54  ;;  %v283_v56 = vrot.slane %v278_v51, %v7736_v8  ;;  %v287_v57 = vrot.slane %v278_v51, %v7738_v9 }
  0xb6   : > { %v403_v58 = vpop.permute.xlu1 %402  ;;  %1160 = vmatpush1.bf16.msra.mxu0 %v7148_v55 }
  0xb7   : > { %v401_v63 = vpop.permute.xlu0 %400  ;;  %v7147_v1 = vpack.c.bf16 %v445_v60, %v443_v62  ;;  %v7146_v2 = vpack.c.bf16 %v444_v59, %v442_v61 }
  0xb9   : > { %1161 = vmatprep.subr.bf16.mxu0 %v7147_v1 }
  0xba   : > { %v411_v5 = vpop.permute.xlu1 %410  ;;  %1162 = vmatpush1.bf16.msra.mxu0 %v7146_v2 }
  0xbb   : > { %v418_v6 = vsel %vm416_vm1, %v403_v58, %v411_v5  ;;  %v422_v10 = vsel %vm416_vm1, %v411_v5, %v403_v58  ;;  %v409_v11 = vpop.permute.xlu0 %408 }
  0xbc   : > { %v417_v12 = vsel %vm416_vm1, %v401_v63, %v409_v11  ;;  %v421_v13 = vsel %vm416_vm1, %v409_v11, %v401_v63  ;;  %v440_v15 = vmul.f32 %v431_v44, %v422_v10  ;;  %v441_v16 = vmul.f32 %v435_v45, %v418_v6 }
  0xbd   : > { %v438_v17 = vmul.f32 %v431_v44, %v421_v13  ;;  %v439_v18 = vmul.f32 %v435_v45, %v417_v12 }
  0xbe   : > { %v333_v14 = vpop.permute.xlu1 %332 }
  0xbf   : > { %v331_v20 = vpop.permute.xlu0 %330  ;;  %v7145_v21 = vpack.c.bf16 %v441_v16, %v439_v18  ;;  %v7144_v22 = vpack.c.bf16 %v440_v15, %v438_v17 }
  0xc1   : > { %1163 = vmatprep.subr.bf16.mxu0 %v7145_v21 }
  0xc2   : > { %v341_v23 = vpop.permute.xlu1 %340  ;;  %1164 = vmatpush1.bf16.msra.mxu0 %v7144_v22 }
  0xc3   : > { %v346_v27 = vsel %vm342_vm2, %v333_v14, %v341_v23  ;;  %v350_v28 = vsel %vm342_vm2, %v341_v23, %v333_v14  ;;  %v339_v29 = vpop.permute.xlu0 %338 }
  0xc4   : > { %v345_v30 = vsel %vm342_vm2, %v331_v20, %v339_v29  ;;  %v349_v31 = vsel %vm342_vm2, %v339_v29, %v331_v20  ;;  %v370_v33 = vmul.f32 %v357_v24, %v350_v28  ;;  %v371_v34 = vmul.f32 %v361_v25, %v346_v27 }
  0xc5   : > { %v368_v35 = vmul.f32 %v357_v24, %v349_v31  ;;  %v369_v36 = vmul.f32 %v361_v25, %v345_v30 }
  0xc6   : > { %v329_v32 = vpop.permute.xlu1 %328 }
  0xc7   : > { %v327_v37 = vpop.permute.xlu0 %326  ;;  %v7143_v38 = vpack.c.bf16 %v371_v34, %v369_v36  ;;  %v7142_v39 = vpack.c.bf16 %v370_v33, %v368_v35 }
  0xc9   : > { %1165 = vmatprep.subr.bf16.mxu0 %v7143_v38 }
  0xca   : > { %v337_v40 = vpop.permute.xlu1 %336  ;;  %1166 = vmatpush1.bf16.msra.mxu0 %v7142_v39 }
  0xcb   : > { %v344_v41 = vsel %vm342_vm2, %v329_v32, %v337_v40  ;;  %v348_v42 = vsel %vm342_vm2, %v337_v40, %v329_v32  ;;  %v335_v43 = vpop.permute.xlu0 %334 }
  0xcc   : > { %v343_v44 = vsel %vm342_vm2, %v327_v37, %v335_v43  ;;  %v347_v45 = vsel %vm342_vm2, %v335_v43, %v327_v37  ;;  %v366_v47 = vmul.f32 %v357_v24, %v348_v42  ;;  %v367_v48 = vmul.f32 %v361_v25, %v344_v41 }
  0xcd   : > { %v364_v49 = vmul.f32 %v357_v24, %v347_v45  ;;  %v365_v50 = vmul.f32 %v361_v25, %v343_v44  ;;  %v6429_v24 = vld [vmem:[%s10251_s3 + $0xe] sm:$0x3] }
  0xce   : > { %v258_v46 = vpop.permute.xlu1 %257  ;;  %v755_v30 = vrot.slane %v6429_v24, %v7736_v8  ;;  %v759_v31 = vrot.slane %v6429_v24, %v7738_v9 }
  0xcf   : > { %v256_v52 = vpop.permute.xlu0 %255  ;;  %v7141_v53 = vpack.c.bf16 %v367_v48, %v365_v50  ;;  %v7140_v54 = vpack.c.bf16 %v366_v47, %v364_v49 }
  0xd1   : > { %1167 = vmatprep.subr.bf16.mxu0 %v7141_v53 }
  0xd2   : > { %v266_v55 = vpop.permute.xlu1 %265  ;;  %1168 = vmatpush1.bf16.msra.mxu0 %v7140_v54 }
  0xd3   : > { %v273_v58 = vsel %vm269_vm3, %v258_v46, %v266_v55  ;;  %v277_v59 = vsel %vm269_vm3, %v266_v55, %v258_v46  ;;  %v264_v60 = vpop.permute.xlu0 %263 }
  0xd4   : > { %v272_v61 = vsel %vm269_vm3, %v256_v52, %v264_v60  ;;  %v276_v62 = vsel %vm269_vm3, %v264_v60, %v256_v52  ;;  %v296_v1 = vmul.f32 %v283_v56, %v277_v59  ;;  %v297_v2 = vmul.f32 %v287_v57, %v273_v58 }
  0xd5   : > { %v294_v5 = vmul.f32 %v283_v56, %v276_v62  ;;  %v295_v6 = vmul.f32 %v287_v57, %v272_v61 }
  0xd6   : > { %v254_v63 = vpop.permute.xlu1 %253 }
  0xd7   : > { %v252_v10 = vpop.permute.xlu0 %251  ;;  %v7139_v11 = vpack.c.bf16 %v297_v2, %v295_v6  ;;  %v7138_v12 = vpack.c.bf16 %v296_v1, %v294_v5 }
  0xd9   : > { %1169 = vmatprep.subr.bf16.mxu0 %v7139_v11 }
  0xda   : > { %v262_v13 = vpop.permute.xlu1 %261  ;;  %1170 = vmatpush1.bf16.msra.mxu0 %v7138_v12 }
  0xdb   : > { %v271_v14 = vsel %vm269_vm3, %v254_v63, %v262_v13  ;;  %v275_v15 = vsel %vm269_vm3, %v262_v13, %v254_v63  ;;  %v260_v16 = vpop.permute.xlu0 %259 }
  0xdc   : > { %v270_v17 = vsel %vm269_vm3, %v252_v10, %v260_v16  ;;  %v274_v18 = vsel %vm269_vm3, %v260_v16, %v252_v10  ;;  %v292_v20 = vmul.f32 %v283_v56, %v275_v15  ;;  %v293_v21 = vmul.f32 %v287_v57, %v271_v14 }
  0xdd   : > { %v290_v22 = vmul.f32 %v283_v56, %v274_v18  ;;  %v291_v23 = vmul.f32 %v287_v57, %v270_v17  ;;  %v6424_v56 = vld [vmem:[%s10251_s3 + $0xc] sm:$0x3] }
  0xde   : > { %v731_v19 = vpop.permute.xlu1 %730  ;;  %v681_v61 = vrot.slane %v6424_v56, %v7736_v8  ;;  %v685_v62 = vrot.slane %v6424_v56, %v7738_v9 }
  0xdf   : > { %v729_v25 = vpop.permute.xlu0 %728  ;;  %v7137_v27 = vpack.c.bf16 %v293_v21, %v291_v23  ;;  %v7136_v28 = vpack.c.bf16 %v292_v20, %v290_v22 }
  0xe1   : > { %1171 = vmatprep.subr.bf16.mxu0 %v7137_v27 }
  0xe2   : > { %v739_v29 = vpop.permute.xlu1 %738  ;;  %1172 = vmatpush1.bf16.msra.mxu0 %v7136_v28 }
  0xe3   : > { %v744_v32 = vsel %vm740_vm4, %v731_v19, %v739_v29  ;;  %v748_v33 = vsel %vm740_vm4, %v739_v29, %v731_v19  ;;  %v737_v34 = vpop.permute.xlu0 %736 }
  0xe4   : > { %v743_v35 = vsel %vm740_vm4, %v729_v25, %v737_v34  ;;  %v747_v36 = vsel %vm740_vm4, %v737_v34, %v729_v25  ;;  %v768_v38 = vmul.f32 %v755_v30, %v744_v32  ;;  %v769_v39 = vmul.f32 %v759_v31, %v748_v33 }
  0xe5   : > { %v766_v40 = vmul.f32 %v755_v30, %v743_v35  ;;  %v767_v41 = vmul.f32 %v759_v31, %v747_v36 }
  0xe6   : > { %v727_v37 = vpop.permute.xlu1 %726 }
  0xe7   : > { %v725_v42 = vpop.permute.xlu0 %724  ;;  %v7167_v43 = vpack.c.bf16 %v769_v39, %v767_v41  ;;  %v7166_v44 = vpack.c.bf16 %v768_v38, %v766_v40 }
  0xe9   : > { %1173 = vmatprep.subr.bf16.mxu0 %v7167_v43 }
  0xea   : > { %v735_v45 = vpop.permute.xlu1 %734  ;;  %1174 = vmatpush2.bf16.msra.mxu0 %v7166_v44 }
  0xeb   : > { %v742_v46 = vsel %vm740_vm4, %v727_v37, %v735_v45  ;;  %v746_v47 = vsel %vm740_vm4, %v735_v45, %v727_v37  ;;  %v733_v48 = vpop.permute.xlu0 %732 }
  0xec   : > { %v741_v49 = vsel %vm740_vm4, %v725_v42, %v733_v48  ;;  %v745_v50 = vsel %vm740_vm4, %v733_v48, %v725_v42  ;;  %v764_v52 = vmul.f32 %v755_v30, %v742_v46  ;;  %v765_v53 = vmul.f32 %v759_v31, %v746_v47 }
  0xed   : > { %v762_v54 = vmul.f32 %v755_v30, %v741_v49  ;;  %v763_v55 = vmul.f32 %v759_v31, %v745_v50  ;;  %v6419_v30 = vld [vmem:[%s10251_s3 + $0xa] sm:$0x3] }
  0xee   : > { %v657_v51 = vpop.permute.xlu1 %656  ;;  %v607_v35 = vrot.slane %v6419_v30, %v7736_v8  ;;  %v611_v36 = vrot.slane %v6419_v30, %v7738_v9  ;;  %v7401_v30 = vld [vmem:[#allocation4 + $0x1c] ss:$12 sps:$4 sm:$0xff]  }
  0xef   : > { %v655_v57 = vpop.permute.xlu0 %654  ;;  %v7165_v58 = vpack.c.bf16 %v765_v53, %v763_v55  ;;  %v7164_v59 = vpack.c.bf16 %v764_v52, %v762_v54 }
  0xf1   : > { %1175 = vmatprep.subr.bf16.mxu0 %v7165_v58 }
  0xf2   : > { %v665_v60 = vpop.permute.xlu1 %664  ;;  %1176 = vmatpush2.bf16.msra.mxu0 %v7164_v59 }
  0xf3   : > { %v670_v63 = vsel %vm666_vm5, %v657_v51, %v665_v60  ;;  %v674_v1 = vsel %vm666_vm5, %v665_v60, %v657_v51  ;;  %v663_v2 = vpop.permute.xlu0 %662 }
  0xf4   : > { %v669_v5 = vsel %vm666_vm5, %v655_v57, %v663_v2  ;;  %v673_v6 = vsel %vm666_vm5, %v663_v2, %v655_v57  ;;  %v694_v11 = vmul.f32 %v681_v61, %v670_v63  ;;  %v695_v12 = vmul.f32 %v685_v62, %v674_v1 }
  0xf5   : > { %v692_v13 = vmul.f32 %v681_v61, %v669_v5  ;;  %v693_v14 = vmul.f32 %v685_v62, %v673_v6 }
  0xf6   : > { %v653_v10 = vpop.permute.xlu1 %652 }
  0xf7   : > { %v651_v15 = vpop.permute.xlu0 %650  ;;  %v7163_v16 = vpack.c.bf16 %v695_v12, %v693_v14  ;;  %v7162_v17 = vpack.c.bf16 %v694_v11, %v692_v13  ;;  %v7533_v13 = vmov 0.0|0.0   ;;  %v7153_v14 = vpack.c.bf16 %v7523_v0, %v7640_v4 }
  0xf9   : > { %1177 = vmatprep.subr.bf16.mxu0 %v7163_v16 }
  0xfa   : > { %v661_v18 = vpop.permute.xlu1 %660  ;;  %1178 = vmatpush2.bf16.msra.mxu0 %v7162_v17 }
  0xfb   : > { %v668_v19 = vsel %vm666_vm5, %v653_v10, %v661_v18  ;;  %v672_v20 = vsel %vm666_vm5, %v661_v18, %v653_v10  ;;  %v659_v21 = vpop.permute.xlu0 %658 }
  0xfc   : > { %v667_v22 = vsel %vm666_vm5, %v651_v15, %v659_v21  ;;  %v671_v23 = vsel %vm666_vm5, %v659_v21, %v651_v15  ;;  %v690_v25 = vmul.f32 %v681_v61, %v668_v19  ;;  %v691_v27 = vmul.f32 %v685_v62, %v672_v20 }
  0xfd   : > { %v688_v28 = vmul.f32 %v681_v61, %v667_v22  ;;  %v689_v29 = vmul.f32 %v685_v62, %v671_v23  ;;  %v6434_v61 = vld [vmem:[%s10251_s3 + $0x10] sm:$0x3]  ;;  %v7152_v22 = vpack.c.bf16 %v7523_v0, %v7634_v3 }
  0xfe   : > { %v583_v24 = vpop.permute.xlu1 %582  ;;  %v833_v5 = vrot.slane %v6434_v61, %v7738_v9  ;;  %v829_v6 = vrot.slane %v6434_v61, %v7736_v8 }
  0xff   : > { %v581_v31 = vpop.permute.xlu0 %580  ;;  %v7161_v32 = vpack.c.bf16 %v691_v27, %v689_v29  ;;  %v7160_v33 = vpack.c.bf16 %v690_v25, %v688_v28  ;;  %v7398_v27 = vld [vmem:[#allocation4] ss:$12 sps:$4 sm:$0xff]  }
 0x101   : > { %1179 = vmatprep.subr.bf16.mxu0 %v7161_v32 }
 0x102   : > { %v591_v34 = vpop.permute.xlu1 %590  ;;  %1180 = vmatpush2.bf16.msra.mxu0 %v7160_v33 }
 0x103   : > { %v596_v37 = vsel %vm592_vm6, %v583_v24, %v591_v34  ;;  %v600_v38 = vsel %vm592_vm6, %v591_v34, %v583_v24  ;;  %v589_v39 = vpop.permute.xlu0 %588 }
 0x104   : > { %v595_v40 = vsel %vm592_vm6, %v581_v31, %v589_v39  ;;  %v599_v41 = vsel %vm592_vm6, %v589_v39, %v581_v31  ;;  %v620_v43 = vmul.f32 %v607_v35, %v596_v37  ;;  %v621_v44 = vmul.f32 %v611_v36, %v600_v38  ;;  %v7403_v38 = vld [vmem:[#allocation4 + $0x18] ss:$12 sps:$4 sm:$0xff]   ;;  %v7404_v39 = vld [vmem:[#allocation4 + $0x8] ss:$12 sps:$4 sm:$0xff]  }
 0x105   : > { %v618_v45 = vmul.f32 %v607_v35, %v595_v40  ;;  %v619_v46 = vmul.f32 %v611_v36, %v599_v41  ;;  %v7405_v40 = vld [vmem:[#allocation4 + $0x20] ss:$12 sps:$4 sm:$0xff]  }
 0x106   : > { %v579_v42 = vpop.permute.xlu1 %578 }
 0x107   : > { %v577_v47 = vpop.permute.xlu0 %576  ;;  %v7159_v48 = vpack.c.bf16 %v621_v44, %v619_v46  ;;  %v7158_v49 = vpack.c.bf16 %v620_v43, %v618_v45 }
 0x109   : > { %1181 = vmatprep.subr.bf16.mxu0 %v7159_v48 }
 0x10a   : > { %v587_v50 = vpop.permute.xlu1 %586  ;;  %1182 = vmatpush2.bf16.msra.mxu0 %v7158_v49 }
 0x10b   : > { %v594_v51 = vsel %vm592_vm6, %v579_v42, %v587_v50  ;;  %v598_v52 = vsel %vm592_vm6, %v587_v50, %v579_v42  ;;  %v585_v53 = vpop.permute.xlu0 %584 }
 0x10c   : > { %v593_v54 = vsel %vm592_vm6, %v577_v47, %v585_v53  ;;  %v597_v55 = vsel %vm592_vm6, %v585_v53, %v577_v47  ;;  %v616_v57 = vmul.f32 %v607_v35, %v594_v51  ;;  %v617_v58 = vmul.f32 %v611_v36, %v598_v52 }
 0x10d   : > { %v614_v59 = vmul.f32 %v607_v35, %v593_v54  ;;  %v615_v60 = vmul.f32 %v611_v36, %v597_v55 }
 0x10e   : > { %v805_v56 = vpop.permute.xlu1 %804 }
 0x10f   : > { %v803_v62 = vpop.permute.xlu0 %802  ;;  %v7157_v63 = vpack.c.bf16 %v617_v58, %v615_v60  ;;  %v7156_v1 = vpack.c.bf16 %v616_v57, %v614_v59 }
 0x111   : > { %1183 = vmatprep.subr.bf16.mxu0 %v7157_v63 }
 0x112   : > { %v813_v2 = vpop.permute.xlu1 %812  ;;  %1184 = vmatpush2.bf16.msra.mxu0 %v7156_v1 }
 0x113   : > { %v818_v10 = vsel %vm814_vm7, %v805_v56, %v813_v2  ;;  %v822_v11 = vsel %vm814_vm7, %v813_v2, %v805_v56  ;;  %v811_v12 = vpop.permute.xlu0 %810  ;;  %1185 = vmatprep.subr.bf16.mxu0 %v7533_v13 }
 0x114   : > { %v817_v15 = vsel %vm814_vm7, %v803_v62, %v811_v12  ;;  %v821_v17 = vsel %vm814_vm7, %v811_v12, %v803_v62  ;;  %v843_v19 = vmul.f32 %v833_v5, %v822_v11  ;;  %v842_v21 = vmul.f32 %v829_v6, %v818_v10 }
 0x115   : > { %v841_v18 = vmul.f32 %v833_v5, %v821_v17  ;;  %v840_v20 = vmul.f32 %v829_v6, %v817_v15 }
 0x116   : > { %v801_v16 = vpop.permute.xlu1 %800  ;;  %1186 = vmatpush2.bf16.msra.mxu0 %v7533_v13 }
 0x117   : > { %v799_v23 = vpop.permute.xlu0 %798  ;;  %1187 = vmatprep.subr.bf16.mxu0 %v7153_v14  ;;  %v7171_v24 = vpack.c.bf16 %v843_v19, %v841_v18  ;;  %v7170_v25 = vpack.c.bf16 %v842_v21, %v840_v20 }
 0x119   : > { %1222 = vmatprep.subr.bf16.mxu1 %v7171_v24 }
 0x11a   : > { %v809_v4 = vpop.permute.xlu1 %808  ;;  %1188 = vmatpush2.bf16.msra.mxu0 %v7152_v22  ;;  %1223 = vmatpush1.bf16.msra.mxu1 %v7170_v25 }
 0x11b   : > { %v816_v28 = vsel %vm814_vm7, %v801_v16, %v809_v4  ;;  %v820_v29 = vsel %vm814_vm7, %v809_v4, %v801_v16  ;;  %v807_v31 = vpop.permute.xlu0 %806 }
 0x11c   : > { %v815_v0 = vsel %vm814_vm7, %v799_v23, %v807_v31  ;;  %v819_v3 = vsel %vm814_vm7, %v807_v31, %v799_v23  ;;  %v838_v32 = vmul.f32 %v829_v6, %v816_v28  ;;  %v839_v33 = vmul.f32 %v833_v5, %v820_v29 }
 0x11d   : > { %v836_v34 = vmul.f32 %v829_v6, %v815_v0  ;;  %v837_v35 = vmul.f32 %v833_v5, %v819_v3  ;;  %1190 = vmatmul.mubr.bf16.vlgmr.msra.gmra.mxu0 %v7398_v27  ;;  %v1903_v3 = vld [vmem:[#allocation6 + $0x30] sm:$0xff] }
 0x11e   : > { %1199 = vmatprep.mubr.bf16.mxu0 %v7401_v30  ;;  %v7408_v30 = vld [vmem:[#allocation4 + $0x34] ss:$12 sps:$4 sm:$0xff]  }
 0x11f   : > { %v7169_v36 = vpack.c.bf16 %v839_v33, %v837_v35  ;;  %v7168_v37 = vpack.c.bf16 %v838_v32, %v836_v34  ;;  %v1904_v34 = vld [vmem:[#allocation6 + $0x38] sm:$0xff]  ;;  %v1901_v35 = vld [vmem:[#allocation6 + $0x20] sm:$0xff] }
 0x121   : > { %1224 = vmatprep.subr.bf16.mxu1 %v7169_v36 }
 0x122   : > { %1225 = vmatpush1.bf16.msra.mxu1 %v7168_v37 }
 0x125   : > { %1200 = vmatmul.mubr.bf16.gmra.mxu0 %v7403_v38  ;;  %6481 = vmatmul.mubr.msk.bf16.vlgmr.msra.gmra.mxu1 %vm1150_vm8, %v7404_v39  ;;  %v1902_v38 = vld [vmem:[#allocation6 + $0x28] sm:$0xff] }
 0x126   : > { %1252 = vmatprep.mubr.bf16.mxu1 %v7532_v26  ;;  %2262 = vmatprep.mubr.bf16.mxu0 %v7532_v26 }
 0x127   : > { %v7945_v41 = vpop.permute.xlu1 %937 }
 0x128   : > { %v933_v42 = vpop.permute.xlu0 %932 }
 0x12b   : > { %v923_v44 = vpop.permute.xlu1 %922 }
 0x12c   : > { %v928_v47 = vpop.permute.xlu0 %927 }
 0x12d   : > { %6482 = vmatmul.mubr.msk.bf16.gmra.mxu1 %vm1150_vm8, %v7405_v40 }
 0x12e   : > { %2209 = vmatprep.mubr.bf16.mxu1 %v7408_v30 }
 0x1dd   : > { %v1191_v43 = vpop.f32.mrf.mxu0 }
 0x1de   : > { %v1192_v45 = vadd.f32 %v1191_v43, %v923_v44 }
 0x1df   : > { %v1193_v46 = vpop.f32.mrf.mxu0 }
 0x1e0   : > { %v1194_v57 = vadd.f32 %v1193_v46, %v923_v44 }
 0x1e1   : > { %v1195_v50 = vpop.f32.mrf.mxu0 }
 0x1e2   : > { %v1196_v53 = vadd.f32 %v1195_v50, %v928_v47 }
 0x1e3   : > { %v1197_v58 = vpop.f32.mrf.mxu0 }
 0x1e4   : > { %v1198_v61 = vadd.f32 %v1197_v58, %v928_v47 }
 0x1e5   : > { %v1244_v48 = vpop.f32.mrf.mxu1  ;;  %v1201_v2 = vpop.f32.mrf.mxu0 }
 0x1e6   : > { %v1245_v49 = vadd.f32 %v1244_v48, %v1192_v45  ;;  %v1202_v11 = vadd.f32 %v1201_v2, %v933_v42 }
 0x1e7   : > { %v1246_v51 = vpop.f32.mrf.mxu1  ;;  %v1203_v6 = vpop.f32.mrf.mxu0 }
 0x1e8   : > { %v7947_v52 = vmax.f32 %v1245_v49, 0.0  ;;  %v1247_v59 = vadd.f32 %v1246_v51, %v1194_v57  ;;  %v1204_v19 = vadd.f32 %v1203_v6, %v933_v42 }
 0x1e9   : > { %v1248_v54 = vpop.f32.mrf.mxu1  ;;  %v1205_v12 = vpop.f32.mrf.mxu0 }
 0x1ea   : > { %v1249_v55 = vadd.f32 %v1248_v54, %v1196_v53  ;;  %1503 = vrot.lane.b32.xlu1 %v7947_v52, %s7524_s7  ;;  %v7969_v62 = vmax.f32 %v1247_v59, 0.0  ;;  %v1206_v15 = vadd.f32 %v1205_v12, %v7945_v41 }
 0x1eb   : > { %v1250_v60 = vpop.f32.mrf.mxu1  ;;  %v1207_v20 = vpop.f32.mrf.mxu0 }
 0x1ec   : > { %v7951_v56 = vmax.f32 %v1249_v55, 0.0  ;;  %v1251_v63 = vadd.f32 %v1250_v60, %v1198_v61  ;;  %v1208_v23 = vadd.f32 %v1207_v20, %v7945_v41  ;;  %v6497_v61 = vld [vmem:[%s10251_s3 + $0x6] sm:$0x3] }
 0x1ed   : > { %v1254_v5 = vpop.f32.mrf.mxu1  ;;  %v1536_v6 = vrot.slane %v6497_v61, %v7738_v9  ;;  %v1532_v12 = vrot.slane %v6497_v61, %v7736_v8 }
 0x1ee   : > { %1505 = vrot.lane.b32.xlu0 %v7951_v56, %s7524_s7  ;;  %1431 = vrot.lane.b32.xlu1 %v7947_v52, %s7525_s12  ;;  %v7975_v1 = vmax.f32 %v1251_v63, 0.0  ;;  %v1255_v13 = vadd.f32 %v1254_v5, %v1202_v11 }
 0x1ef   : > { %v1256_v10 = vpop.f32.mrf.mxu1 }
 0x1f0   : > { %v7994_v16 = vmax.f32 %v1255_v13, 0.0  ;;  %v1257_v21 = vadd.f32 %v1256_v10, %v1204_v19 }
 0x1f1   : > { %v1258_v14 = vpop.f32.mrf.mxu1 }
 0x1f2   : > { %1433 = vrot.lane.b32.xlu0 %v7951_v56, %s7525_s12  ;;  %1359 = vrot.lane.b32.xlu1 %v7947_v52, %s7526_s13  ;;  %v1259_v17 = vadd.f32 %v1258_v14, %v1206_v15  ;;  %v8019_v24 = vmax.f32 %v1257_v21, 0.0 }
 0x1f3   : > { %v1260_v22 = vpop.f32.mrf.mxu1 }
 0x1f4   : > { %v8000_v18 = vmax.f32 %v1259_v17, 0.0  ;;  %v1261_v25 = vadd.f32 %v1260_v22, %v1208_v23 }
 0x1f6   : > { %1361 = vrot.lane.b32.xlu0 %v7951_v56, %s7526_s13  ;;  %1287 = vrot.lane.b32.xlu1 %v7947_v52, %s7527_s14  ;;  %v8025_v4 = vmax.f32 %v1261_v25, 0.0 }
 0x1fa   : > { %1289 = vrot.lane.b32.xlu0 %v7951_v56, %s7527_s14  ;;  %1747 = vrot.lane.b32.xlu1 %v7947_v52, %s7528_s16 }
 0x1fe   : > { %1749 = vrot.lane.b32.xlu0 %v7951_v56, %s7528_s16  ;;  %1511 = vrot.lane.b32.xlu1 %v7969_v62, %s7524_s7 }
 0x202   : > { %1513 = vrot.lane.b32.xlu0 %v7975_v1, %s7524_s7  ;;  %1439 = vrot.lane.b32.xlu1 %v7969_v62, %s7525_s12 }
 0x206   : > { %1441 = vrot.lane.b32.xlu0 %v7975_v1, %s7525_s12  ;;  %1367 = vrot.lane.b32.xlu1 %v7969_v62, %s7526_s13 }
 0x20a   : > { %1369 = vrot.lane.b32.xlu0 %v7975_v1, %s7526_s13  ;;  %1295 = vrot.lane.b32.xlu1 %v7969_v62, %s7527_s14 }
 0x20e   : > { %1297 = vrot.lane.b32.xlu0 %v7975_v1, %s7527_s14  ;;  %1755 = vrot.lane.b32.xlu1 %v7969_v62, %s7528_s16 }
 0x212   : > { %1757 = vrot.lane.b32.xlu0 %v7975_v1, %s7528_s16  ;;  %1507 = vrot.lane.b32.xlu1 %v7994_v16, %s7524_s7 }
 0x216   : > { %1509 = vrot.lane.b32.xlu0 %v8000_v18, %s7524_s7  ;;  %1435 = vrot.lane.b32.xlu1 %v7994_v16, %s7525_s12 }
 0x21a   : > { %1437 = vrot.lane.b32.xlu0 %v8000_v18, %s7525_s12  ;;  %1363 = vrot.lane.b32.xlu1 %v7994_v16, %s7526_s13 }
 0x21e   : > { %1365 = vrot.lane.b32.xlu0 %v8000_v18, %s7526_s13  ;;  %1291 = vrot.lane.b32.xlu1 %v7994_v16, %s7527_s14 }
 0x222   : > { %1293 = vrot.lane.b32.xlu0 %v8000_v18, %s7527_s14  ;;  %1751 = vrot.lane.b32.xlu1 %v7994_v16, %s7528_s16 }
 0x226   : > { %1753 = vrot.lane.b32.xlu0 %v8000_v18, %s7528_s16  ;;  %1515 = vrot.lane.b32.xlu1 %v8019_v24, %s7524_s7 }
 0x22a   : > { %1517 = vrot.lane.b32.xlu0 %v8025_v4, %s7524_s7  ;;  %1679 = vrot.lane.b32.xlu1 %v7994_v16, %s7529_s17 }
 0x22e   : > { %1681 = vrot.lane.b32.xlu0 %v8000_v18, %s7529_s17  ;;  %1443 = vrot.lane.b32.xlu1 %v8019_v24, %s7525_s12 }
 0x232   : > { %1445 = vrot.lane.b32.xlu0 %v8025_v4, %s7525_s12  ;;  %1371 = vrot.lane.b32.xlu1 %v8019_v24, %s7526_s13 }
 0x236   : > { %1677 = vrot.lane.b32.xlu0 %v7951_v56, %s7529_s17  ;;  %1299 = vrot.lane.b32.xlu1 %v8019_v24, %s7527_s14 }
 0x23a   : > { %1373 = vrot.lane.b32.xlu0 %v8025_v4, %s7526_s13  ;;  %1759 = vrot.lane.b32.xlu1 %v8019_v24, %s7528_s16 }
 0x23e   : > { %1685 = vrot.lane.b32.xlu0 %v7975_v1, %s7529_s17  ;;  %1687 = vrot.lane.b32.xlu1 %v8019_v24, %s7529_s17 }
 0x242   : > { %1301 = vrot.lane.b32.xlu0 %v8025_v4, %s7527_s14  ;;  %1675 = vrot.lane.b32.xlu1 %v7947_v52, %s7529_s17 }
 0x246   : > { %1609 = vrot.lane.b32.xlu0 %v8000_v18, %s7530_s19  ;;  %1683 = vrot.lane.b32.xlu1 %v7969_v62, %s7529_s17 }
 0x24a   : > { %1761 = vrot.lane.b32.xlu0 %v8025_v4, %s7528_s16  ;;  %1607 = vrot.lane.b32.xlu1 %v7994_v16, %s7530_s19 }
 0x24e   : > { %1605 = vrot.lane.b32.xlu0 %v7951_v56, %s7530_s19  ;;  %1615 = vrot.lane.b32.xlu1 %v8019_v24, %s7530_s19 }
 0x252   : > { %1689 = vrot.lane.b32.xlu0 %v8025_v4, %s7529_s17  ;;  %1603 = vrot.lane.b32.xlu1 %v7947_v52, %s7530_s19 }
 0x256   : > { %1613 = vrot.lane.b32.xlu0 %v7975_v1, %s7530_s19  ;;  %1611 = vrot.lane.b32.xlu1 %v7969_v62, %s7530_s19 }
 0x25a   : > { %1617 = vrot.lane.b32.xlu0 %v8025_v4, %s7530_s19  ;;  %1823 = vrot.lane.b32.xlu1 %v7994_v16, %s7531_s22 }
 0x25c   : > { %v8079_v27 = vpop.permute.xlu1 %1503 }
 0x25e   : > { %1825 = vrot.lane.b32.xlu0 %v8000_v18, %s7531_s22  ;;  %1831 = vrot.lane.b32.xlu1 %v8019_v24, %s7531_s22 }
 0x260   : > { %v1506_v28 = vpop.permute.xlu0 %1505  ;;  %v8085_v29 = vpop.permute.xlu1 %1431 }
 0x262   : > { %1821 = vrot.lane.b32.xlu0 %v7951_v56, %s7531_s22  ;;  %1819 = vrot.lane.b32.xlu1 %v7947_v52, %s7531_s22 }
 0x264   : > { %v8091_v31 = vpop.permute.xlu0 %1433  ;;  %v8093_v0 = vpop.permute.xlu1 %1359 }
 0x266   : > { %1833 = vrot.lane.b32.xlu0 %v8025_v4, %s7531_s22  ;;  %1827 = vrot.lane.b32.xlu1 %v7969_v62, %s7531_s22 }
 0x268   : > { %v8099_v32 = vpop.permute.xlu0 %1361  ;;  %v8101_v33 = vpop.permute.xlu1 %1287 }
 0x26a   : > { %1829 = vrot.lane.b32.xlu0 %v7975_v1, %s7531_s22  ;;  %1953 = vperm.xlu1 %7396, %v1903_v3  }
 0x26c   : > { %v8105_v36 = vpop.permute.xlu0 %1289  ;;  %v8107_v37 = vpop.permute.xlu1 %1747 }
 0x26e   : > { %1958 = vperm.xlu0 %7395, %v1904_v34   ;;  %1943 = vperm.xlu1 %7396, %v1901_v35  }
 0x270   : > { %v8109_v39 = vpop.permute.xlu0 %1749  ;;  %v1512_v40 = vpop.permute.xlu1 %1511 }
 0x271   : > { %v1519_v13 = vsel %vm490_vm0, %v8079_v27, %v1512_v40  ;;  %v1523_v3 = vsel %vm490_vm0, %v1512_v40, %v8079_v27 }
 0x272   : > { %1948 = vperm.xlu0 %7395, %v1902_v38   ;;  %v1540_v34 = vmul.f32 %v1536_v6, %v1519_v13 }
 0x274   : > { %v1514_v41 = vpop.permute.xlu0 %1513  ;;  %v8111_v42 = vpop.permute.xlu1 %1439 }
 0x275   : > { %v1520_v5 = vsel %vm490_vm0, %v1506_v28, %v1514_v41  ;;  %v1524_v17 = vsel %vm490_vm0, %v1514_v41, %v1506_v28  ;;  %v6492_v28 = vld [vmem:[%s10251_s3 + $0x4] sm:$0x3] }
 0x276   : > { %v1542_v19 = vmul.f32 %v1536_v6, %v1520_v5  ;;  %v1541_v35 = vmul.f32 %v1532_v12, %v1524_v17  ;;  %v1464_v27 = vrot.slane %v6492_v28, %v7738_v9 }
 0x278   : > { %v1442_v43 = vpop.permute.xlu0 %1441  ;;  %v8113_v44 = vpop.permute.xlu1 %1367  ;;  %v7185_v5 = vpack.c.bf16 %v1542_v19, %v1540_v34 }
 0x279   : > { %v1452_v17 = vsel %vm416_vm1, %v1442_v43, %v8091_v31 }
 0x27c   : > { %v8115_v45 = vpop.permute.xlu0 %1369  ;;  %v8117_v46 = vpop.permute.xlu1 %1295 }
 0x280   : > { %v8119_v47 = vpop.permute.xlu0 %1297  ;;  %v8121_v48 = vpop.permute.xlu1 %1755 }
 0x284   : > { %v8123_v49 = vpop.permute.xlu0 %1757  ;;  %v1508_v50 = vpop.permute.xlu1 %1507 }
 0x288   : > { %v1510_v51 = vpop.permute.xlu0 %1509  ;;  %v1436_v53 = vpop.permute.xlu1 %1435 }
 0x28c   : > { %v1438_v54 = vpop.permute.xlu0 %1437  ;;  %v8125_v55 = vpop.permute.xlu1 %1363 }
 0x290   : > { %v8127_v57 = vpop.permute.xlu0 %1365  ;;  %v8129_v58 = vpop.permute.xlu1 %1291 }
 0x294   : > { %v8131_v59 = vpop.permute.xlu0 %1293  ;;  %v8133_v60 = vpop.permute.xlu1 %1751 }
 0x298   : > { %v8138_v63 = vpop.permute.xlu0 %1753  ;;  %v1516_v2 = vpop.permute.xlu1 %1515 }
 0x299   : > { %v1521_v10 = vsel %vm490_vm0, %v1508_v50, %v1516_v2  ;;  %v1525_v11 = vsel %vm490_vm0, %v1516_v2, %v1508_v50  ;;  %v1448_v2 = vsel %vm416_vm1, %v8091_v31, %v1442_v43  ;;  %v6487_v31 = vld [vmem:[%s10251_s3 + $0x2] sm:$0x3] }
 0x29a   : > { %v1543_v22 = vmul.f32 %v1532_v12, %v1525_v11  ;;  %v1544_v23 = vmul.f32 %v1536_v6, %v1521_v10  ;;  %v1460_v11 = vrot.slane %v6492_v28, %v7736_v8  ;;  %v1470_v19 = vmul.f32 %v1464_v27, %v1448_v2 }
 0x29c   : > { %v1518_v14 = vpop.permute.xlu0 %1517  ;;  %v8151_v15 = vpop.permute.xlu1 %1679  ;;  %v1469_v34 = vmul.f32 %v1460_v11, %v1452_v17 }
 0x29d   : > { %v1522_v20 = vsel %vm490_vm0, %v1510_v51, %v1518_v14  ;;  %v1526_v21 = vsel %vm490_vm0, %v1518_v14, %v1510_v51  ;;  %v1539_v51 = vmul.f32 %v1532_v12, %v1523_v3 }
 0x29e   : > { %v1545_v25 = vmul.f32 %v1532_v12, %v1526_v21  ;;  %v1546_v30 = vmul.f32 %v1536_v6, %v1522_v20  ;;  %v1447_v12 = vsel %vm416_vm1, %v8085_v29, %v8111_v42 }
 0x29f   : > { %v7184_v10 = vpack.c.bf16 %v1541_v35, %v1539_v51  ;;  %v1468_v3 = vmul.f32 %v1464_v27, %v1447_v12 }
 0x2a0   : > { %v7186_v38 = vpack.c.bf16 %v1545_v25, %v1543_v22  ;;  %v8165_v41 = vpop.permute.xlu0 %1681  ;;  %v1444_v50 = vpop.permute.xlu1 %1443  ;;  %v7187_v61 = vpack.c.bf16 %v1546_v30, %v1544_v23  ;;  %v1451_v30 = vsel %vm416_vm1, %v8111_v42, %v8085_v29  ;;  %v1392_v42 = vrot.slane %v6487_v31, %v7738_v9 }
 0x2a1   : > { %v1449_v40 = vsel %vm416_vm1, %v1436_v53, %v1444_v50  ;;  %v1453_v6 = vsel %vm416_vm1, %v1444_v50, %v1436_v53  ;;  %v1376_v50 = vsel %vm342_vm2, %v8099_v32, %v8115_v45  ;;  %v7181_v29 = vpack.c.bf16 %v1470_v19, %v1468_v3 }
 0x2a2   : > { %2177 = vmatprep.subr.bf16.mxu1 %v7187_v61  ;;  %v1471_v21 = vmul.f32 %v1460_v11, %v1453_v6  ;;  %v1472_v22 = vmul.f32 %v1464_v27, %v1449_v40 }
 0x2a3   : > { %2178 = vmatpush1.bf16.msra.mxu1 %v7186_v38  ;;  %v1467_v38 = vmul.f32 %v1460_v11, %v1451_v30  ;;  %v1304_v30 = vsel %vm269_vm3, %v8105_v36, %v8119_v47 }
 0x2a4   : > { %v1446_v13 = vpop.permute.xlu0 %1445  ;;  %2179 = vmatprep.subr.bf16.mxu1 %v7185_v5  ;;  %v1372_v14 = vpop.permute.xlu1 %1371  ;;  %v1388_v5 = vrot.slane %v6487_v31, %v7736_v8 }
 0x2a5   : > { %v1450_v53 = vsel %vm416_vm1, %v1438_v54, %v1446_v13  ;;  %v1454_v20 = vsel %vm416_vm1, %v1446_v13, %v1438_v54  ;;  %v1377_v61 = vsel %vm342_vm2, %v8125_v55, %v1372_v14  ;;  %v1381_v51 = vsel %vm342_vm2, %v1372_v14, %v8125_v55 }
 0x2a6   : > { %v1473_v23 = vmul.f32 %v1460_v11, %v1454_v20  ;;  %v1474_v25 = vmul.f32 %v1464_v27, %v1450_v53  ;;  %v7180_v2 = vpack.c.bf16 %v1469_v34, %v1467_v38  ;;  %v1375_v27 = vsel %vm342_vm2, %v8093_v0, %v8113_v44  ;;  %v1311_v20 = vld [vmem:[%s10251_s3] sm:$0x3] }
 0x2a7   : > { %2180 = vmatpush1.bf16.msra.mxu1 %v7184_v10  ;;  %v1380_v10 = vsel %vm342_vm2, %v8115_v45, %v8099_v32  ;;  %v1398_v11 = vmul.f32 %v1392_v42, %v1376_v50  ;;  %v1399_v13 = vmul.f32 %v1388_v5, %v1381_v51  ;;  %v1400_v14 = vmul.f32 %v1392_v42, %v1377_v61 }
 0x2a8   : > { %v7182_v43 = vpack.c.bf16 %v1473_v23, %v1471_v21  ;;  %v8194_v35 = vpop.permute.xlu0 %1677  ;;  %v1300_v54 = vpop.permute.xlu1 %1299  ;;  %v7183_v28 = vpack.c.bf16 %v1474_v25, %v1472_v22  ;;  %v1379_v53 = vsel %vm342_vm2, %v8113_v44, %v8093_v0  ;;  %v1396_v32 = vmul.f32 %v1392_v42, %v1375_v27 }
 0x2a9   : > { %v1397_v45 = vmul.f32 %v1388_v5, %v1380_v10  ;;  %v1395_v25 = vmul.f32 %v1388_v5, %v1379_v53  ;;  %v1320_v44 = vrot.slane %v1311_v20, %v7738_v9  ;;  %v1305_v3 = vsel %vm269_vm3, %v8129_v58, %v1300_v54 }
 0x2aa   : > { %2181 = vmatprep.subr.bf16.mxu1 %v7183_v28  ;;  %v7177_v0 = vpack.c.bf16 %v1398_v11, %v1396_v32  ;;  %v1309_v34 = vsel %vm269_vm3, %v1300_v54, %v8129_v58  ;;  %v1303_v28 = vsel %vm269_vm3, %v8101_v33, %v8117_v46  ;;  %v1307_v27 = vsel %vm269_vm3, %v8117_v46, %v8101_v33 }
 0x2ab   : > { %2182 = vmatpush1.bf16.msra.mxu1 %v7182_v43  ;;  %v7176_v31 = vpack.c.bf16 %v1397_v45, %v1395_v25  ;;  %v1316_v43 = vrot.slane %v1311_v20, %v7736_v8  ;;  %v1328_v51 = vmul.f32 %v1320_v44, %v1305_v3  ;;  %v1767_v32 = vsel %vm740_vm4, %v8121_v48, %v8107_v37 }
 0x2ac   : > { %v1374_v40 = vpop.permute.xlu0 %1373  ;;  %2183 = vmatprep.subr.bf16.mxu1 %v7181_v29  ;;  %v1760_v6 = vpop.permute.xlu1 %1759  ;;  %v1308_v29 = vsel %vm269_vm3, %v8119_v47, %v8105_v36  ;;  %v1324_v36 = vmul.f32 %v1320_v44, %v1303_v28 }
 0x2ad   : > { %v1378_v55 = vsel %vm342_vm2, %v8127_v57, %v1374_v40  ;;  %v1382_v12 = vsel %vm342_vm2, %v1374_v40, %v8127_v57  ;;  %v1327_v61 = vmul.f32 %v1316_v43, %v1309_v34  ;;  %v1325_v47 = vmul.f32 %v1316_v43, %v1308_v29  ;;  %v6516_v40 = vld [vmem:[%s10251_s3 + $0xe] sm:$0x3] }
 0x2ae   : > { %v1401_v17 = vmul.f32 %v1388_v5, %v1382_v12  ;;  %v1402_v19 = vmul.f32 %v1392_v42, %v1378_v55  ;;  %v1326_v42 = vmul.f32 %v1320_v44, %v1304_v30  ;;  %v1323_v12 = vmul.f32 %v1316_v43, %v1307_v27 }
 0x2af   : > { %2184 = vmatpush1.bf16.msra.mxu1 %v7180_v2  ;;  %v1780_v46 = vrot.slane %v6516_v40, %v7738_v9  ;;  %v1776_v53 = vrot.slane %v6516_v40, %v7736_v8 }
 0x2b0   : > { %v7178_v21 = vpack.c.bf16 %v1401_v17, %v1399_v13  ;;  %v8229_v22 = vpop.permute.xlu0 %1685  ;;  %v8231_v57 = vpop.permute.xlu1 %1687  ;;  %v7179_v23 = vpack.c.bf16 %v1402_v19, %v1400_v14  ;;  %v1768_v13 = vsel %vm740_vm4, %v8123_v49, %v8109_v39  ;;  %v7173_v33 = vpack.c.bf16 %v1326_v42, %v1324_v36 }
 0x2b1   : > { %v1765_v14 = vsel %vm740_vm4, %v8133_v60, %v1760_v6  ;;  %v1769_v17 = vsel %vm740_vm4, %v1760_v6, %v8133_v60  ;;  %v7172_v19 = vpack.c.bf16 %v1325_v47, %v1323_v12 }
 0x2b2   : > { %2185 = vmatprep.subr.bf16.mxu1 %v7179_v23  ;;  %v1786_v23 = vmul.f32 %v1780_v46, %v1768_v13  ;;  %v1787_v25 = vmul.f32 %v1776_v53, %v1765_v14  ;;  %v1788_v30 = vmul.f32 %v1780_v46, %v1769_v17  ;;  %v1692_v13 = vsel %vm666_vm5, %v8194_v35, %v8229_v22 }
 0x2b3   : > { %2186 = vmatpush1.bf16.msra.mxu1 %v7178_v21  ;;  %v1764_v21 = vsel %vm740_vm4, %v8109_v39, %v8123_v49  ;;  %v1763_v39 = vsel %vm740_vm4, %v8107_v37, %v8121_v48  ;;  %v1784_v49 = vmul.f32 %v1780_v46, %v1767_v32  ;;  %v1697_v37 = vsel %vm666_vm5, %v8231_v57, %v8151_v15 }
 0x2b4   : > { %v1302_v38 = vpop.permute.xlu0 %1301  ;;  %2187 = vmatprep.subr.bf16.mxu1 %v7177_v0  ;;  %v8249_v50 = vpop.permute.xlu1 %1675  ;;  %v6511_v0 = vld [vmem:[%s10251_s3 + $0xc] sm:$0x3]  ;;  %v1785_v34 = vmul.f32 %v1776_v53, %v1764_v21  ;;  %v1783_v29 = vmul.f32 %v1776_v53, %v1763_v39 }
 0x2b5   : > { %v1306_v58 = vsel %vm269_vm3, %v8131_v59, %v1302_v38  ;;  %v1310_v54 = vsel %vm269_vm3, %v1302_v38, %v8131_v59  ;;  %v1704_v38 = vrot.slane %v6511_v0, %v7736_v8  ;;  %v1708_v42 = vrot.slane %v6511_v0, %v7738_v9 }
 0x2b6   : > { %v1329_v2 = vmul.f32 %v1316_v43, %v1310_v54  ;;  %v1330_v5 = vmul.f32 %v1320_v44, %v1306_v58  ;;  %v1693_v58 = vsel %vm666_vm5, %v8151_v15, %v8231_v57  ;;  %v7201_v54 = vpack.c.bf16 %v1786_v23, %v1784_v49 }
 0x2b7   : > { %2188 = vmatpush1.bf16.msra.mxu1 %v7176_v31  ;;  %v1715_v36 = vmul.f32 %v1704_v38, %v1693_v58  ;;  %v1716_v40 = vmul.f32 %v1708_v42, %v1697_v37 }
 0x2b8   : > { %v7174_v10 = vpack.c.bf16 %v1329_v2, %v1327_v61  ;;  %v8268_v11 = vpop.permute.xlu0 %1609  ;;  %v1684_v59 = vpop.permute.xlu1 %1683  ;;  %v7175_v55 = vpack.c.bf16 %v1330_v5, %v1328_v51  ;;  %v7200_v61 = vpack.c.bf16 %v1785_v34, %v1783_v29  ;;  %v1696_v51 = vsel %vm666_vm5, %v8229_v22, %v8194_v35  ;;  %v6506_v2 = vld [vmem:[%s10251_s3 + $0xa] sm:$0x3] }
 0x2b9   : > { %v1695_v48 = vsel %vm666_vm5, %v1684_v59, %v8249_v50  ;;  %v1691_v15 = vsel %vm666_vm5, %v8249_v50, %v1684_v59  ;;  %v1636_v50 = vrot.slane %v6506_v2, %v7738_v9  ;;  %v1714_v59 = vmul.f32 %v1708_v42, %v1696_v51 }
 0x2ba   : > { %2189 = vmatprep.subr.bf16.mxu1 %v7175_v55 }
 0x2bb   : > { %2190 = vmatpush1.bf16.msra.mxu1 %v7174_v10  ;;  %v1712_v10 = vmul.f32 %v1708_v42, %v1695_v48 }
 0x2bc   : > { %v1762_v45 = vpop.permute.xlu0 %1761  ;;  %2191 = vmatprep.subr.bf16.mxu1 %v7173_v33  ;;  %v1608_v20 = vpop.permute.xlu1 %1607  ;;  %v1632_v33 = vrot.slane %v6506_v2, %v7736_v8  ;;  %v7191_v2 = vpack.c.bf16 %v8025_v4, %v8019_v24  ;;  %v7189_v24 = vpack.c.bf16 %v7975_v1, %v7969_v62  ;;  %v7188_v1 = vpack.c.bf16 %v7951_v56, %v7947_v52  ;;  %v7413_v52 = vld [vmem:[#allocation4 + $0x50] ss:$12 sps:$4 sm:$0xff]  }
 0x2bd   : > { %v1766_v60 = vsel %vm740_vm4, %v8138_v63, %v1762_v45  ;;  %v1770_v6 = vsel %vm740_vm4, %v1762_v45, %v8138_v63  ;;  %v1713_v45 = vmul.f32 %v1704_v38, %v1692_v13  ;;  %v7197_v35 = vpack.c.bf16 %v1714_v59, %v1712_v10 }
 0x2be   : > { %v1789_v44 = vmul.f32 %v1776_v53, %v1766_v60  ;;  %v1790_v3 = vmul.f32 %v1780_v46, %v1770_v6  ;;  %v1711_v46 = vmul.f32 %v1704_v38, %v1691_v15 }
 0x2bf   : > { %2192 = vmatpush1.bf16.msra.mxu1 %v7172_v19 }
 0x2c0   : > { %v7202_v31 = vpack.c.bf16 %v1789_v44, %v1787_v25  ;;  %v1606_v43 = vpop.permute.xlu0 %1605  ;;  %v1616_v28 = vpop.permute.xlu1 %1615  ;;  %v7203_v63 = vpack.c.bf16 %v1790_v3, %v1788_v30  ;;  %v7196_v23 = vpack.c.bf16 %v1713_v45, %v1711_v46 }
 0x2c1   : > { %v1621_v53 = vsel %vm592_vm6, %v1608_v20, %v1616_v28  ;;  %v1625_v32 = vsel %vm592_vm6, %v1616_v28, %v1608_v20 }
 0x2c2   : > { %2193 = vmatprep.subr.bf16.mxu1 %v7203_v63  ;;  %v1643_v60 = vmul.f32 %v1632_v33, %v1621_v53  ;;  %v1644_v6 = vmul.f32 %v1636_v50, %v1625_v32  ;;  %v7410_v53 = vld [vmem:[#allocation4 + $0x4c] ss:$12 sps:$4 sm:$0xff]  }
 0x2c3   : > { %2194 = vmatpush2.bf16.msra.mxu1 %v7202_v31 }
 0x2c4   : > { %v1690_v5 = vpop.permute.xlu0 %1689  ;;  %2195 = vmatprep.subr.bf16.mxu1 %v7201_v54  ;;  %v1604_v27 = vpop.permute.xlu1 %1603  ;;  %v6521_v54 = vld [vmem:[%s10251_s3 + $0x10] sm:$0x3] }
 0x2c5   : > { %v1694_v57 = vsel %vm666_vm5, %v8165_v41, %v1690_v5  ;;  %v1698_v47 = vsel %vm666_vm5, %v1690_v5, %v8165_v41  ;;  %v1852_v51 = vrot.slane %v6521_v54, %v7738_v9 }
 0x2c6   : > { %v1717_v55 = vmul.f32 %v1704_v38, %v1694_v57  ;;  %v1718_v12 = vmul.f32 %v1708_v42, %v1698_v47 }
 0x2c7   : > { %2196 = vmatpush2.bf16.msra.mxu1 %v7200_v61  ;;  %v1848_v61 = vrot.slane %v6521_v54, %v7736_v8 }
 0x2c8   : > { %v7198_v14 = vpack.c.bf16 %v1717_v55, %v1715_v36  ;;  %v1614_v17 = vpop.permute.xlu0 %1613  ;;  %v1612_v19 = vpop.permute.xlu1 %1611  ;;  %v7199_v41 = vpack.c.bf16 %v1718_v12, %v1716_v40  ;;  %v7190_v40 = vpack.c.bf16 %v8000_v18, %v7994_v16 }
 0x2c9   : > { %v1624_v22 = vsel %vm592_vm6, %v1614_v17, %v1606_v43  ;;  %v1623_v21 = vsel %vm592_vm6, %v1612_v19, %v1604_v27  ;;  %v1620_v0 = vsel %vm592_vm6, %v1606_v43, %v1614_v17  ;;  %v1619_v20 = vsel %vm592_vm6, %v1604_v27, %v1612_v19 }
 0x2ca   : > { %2197 = vmatprep.subr.bf16.mxu1 %v7199_v41  ;;  %v1642_v39 = vmul.f32 %v1636_v50, %v1624_v22  ;;  %v1640_v49 = vmul.f32 %v1636_v50, %v1623_v21  ;;  %v1641_v29 = vmul.f32 %v1632_v33, %v1620_v0  ;;  %v1639_v42 = vmul.f32 %v1632_v33, %v1619_v20  ;;  %v7406_v41 = vld [vmem:[#allocation4 + $0x30] ss:$12 sps:$4 sm:$0xff]   ;;  %v7412_v22 = vld [vmem:[#allocation4 + $0x48] ss:$12 sps:$4 sm:$0xff]  }
 0x2cb   : > { %2198 = vmatpush2.bf16.msra.mxu1 %v7198_v14 }
 0x2cc   : > { %v1618_v25 = vpop.permute.xlu0 %1617  ;;  %2199 = vmatprep.subr.bf16.mxu1 %v7197_v35  ;;  %v1824_v30 = vpop.permute.xlu1 %1823  ;;  %v7193_v58 = vpack.c.bf16 %v1642_v39, %v1640_v49  ;;  %v7192_v48 = vpack.c.bf16 %v1641_v29, %v1639_v42  ;;  %v7409_v35 = vld [vmem:[#allocation4 + $0x38] ss:$12 sps:$4 sm:$0xff]  }
 0x2cd   : > { %v1622_v44 = vsel %vm592_vm6, %v8268_v11, %v1618_v25  ;;  %v1626_v3 = vsel %vm592_vm6, %v1618_v25, %v8268_v11 }
 0x2ce   : > { %v1645_v34 = vmul.f32 %v1632_v33, %v1622_v44  ;;  %v1646_v31 = vmul.f32 %v1636_v50, %v1626_v3 }
 0x2cf   : > { %2200 = vmatpush2.bf16.msra.mxu1 %v7196_v23 }
 0x2d0   : > { %v7194_v28 = vpack.c.bf16 %v1645_v34, %v1643_v60  ;;  %v1826_v63 = vpop.permute.xlu0 %1825  ;;  %v1832_v38 = vpop.permute.xlu1 %1831  ;;  %v7195_v43 = vpack.c.bf16 %v1646_v31, %v1644_v6 }
 0x2d1   : > { %v1837_v5 = vsel %vm814_vm7, %v1824_v30, %v1832_v38  ;;  %v1841_v27 = vsel %vm814_vm7, %v1832_v38, %v1824_v30 }
 0x2d2   : > { %2201 = vmatprep.subr.bf16.mxu1 %v7195_v43  ;;  %v1859_v4 = vmul.f32 %v1848_v61, %v1837_v5  ;;  %v1860_v10 = vmul.f32 %v1852_v51, %v1841_v27 }
 0x2d3   : > { %2202 = vmatpush2.bf16.msra.mxu1 %v7194_v28 }
 0x2d4   : > { %v1822_v37 = vpop.permute.xlu0 %1821  ;;  %2203 = vmatprep.subr.bf16.mxu1 %v7193_v58  ;;  %v1820_v11 = vpop.permute.xlu1 %1819 }
 0x2d7   : > { %2204 = vmatpush2.bf16.msra.mxu1 %v7192_v48 }
 0x2d8   : > { %v1834_v36 = vpop.permute.xlu0 %1833  ;;  %2205 = vmatprep.subr.bf16.mxu1 %v7191_v2  ;;  %v1828_v15 = vpop.permute.xlu1 %1827 }
 0x2d9   : > { %v1838_v57 = vsel %vm814_vm7, %v1826_v63, %v1834_v36  ;;  %v1842_v47 = vsel %vm814_vm7, %v1834_v36, %v1826_v63  ;;  %v1835_v13 = vsel %vm814_vm7, %v1820_v11, %v1828_v15  ;;  %v1839_v33 = vsel %vm814_vm7, %v1828_v15, %v1820_v11 }
 0x2da   : > { %v1861_v55 = vmul.f32 %v1848_v61, %v1838_v57  ;;  %v1862_v12 = vmul.f32 %v1852_v51, %v1842_v47  ;;  %v1855_v18 = vmul.f32 %v1848_v61, %v1835_v13  ;;  %v1856_v14 = vmul.f32 %v1852_v51, %v1839_v33 }
 0x2db   : > { %2206 = vmatpush2.bf16.msra.mxu1 %v7190_v40 }
 0x2dc   : > { %v7206_v50 = vpack.c.bf16 %v1861_v55, %v1859_v4  ;;  %v1830_v59 = vpop.permute.xlu0 %1829  ;;  %2207 = vmatprep.subr.bf16.mxu1 %v7189_v24  ;;  %v7207_v46 = vpack.c.bf16 %v1862_v12, %v1860_v10 }
 0x2dd   : > { %v1836_v16 = vsel %vm814_vm7, %v1822_v37, %v1830_v59  ;;  %v1840_v62 = vsel %vm814_vm7, %v1830_v59, %v1822_v37 }
 0x2de   : > { %v1857_v17 = vmul.f32 %v1848_v61, %v1836_v16  ;;  %v1858_v19 = vmul.f32 %v1852_v51, %v1840_v62  ;;  %2242 = vmatprep.subr.bf16.mxu0 %v7207_v46  ;;  %v7416_v62 = vld [vmem:[#allocation4 + $0x64] ss:$12 sps:$4 sm:$0xff]  }
 0x2df   : > { %2208 = vmatpush2.bf16.msra.mxu1 %v7188_v1  ;;  %2243 = vmatpush1.bf16.msra.mxu0 %v7206_v50 }
 0x2e0   : > { %v7204_v32 = vpack.c.bf16 %v1857_v17, %v1855_v18  ;;  %v7205_v45 = vpack.c.bf16 %v1858_v19, %v1856_v14  ;;  %v2923_v14 = vld [vmem:[#allocation6 + $0x50] sm:$0xff] }
 0x2e2   : > { %2210 = vmatmul.mubr.bf16.vlgmr.msra.gmra.mxu1 %v7406_v41  ;;  %2244 = vmatprep.subr.bf16.mxu0 %v7205_v45  ;;  %v2924_v41 = vld [vmem:[#allocation6 + $0x58] sm:$0xff] }
 0x2e3   : > { %2245 = vmatpush1.bf16.msra.mxu0 %v7204_v32  ;;  %2219 = vmatprep.mubr.bf16.mxu1 %v7410_v53  ;;  %v2921_v53 = vld [vmem:[#allocation6 + $0x40] sm:$0xff] }
 0x2e5   : > { %v1954_v56 = vpop.permute.xlu1 %1953 }
 0x2e6   : > { %6568 = vmatmul.mubr.msk.bf16.vlgmr.msra.gmra.mxu0 %vm1150_vm8, %v7409_v35  ;;  %v2922_v35 = vld [vmem:[#allocation6 + $0x48] sm:$0xff] }
 0x2e7   : > { %2272 = vmatprep.mubr.bf16.mxu0 %v7532_v26 }
 0x2e9   : > { %v8389_v21 = vpop.permute.xlu0 %1958  ;;  %v1944_v60 = vpop.permute.xlu1 %1943 }
 0x2ea   : > { %2220 = vmatmul.mubr.bf16.gmra.mxu1 %v7412_v22 }
 0x2eb   : > { %3229 = vmatprep.mubr.bf16.mxu1 %v7416_v62 }
 0x2ed   : > { %v1949_v44 = vpop.permute.xlu0 %1948 }
 0x2ee   : > { %6569 = vmatmul.mubr.msk.bf16.gmra.mxu0 %vm1150_vm8, %v7413_v52 }
 0x2ef   : > { %3282 = vmatprep.mubr.bf16.mxu0 %v7532_v26 }
 0x3a2   : > { %v2211_v23 = vpop.f32.mrf.mxu1 }
 0x3a3   : > { %v2212_v25 = vadd.f32 %v2211_v23, %v1944_v60 }
 0x3a4   : > { %v2213_v6 = vpop.f32.mrf.mxu1 }
 0x3a5   : > { %v2214_v63 = vadd.f32 %v2213_v6, %v1944_v60 }
 0x3a6   : > { %v2215_v30 = vpop.f32.mrf.mxu1  ;;  %v2264_v0 = vpop.f32.mrf.mxu0 }
 0x3a7   : > { %v2265_v20 = vadd.f32 %v2264_v0, %v2212_v25  ;;  %v2216_v39 = vadd.f32 %v2215_v30, %v1949_v44 }
 0x3a8   : > { %v2266_v3 = vpop.f32.mrf.mxu0  ;;  %v2217_v38 = vpop.f32.mrf.mxu1 }
 0x3a9   : > { %v8391_v49 = vmax.f32 %v2265_v20, 0.0  ;;  %v2267_v43 = vadd.f32 %v2266_v3, %v2214_v63  ;;  %v2218_v42 = vadd.f32 %v2217_v38, %v1949_v44 }
 0x3aa   : > { %v2268_v34 = vpop.f32.mrf.mxu0  ;;  %v2221_v11 = vpop.f32.mrf.mxu1 }
 0x3ab   : > { %v2269_v31 = vadd.f32 %v2268_v34, %v2216_v39  ;;  %2523 = vrot.lane.b32.xlu1 %v8391_v49, %s7524_s7  ;;  %v8413_v58 = vmax.f32 %v2267_v43, 0.0  ;;  %v2222_v2 = vadd.f32 %v2221_v11, %v1954_v56 }
 0x3ac   : > { %v2270_v29 = vpop.f32.mrf.mxu0  ;;  %v2223_v61 = vpop.f32.mrf.mxu1 }
 0x3ad   : > { %v8395_v28 = vmax.f32 %v2269_v31, 0.0  ;;  %v2271_v54 = vadd.f32 %v2270_v29, %v2218_v42  ;;  %v2224_v24 = vadd.f32 %v2223_v61, %v1954_v56  ;;  %v6584_v42 = vld [vmem:[%s10251_s3 + $0x6] sm:$0x3] }
 0x3ae   : > { %v2274_v48 = vpop.f32.mrf.mxu0  ;;  %v2225_v5 = vpop.f32.mrf.mxu1  ;;  %v2556_v61 = vrot.slane %v6584_v42, %v7738_v9 }
 0x3af   : > { %2525 = vrot.lane.b32.xlu0 %v8395_v28, %s7524_s7  ;;  %2451 = vrot.lane.b32.xlu1 %v8391_v49, %s7525_s12  ;;  %v8419_v37 = vmax.f32 %v2271_v54, 0.0  ;;  %v2275_v27 = vadd.f32 %v2274_v48, %v2222_v2  ;;  %v2226_v15 = vadd.f32 %v2225_v5, %v8389_v21  ;;  %v2552_v5 = vrot.slane %v6584_v42, %v7736_v8 }
 0x3b0   : > { %v2276_v51 = vpop.f32.mrf.mxu0  ;;  %v2227_v4 = vpop.f32.mrf.mxu1 }
 0x3b1   : > { %v8438_v57 = vmax.f32 %v2275_v27, 0.0  ;;  %v2277_v10 = vadd.f32 %v2276_v51, %v2224_v24  ;;  %v2228_v12 = vadd.f32 %v2227_v4, %v8389_v21 }
 0x3b2   : > { %v2278_v36 = vpop.f32.mrf.mxu0 }
 0x3b3   : > { %2453 = vrot.lane.b32.xlu0 %v8395_v28, %s7525_s12  ;;  %2379 = vrot.lane.b32.xlu1 %v8391_v49, %s7526_s13  ;;  %v2279_v47 = vadd.f32 %v2278_v36, %v2226_v15  ;;  %v8463_v13 = vmax.f32 %v2277_v10, 0.0 }
 0x3b4   : > { %v2280_v55 = vpop.f32.mrf.mxu0 }
 0x3b5   : > { %v8444_v40 = vmax.f32 %v2279_v47, 0.0  ;;  %v2281_v33 = vadd.f32 %v2280_v55, %v2228_v12 }
 0x3b7   : > { %2381 = vrot.lane.b32.xlu0 %v8395_v28, %s7526_s13  ;;  %2307 = vrot.lane.b32.xlu1 %v8391_v49, %s7527_s14  ;;  %v8469_v50 = vmax.f32 %v2281_v33, 0.0 }
 0x3bb   : > { %2309 = vrot.lane.b32.xlu0 %v8395_v28, %s7527_s14  ;;  %2767 = vrot.lane.b32.xlu1 %v8391_v49, %s7528_s16 }
 0x3bf   : > { %2769 = vrot.lane.b32.xlu0 %v8395_v28, %s7528_s16  ;;  %2531 = vrot.lane.b32.xlu1 %v8413_v58, %s7524_s7 }
 0x3c3   : > { %2533 = vrot.lane.b32.xlu0 %v8419_v37, %s7524_s7  ;;  %2459 = vrot.lane.b32.xlu1 %v8413_v58, %s7525_s12 }
 0x3c7   : > { %2461 = vrot.lane.b32.xlu0 %v8419_v37, %s7525_s12  ;;  %2387 = vrot.lane.b32.xlu1 %v8413_v58, %s7526_s13 }
 0x3cb   : > { %2389 = vrot.lane.b32.xlu0 %v8419_v37, %s7526_s13  ;;  %2315 = vrot.lane.b32.xlu1 %v8413_v58, %s7527_s14 }
 0x3cf   : > { %2317 = vrot.lane.b32.xlu0 %v8419_v37, %s7527_s14  ;;  %2775 = vrot.lane.b32.xlu1 %v8413_v58, %s7528_s16 }
 0x3d3   : > { %2777 = vrot.lane.b32.xlu0 %v8419_v37, %s7528_s16  ;;  %2527 = vrot.lane.b32.xlu1 %v8438_v57, %s7524_s7 }
 0x3d7   : > { %2529 = vrot.lane.b32.xlu0 %v8444_v40, %s7524_s7  ;;  %2455 = vrot.lane.b32.xlu1 %v8438_v57, %s7525_s12 }
 0x3db   : > { %2457 = vrot.lane.b32.xlu0 %v8444_v40, %s7525_s12  ;;  %2383 = vrot.lane.b32.xlu1 %v8438_v57, %s7526_s13 }
 0x3df   : > { %2385 = vrot.lane.b32.xlu0 %v8444_v40, %s7526_s13  ;;  %2311 = vrot.lane.b32.xlu1 %v8438_v57, %s7527_s14 }
 0x3e3   : > { %2313 = vrot.lane.b32.xlu0 %v8444_v40, %s7527_s14  ;;  %2771 = vrot.lane.b32.xlu1 %v8438_v57, %s7528_s16 }
 0x3e7   : > { %2773 = vrot.lane.b32.xlu0 %v8444_v40, %s7528_s16  ;;  %2535 = vrot.lane.b32.xlu1 %v8463_v13, %s7524_s7 }
 0x3eb   : > { %2537 = vrot.lane.b32.xlu0 %v8469_v50, %s7524_s7  ;;  %2699 = vrot.lane.b32.xlu1 %v8438_v57, %s7529_s17 }
 0x3ef   : > { %2701 = vrot.lane.b32.xlu0 %v8444_v40, %s7529_s17  ;;  %2463 = vrot.lane.b32.xlu1 %v8463_v13, %s7525_s12 }
 0x3f3   : > { %2465 = vrot.lane.b32.xlu0 %v8469_v50, %s7525_s12  ;;  %2391 = vrot.lane.b32.xlu1 %v8463_v13, %s7526_s13 }
 0x3f7   : > { %2697 = vrot.lane.b32.xlu0 %v8395_v28, %s7529_s17  ;;  %2319 = vrot.lane.b32.xlu1 %v8463_v13, %s7527_s14 }
 0x3fb   : > { %2393 = vrot.lane.b32.xlu0 %v8469_v50, %s7526_s13  ;;  %2779 = vrot.lane.b32.xlu1 %v8463_v13, %s7528_s16 }
 0x3ff   : > { %2705 = vrot.lane.b32.xlu0 %v8419_v37, %s7529_s17  ;;  %2707 = vrot.lane.b32.xlu1 %v8463_v13, %s7529_s17 }
 0x403   : > { %2321 = vrot.lane.b32.xlu0 %v8469_v50, %s7527_s14  ;;  %2695 = vrot.lane.b32.xlu1 %v8391_v49, %s7529_s17 }
 0x407   : > { %2629 = vrot.lane.b32.xlu0 %v8444_v40, %s7530_s19  ;;  %2703 = vrot.lane.b32.xlu1 %v8413_v58, %s7529_s17 }
 0x40b   : > { %2781 = vrot.lane.b32.xlu0 %v8469_v50, %s7528_s16  ;;  %2627 = vrot.lane.b32.xlu1 %v8438_v57, %s7530_s19 }
 0x40f   : > { %2625 = vrot.lane.b32.xlu0 %v8395_v28, %s7530_s19  ;;  %2635 = vrot.lane.b32.xlu1 %v8463_v13, %s7530_s19 }
 0x413   : > { %2709 = vrot.lane.b32.xlu0 %v8469_v50, %s7529_s17  ;;  %2623 = vrot.lane.b32.xlu1 %v8391_v49, %s7530_s19 }
 0x417   : > { %2633 = vrot.lane.b32.xlu0 %v8419_v37, %s7530_s19  ;;  %2631 = vrot.lane.b32.xlu1 %v8413_v58, %s7530_s19 }
 0x41b   : > { %2637 = vrot.lane.b32.xlu0 %v8469_v50, %s7530_s19  ;;  %2843 = vrot.lane.b32.xlu1 %v8438_v57, %s7531_s22 }
 0x41d   : > { %v8523_v59 = vpop.permute.xlu1 %2523 }
 0x41f   : > { %2845 = vrot.lane.b32.xlu0 %v8444_v40, %s7531_s22  ;;  %2851 = vrot.lane.b32.xlu1 %v8463_v13, %s7531_s22 }
 0x421   : > { %v2526_v46 = vpop.permute.xlu0 %2525  ;;  %v8529_v16 = vpop.permute.xlu1 %2451 }
 0x423   : > { %2841 = vrot.lane.b32.xlu0 %v8395_v28, %s7531_s22  ;;  %2839 = vrot.lane.b32.xlu1 %v8391_v49, %s7531_s22 }
 0x425   : > { %v8535_v1 = vpop.permute.xlu0 %2453  ;;  %v8537_v18 = vpop.permute.xlu1 %2379 }
 0x427   : > { %2853 = vrot.lane.b32.xlu0 %v8469_v50, %s7531_s22  ;;  %2847 = vrot.lane.b32.xlu1 %v8413_v58, %s7531_s22 }
 0x429   : > { %v8543_v17 = vpop.permute.xlu0 %2381  ;;  %v8545_v19 = vpop.permute.xlu1 %2307 }
 0x42b   : > { %2849 = vrot.lane.b32.xlu0 %v8419_v37, %s7531_s22  ;;  %2973 = vperm.xlu1 %7396, %v2923_v14  }
 0x42d   : > { %v8549_v32 = vpop.permute.xlu0 %2309  ;;  %v8551_v45 = vpop.permute.xlu1 %2767 }
 0x42f   : > { %2978 = vperm.xlu0 %7395, %v2924_v41   ;;  %2963 = vperm.xlu1 %7396, %v2921_v53  }
 0x431   : > { %v8553_v22 = vpop.permute.xlu0 %2769  ;;  %v2532_v52 = vpop.permute.xlu1 %2531 }
 0x432   : > { %v2539_v27 = vsel %vm490_vm0, %v8523_v59, %v2532_v52  ;;  %v2543_v14 = vsel %vm490_vm0, %v2532_v52, %v8523_v59 }
 0x433   : > { %2968 = vperm.xlu0 %7395, %v2922_v35   ;;  %v2560_v41 = vmul.f32 %v2556_v61, %v2539_v27 }
 0x435   : > { %v2534_v56 = vpop.permute.xlu0 %2533  ;;  %v8555_v21 = vpop.permute.xlu1 %2459 }
 0x436   : > { %v2540_v48 = vsel %vm490_vm0, %v2526_v46, %v2534_v56  ;;  %v2544_v47 = vsel %vm490_vm0, %v2534_v56, %v2526_v46  ;;  %v6579_v46 = vld [vmem:[%s10251_s3 + $0x4] sm:$0x3] }
 0x437   : > { %v2562_v24 = vmul.f32 %v2556_v61, %v2540_v48  ;;  %v2561_v53 = vmul.f32 %v2552_v5, %v2544_v47  ;;  %v2484_v59 = vrot.slane %v6579_v46, %v7738_v9 }
 0x439   : > { %v2462_v23 = vpop.permute.xlu0 %2461  ;;  %v8557_v60 = vpop.permute.xlu1 %2387  ;;  %v7221_v48 = vpack.c.bf16 %v2562_v24, %v2560_v41 }
 0x43a   : > { %v2472_v47 = vsel %vm416_vm1, %v2462_v23, %v8535_v1 }
 0x43d   : > { %v8559_v6 = vpop.permute.xlu0 %2389  ;;  %v8561_v25 = vpop.permute.xlu1 %2315 }
 0x441   : > { %v8563_v30 = vpop.permute.xlu0 %2317  ;;  %v8565_v0 = vpop.permute.xlu1 %2775 }
 0x445   : > { %v8567_v20 = vpop.permute.xlu0 %2777  ;;  %v2528_v44 = vpop.permute.xlu1 %2527 }
 0x449   : > { %v2530_v3 = vpop.permute.xlu0 %2529  ;;  %v2456_v39 = vpop.permute.xlu1 %2455 }
 0x44d   : > { %v2458_v34 = vpop.permute.xlu0 %2457  ;;  %v8569_v31 = vpop.permute.xlu1 %2383 }
 0x451   : > { %v8571_v63 = vpop.permute.xlu0 %2385  ;;  %v8573_v38 = vpop.permute.xlu1 %2311 }
 0x455   : > { %v8575_v43 = vpop.permute.xlu0 %2313  ;;  %v8577_v29 = vpop.permute.xlu1 %2771 }
 0x459   : > { %v8582_v54 = vpop.permute.xlu0 %2773  ;;  %v2536_v11 = vpop.permute.xlu1 %2535 }
 0x45a   : > { %v2541_v51 = vsel %vm490_vm0, %v2528_v44, %v2536_v11  ;;  %v2545_v2 = vsel %vm490_vm0, %v2536_v11, %v2528_v44  ;;  %v2468_v11 = vsel %vm416_vm1, %v8535_v1, %v2462_v23  ;;  %v6574_v1 = vld [vmem:[%s10251_s3 + $0x2] sm:$0x3] }
 0x45b   : > { %v2563_v55 = vmul.f32 %v2552_v5, %v2545_v2  ;;  %v2564_v12 = vmul.f32 %v2556_v61, %v2541_v51  ;;  %v2480_v2 = vrot.slane %v6579_v46, %v7736_v8  ;;  %v2490_v24 = vmul.f32 %v2484_v59, %v2468_v11 }
 0x45d   : > { %v2538_v36 = vpop.permute.xlu0 %2537  ;;  %v8595_v15 = vpop.permute.xlu1 %2699  ;;  %v2489_v41 = vmul.f32 %v2480_v2, %v2472_v47 }
 0x45e   : > { %v2542_v4 = vsel %vm490_vm0, %v2530_v3, %v2538_v36  ;;  %v2546_v10 = vsel %vm490_vm0, %v2538_v36, %v2530_v3  ;;  %v2559_v3 = vmul.f32 %v2552_v5, %v2543_v14 }
 0x45f   : > { %v2565_v33 = vmul.f32 %v2552_v5, %v2546_v10  ;;  %v2566_v62 = vmul.f32 %v2556_v61, %v2542_v4  ;;  %v2467_v5 = vsel %vm416_vm1, %v8529_v16, %v8555_v21 }
 0x460   : > { %v7220_v51 = vpack.c.bf16 %v2561_v53, %v2559_v3  ;;  %v2488_v14 = vmul.f32 %v2484_v59, %v2467_v5 }
 0x461   : > { %v7222_v35 = vpack.c.bf16 %v2565_v33, %v2563_v55  ;;  %v8609_v56 = vpop.permute.xlu0 %2701  ;;  %v2464_v44 = vpop.permute.xlu1 %2463  ;;  %v7223_v42 = vpack.c.bf16 %v2566_v62, %v2564_v12  ;;  %v2471_v62 = vsel %vm416_vm1, %v8555_v21, %v8529_v16  ;;  %v2412_v21 = vrot.slane %v6574_v1, %v7738_v9 }
 0x462   : > { %v2469_v52 = vsel %vm416_vm1, %v2456_v39, %v2464_v44  ;;  %v2473_v61 = vsel %vm416_vm1, %v2464_v44, %v2456_v39  ;;  %v2396_v44 = vsel %vm342_vm2, %v8543_v17, %v8559_v6  ;;  %v7217_v16 = vpack.c.bf16 %v2490_v24, %v2488_v14 }
 0x463   : > { %3197 = vmatprep.subr.bf16.mxu1 %v7223_v42  ;;  %v2491_v10 = vmul.f32 %v2480_v2, %v2473_v61  ;;  %v2492_v55 = vmul.f32 %v2484_v59, %v2469_v52 }
 0x464   : > { %3198 = vmatpush1.bf16.msra.mxu1 %v7222_v35  ;;  %v2487_v35 = vmul.f32 %v2480_v2, %v2471_v62  ;;  %v2324_v62 = vsel %vm269_vm3, %v8549_v32, %v8563_v30 }
 0x465   : > { %v2466_v27 = vpop.permute.xlu0 %2465  ;;  %3199 = vmatprep.subr.bf16.mxu1 %v7221_v48  ;;  %v2392_v36 = vpop.permute.xlu1 %2391  ;;  %v2408_v48 = vrot.slane %v6574_v1, %v7736_v8 }
 0x466   : > { %v2470_v39 = vsel %vm416_vm1, %v2458_v34, %v2466_v27  ;;  %v2474_v4 = vsel %vm416_vm1, %v2466_v27, %v2458_v34  ;;  %v2397_v42 = vsel %vm342_vm2, %v8569_v31, %v2392_v36  ;;  %v2401_v3 = vsel %vm342_vm2, %v2392_v36, %v8569_v31 }
 0x467   : > { %v2493_v12 = vmul.f32 %v2480_v2, %v2474_v4  ;;  %v2494_v33 = vmul.f32 %v2484_v59, %v2470_v39  ;;  %v7216_v11 = vpack.c.bf16 %v2489_v41, %v2487_v35  ;;  %v2395_v59 = vsel %vm342_vm2, %v8537_v18, %v8557_v60  ;;  %v2331_v4 = vld [vmem:[%s10251_s3] sm:$0x3] }
 0x468   : > { %3200 = vmatpush1.bf16.msra.mxu1 %v7220_v51  ;;  %v2400_v51 = vsel %vm342_vm2, %v8559_v6, %v8543_v17  ;;  %v2418_v2 = vmul.f32 %v2412_v21, %v2396_v44  ;;  %v2419_v27 = vmul.f32 %v2408_v48, %v2401_v3  ;;  %v2420_v36 = vmul.f32 %v2412_v21, %v2397_v42 }
 0x469   : > { %v7218_v23 = vpack.c.bf16 %v2493_v12, %v2491_v10  ;;  %v8638_v53 = vpop.permute.xlu0 %2697  ;;  %v2320_v34 = vpop.permute.xlu1 %2319  ;;  %v7219_v46 = vpack.c.bf16 %v2494_v33, %v2492_v55  ;;  %v2399_v39 = vsel %vm342_vm2, %v8557_v60, %v8537_v18  ;;  %v2416_v17 = vmul.f32 %v2412_v21, %v2395_v59 }
 0x46a   : > { %v2417_v6 = vmul.f32 %v2408_v48, %v2400_v51  ;;  %v2415_v33 = vmul.f32 %v2408_v48, %v2399_v39  ;;  %v2340_v60 = vrot.slane %v2331_v4, %v7738_v9  ;;  %v2325_v14 = vsel %vm269_vm3, %v8573_v38, %v2320_v34 }
 0x46b   : > { %3201 = vmatprep.subr.bf16.mxu1 %v7219_v46  ;;  %v7213_v18 = vpack.c.bf16 %v2418_v2, %v2416_v17  ;;  %v2329_v41 = vsel %vm269_vm3, %v2320_v34, %v8573_v38  ;;  %v2323_v46 = vsel %vm269_vm3, %v8545_v19, %v8561_v25  ;;  %v2327_v59 = vsel %vm269_vm3, %v8561_v25, %v8545_v19 }
 0x46c   : > { %3202 = vmatpush1.bf16.msra.mxu1 %v7218_v23  ;;  %v7212_v1 = vpack.c.bf16 %v2417_v6, %v2415_v33  ;;  %v2336_v23 = vrot.slane %v2331_v4, %v7736_v8  ;;  %v2348_v3 = vmul.f32 %v2340_v60, %v2325_v14  ;;  %v2787_v17 = vsel %vm740_vm4, %v8565_v0, %v8551_v45 }
 0x46d   : > { %v2394_v52 = vpop.permute.xlu0 %2393  ;;  %3203 = vmatprep.subr.bf16.mxu1 %v7217_v16  ;;  %v2780_v61 = vpop.permute.xlu1 %2779  ;;  %v2328_v16 = vsel %vm269_vm3, %v8563_v30, %v8549_v32  ;;  %v2344_v32 = vmul.f32 %v2340_v60, %v2323_v46 }
 0x46e   : > { %v2398_v31 = vsel %vm342_vm2, %v8571_v63, %v2394_v52  ;;  %v2402_v5 = vsel %vm342_vm2, %v2394_v52, %v8571_v63  ;;  %v2347_v42 = vmul.f32 %v2336_v23, %v2329_v41  ;;  %v2345_v30 = vmul.f32 %v2336_v23, %v2328_v16  ;;  %v6603_v52 = vld [vmem:[%s10251_s3 + $0xe] sm:$0x3] }
 0x46f   : > { %v2421_v47 = vmul.f32 %v2408_v48, %v2402_v5  ;;  %v2422_v24 = vmul.f32 %v2412_v21, %v2398_v31  ;;  %v2346_v21 = vmul.f32 %v2340_v60, %v2324_v62  ;;  %v2343_v5 = vmul.f32 %v2336_v23, %v2327_v59 }
 0x470   : > { %3204 = vmatpush1.bf16.msra.mxu1 %v7216_v11  ;;  %v2800_v25 = vrot.slane %v6603_v52, %v7738_v9  ;;  %v2796_v39 = vrot.slane %v6603_v52, %v7736_v8 }
 0x471   : > { %v7214_v10 = vpack.c.bf16 %v2421_v47, %v2419_v27  ;;  %v8673_v55 = vpop.permute.xlu0 %2705  ;;  %v8675_v63 = vpop.permute.xlu1 %2707  ;;  %v7215_v12 = vpack.c.bf16 %v2422_v24, %v2420_v36  ;;  %v2788_v27 = vsel %vm740_vm4, %v8567_v20, %v8553_v22  ;;  %v7209_v19 = vpack.c.bf16 %v2346_v21, %v2344_v32 }
 0x472   : > { %v2785_v36 = vsel %vm740_vm4, %v8577_v29, %v2780_v61  ;;  %v2789_v47 = vsel %vm740_vm4, %v2780_v61, %v8577_v29  ;;  %v7208_v24 = vpack.c.bf16 %v2345_v30, %v2343_v5 }
 0x473   : > { %3205 = vmatprep.subr.bf16.mxu1 %v7215_v12  ;;  %v2806_v12 = vmul.f32 %v2800_v25, %v2788_v27  ;;  %v2807_v33 = vmul.f32 %v2796_v39, %v2785_v36  ;;  %v2808_v62 = vmul.f32 %v2800_v25, %v2789_v47  ;;  %v2712_v27 = vsel %vm666_vm5, %v8638_v53, %v8673_v55 }
 0x474   : > { %3206 = vmatpush1.bf16.msra.mxu1 %v7214_v10  ;;  %v2784_v10 = vsel %vm740_vm4, %v8553_v22, %v8567_v20  ;;  %v2783_v22 = vsel %vm740_vm4, %v8551_v45, %v8565_v0  ;;  %v2804_v20 = vmul.f32 %v2800_v25, %v2787_v17  ;;  %v2717_v45 = vsel %vm666_vm5, %v8675_v63, %v8595_v15 }
 0x475   : > { %v2322_v35 = vpop.permute.xlu0 %2321  ;;  %3207 = vmatprep.subr.bf16.mxu1 %v7213_v18  ;;  %v8693_v44 = vpop.permute.xlu1 %2695  ;;  %v6598_v18 = vld [vmem:[%s10251_s3 + $0xc] sm:$0x3]  ;;  %v2805_v41 = vmul.f32 %v2796_v39, %v2784_v10  ;;  %v2803_v16 = vmul.f32 %v2796_v39, %v2783_v22 }
 0x476   : > { %v2326_v38 = vsel %vm269_vm3, %v8575_v43, %v2322_v35  ;;  %v2330_v34 = vsel %vm269_vm3, %v2322_v35, %v8575_v43  ;;  %v2724_v35 = vrot.slane %v6598_v18, %v7736_v8  ;;  %v2728_v21 = vrot.slane %v6598_v18, %v7738_v9 }
 0x477   : > { %v2349_v11 = vmul.f32 %v2336_v23, %v2330_v34  ;;  %v2350_v48 = vmul.f32 %v2340_v60, %v2326_v38  ;;  %v2713_v38 = vsel %vm666_vm5, %v8595_v15, %v8675_v63  ;;  %v7237_v34 = vpack.c.bf16 %v2806_v12, %v2804_v20 }
 0x478   : > { %3208 = vmatpush1.bf16.msra.mxu1 %v7212_v1  ;;  %v2735_v32 = vmul.f32 %v2724_v35, %v2713_v38  ;;  %v2736_v52 = vmul.f32 %v2728_v21, %v2717_v45 }
 0x479   : > { %v7210_v51 = vpack.c.bf16 %v2349_v11, %v2347_v42  ;;  %v8712_v2 = vpop.permute.xlu0 %2629  ;;  %v2704_v43 = vpop.permute.xlu1 %2703  ;;  %v7211_v31 = vpack.c.bf16 %v2350_v48, %v2348_v3  ;;  %v7236_v42 = vpack.c.bf16 %v2805_v41, %v2803_v16  ;;  %v2716_v3 = vsel %vm666_vm5, %v8673_v55, %v8638_v53  ;;  %v6593_v11 = vld [vmem:[%s10251_s3 + $0xa] sm:$0x3] }
 0x47a   : > { %v2715_v0 = vsel %vm666_vm5, %v2704_v43, %v8693_v44  ;;  %v2711_v15 = vsel %vm666_vm5, %v8693_v44, %v2704_v43  ;;  %v2656_v44 = vrot.slane %v6593_v11, %v7738_v9  ;;  %v2734_v43 = vmul.f32 %v2728_v21, %v2716_v3 }
 0x47b   : > { %3209 = vmatprep.subr.bf16.mxu1 %v7211_v31 }
 0x47c   : > { %3210 = vmatpush1.bf16.msra.mxu1 %v7210_v51  ;;  %v2732_v51 = vmul.f32 %v2728_v21, %v2715_v0 }
 0x47d   : > { %v2782_v6 = vpop.permute.xlu0 %2781  ;;  %3211 = vmatprep.subr.bf16.mxu1 %v7209_v19  ;;  %v2628_v4 = vpop.permute.xlu1 %2627  ;;  %v2652_v19 = vrot.slane %v6593_v11, %v7736_v8  ;;  %v7227_v11 = vpack.c.bf16 %v8469_v50, %v8463_v13  ;;  %v7225_v13 = vpack.c.bf16 %v8419_v37, %v8413_v58  ;;  %v7224_v37 = vpack.c.bf16 %v8395_v28, %v8391_v49  ;;  %v7421_v49 = vld [vmem:[#allocation4 + $0x80] ss:$12 sps:$4 sm:$0xff]  }
 0x47e   : > { %v2786_v29 = vsel %vm740_vm4, %v8582_v54, %v2782_v6  ;;  %v2790_v61 = vsel %vm740_vm4, %v2782_v6, %v8582_v54  ;;  %v2733_v6 = vmul.f32 %v2724_v35, %v2712_v27  ;;  %v7233_v53 = vpack.c.bf16 %v2734_v43, %v2732_v51 }
 0x47f   : > { %v2809_v60 = vmul.f32 %v2796_v39, %v2786_v29  ;;  %v2810_v14 = vmul.f32 %v2800_v25, %v2790_v61  ;;  %v2731_v25 = vmul.f32 %v2724_v35, %v2711_v15 }
 0x480   : > { %3212 = vmatpush1.bf16.msra.mxu1 %v7208_v24 }
 0x481   : > { %v7238_v1 = vpack.c.bf16 %v2809_v60, %v2807_v33  ;;  %v2626_v23 = vpop.permute.xlu0 %2625  ;;  %v2636_v46 = vpop.permute.xlu1 %2635  ;;  %v7239_v54 = vpack.c.bf16 %v2810_v14, %v2808_v62  ;;  %v7232_v12 = vpack.c.bf16 %v2733_v6, %v2731_v25 }
 0x482   : > { %v2641_v39 = vsel %vm592_vm6, %v2628_v4, %v2636_v46  ;;  %v2645_v17 = vsel %vm592_vm6, %v2636_v46, %v2628_v4 }
 0x483   : > { %3213 = vmatprep.subr.bf16.mxu1 %v7239_v54  ;;  %v2663_v29 = vmul.f32 %v2652_v19, %v2641_v39  ;;  %v2664_v61 = vmul.f32 %v2656_v44, %v2645_v17  ;;  %v7418_v39 = vld [vmem:[#allocation4 + $0x7c] ss:$12 sps:$4 sm:$0xff]  }
 0x484   : > { %3214 = vmatpush2.bf16.msra.mxu1 %v7238_v1 }
 0x485   : > { %v2710_v48 = vpop.permute.xlu0 %2709  ;;  %3215 = vmatprep.subr.bf16.mxu1 %v7237_v34  ;;  %v2624_v59 = vpop.permute.xlu1 %2623  ;;  %v6608_v34 = vld [vmem:[%s10251_s3 + $0x10] sm:$0x3] }
 0x486   : > { %v2714_v63 = vsel %vm666_vm5, %v8609_v56, %v2710_v48  ;;  %v2718_v30 = vsel %vm666_vm5, %v2710_v48, %v8609_v56  ;;  %v2872_v3 = vrot.slane %v6608_v34, %v7738_v9 }
 0x487   : > { %v2737_v31 = vmul.f32 %v2724_v35, %v2714_v63  ;;  %v2738_v5 = vmul.f32 %v2728_v21, %v2718_v30 }
 0x488   : > { %3216 = vmatpush2.bf16.msra.mxu1 %v7236_v42  ;;  %v2868_v42 = vrot.slane %v6608_v34, %v7736_v8 }
 0x489   : > { %v7234_v36 = vpack.c.bf16 %v2737_v31, %v2735_v32  ;;  %v2634_v47 = vpop.permute.xlu0 %2633  ;;  %v2632_v24 = vpop.permute.xlu1 %2631  ;;  %v7235_v56 = vpack.c.bf16 %v2738_v5, %v2736_v52  ;;  %v7226_v52 = vpack.c.bf16 %v8444_v40, %v8438_v57 }
 0x48a   : > { %v2644_v55 = vsel %vm592_vm6, %v2634_v47, %v2626_v23  ;;  %v2643_v10 = vsel %vm592_vm6, %v2632_v24, %v2624_v59  ;;  %v2640_v18 = vsel %vm592_vm6, %v2626_v23, %v2634_v47  ;;  %v2639_v4 = vsel %vm592_vm6, %v2624_v59, %v2632_v24 }
 0x48b   : > { %3217 = vmatprep.subr.bf16.mxu1 %v7235_v56  ;;  %v2662_v22 = vmul.f32 %v2656_v44, %v2644_v55  ;;  %v2660_v20 = vmul.f32 %v2656_v44, %v2643_v10  ;;  %v2661_v16 = vmul.f32 %v2652_v19, %v2640_v18  ;;  %v2659_v21 = vmul.f32 %v2652_v19, %v2639_v4  ;;  %v7414_v56 = vld [vmem:[#allocation4 + $0x60] ss:$12 sps:$4 sm:$0xff]   ;;  %v7420_v55 = vld [vmem:[#allocation4 + $0x78] ss:$12 sps:$4 sm:$0xff]  }
 0x48c   : > { %3218 = vmatpush2.bf16.msra.mxu1 %v7234_v36 }
 0x48d   : > { %v2638_v33 = vpop.permute.xlu0 %2637  ;;  %3219 = vmatprep.subr.bf16.mxu1 %v7233_v53  ;;  %v2844_v62 = vpop.permute.xlu1 %2843  ;;  %v7229_v38 = vpack.c.bf16 %v2662_v22, %v2660_v20  ;;  %v7228_v0 = vpack.c.bf16 %v2661_v16, %v2659_v21  ;;  %v7417_v53 = vld [vmem:[#allocation4 + $0x68] ss:$12 sps:$4 sm:$0xff]  }
 0x48e   : > { %v2642_v60 = vsel %vm592_vm6, %v8712_v2, %v2638_v33  ;;  %v2646_v14 = vsel %vm592_vm6, %v2638_v33, %v8712_v2 }
 0x48f   : > { %v2665_v41 = vmul.f32 %v2652_v19, %v2642_v60  ;;  %v2666_v1 = vmul.f32 %v2656_v44, %v2646_v14 }
 0x490   : > { %3220 = vmatpush2.bf16.msra.mxu1 %v7232_v12 }
 0x491   : > { %v7230_v46 = vpack.c.bf16 %v2665_v41, %v2663_v29  ;;  %v2846_v54 = vpop.permute.xlu0 %2845  ;;  %v2852_v35 = vpop.permute.xlu1 %2851  ;;  %v7231_v23 = vpack.c.bf16 %v2666_v1, %v2664_v61 }
 0x492   : > { %v2857_v48 = vsel %vm814_vm7, %v2844_v62, %v2852_v35  ;;  %v2861_v59 = vsel %vm814_vm7, %v2852_v35, %v2844_v62 }
 0x493   : > { %3221 = vmatprep.subr.bf16.mxu1 %v7231_v23  ;;  %v2879_v50 = vmul.f32 %v2868_v42, %v2857_v48  ;;  %v2880_v51 = vmul.f32 %v2872_v3, %v2861_v59 }
 0x494   : > { %3222 = vmatpush2.bf16.msra.mxu1 %v7230_v46 }
 0x495   : > { %v2842_v45 = vpop.permute.xlu0 %2841  ;;  %3223 = vmatprep.subr.bf16.mxu1 %v7229_v38  ;;  %v2840_v2 = vpop.permute.xlu1 %2839 }
 0x498   : > { %3224 = vmatpush2.bf16.msra.mxu1 %v7228_v0 }
 0x499   : > { %v2854_v32 = vpop.permute.xlu0 %2853  ;;  %3225 = vmatprep.subr.bf16.mxu1 %v7227_v11  ;;  %v2848_v15 = vpop.permute.xlu1 %2847 }
 0x49a   : > { %v2858_v63 = vsel %vm814_vm7, %v2846_v54, %v2854_v32  ;;  %v2862_v30 = vsel %vm814_vm7, %v2854_v32, %v2846_v54  ;;  %v2855_v27 = vsel %vm814_vm7, %v2840_v2, %v2848_v15  ;;  %v2859_v19 = vsel %vm814_vm7, %v2848_v15, %v2840_v2 }
 0x49b   : > { %v2881_v31 = vmul.f32 %v2868_v42, %v2858_v63  ;;  %v2882_v5 = vmul.f32 %v2872_v3, %v2862_v30  ;;  %v2875_v40 = vmul.f32 %v2868_v42, %v2855_v27  ;;  %v2876_v36 = vmul.f32 %v2872_v3, %v2859_v19 }
 0x49c   : > { %3226 = vmatpush2.bf16.msra.mxu1 %v7226_v52 }
 0x49d   : > { %v7242_v44 = vpack.c.bf16 %v2881_v31, %v2879_v50  ;;  %v2850_v43 = vpop.permute.xlu0 %2849  ;;  %3227 = vmatprep.subr.bf16.mxu1 %v7225_v13  ;;  %v7243_v25 = vpack.c.bf16 %v2882_v5, %v2880_v51 }
 0x49e   : > { %v2856_v57 = vsel %vm814_vm7, %v2842_v45, %v2850_v43  ;;  %v2860_v58 = vsel %vm814_vm7, %v2850_v43, %v2842_v45 }
 0x49f   : > { %v2877_v47 = vmul.f32 %v2868_v42, %v2856_v57  ;;  %v2878_v24 = vmul.f32 %v2872_v3, %v2860_v58  ;;  %3262 = vmatprep.subr.bf16.mxu0 %v7243_v25  ;;  %v7424_v58 = vld [vmem:[#allocation4 + $0x94] ss:$12 sps:$4 sm:$0xff]  }
 0x4a0   : > { %3228 = vmatpush2.bf16.msra.mxu1 %v7224_v37  ;;  %3263 = vmatpush1.bf16.msra.mxu0 %v7242_v44 }
 0x4a1   : > { %v7240_v17 = vpack.c.bf16 %v2877_v47, %v2875_v40  ;;  %v7241_v6 = vpack.c.bf16 %v2878_v24, %v2876_v36  ;;  %v3943_v36 = vld [vmem:[#allocation6 + $0x70] sm:$0xff] }
 0x4a3   : > { %3230 = vmatmul.mubr.bf16.vlgmr.msra.gmra.mxu1 %v7414_v56  ;;  %3264 = vmatprep.subr.bf16.mxu0 %v7241_v6  ;;  %v3944_v56 = vld [vmem:[#allocation6 + $0x78] sm:$0xff] }
 0x4a4   : > { %3265 = vmatpush1.bf16.msra.mxu0 %v7240_v17  ;;  %3239 = vmatprep.mubr.bf16.mxu1 %v7418_v39  ;;  %v3941_v39 = vld [vmem:[#allocation6 + $0x60] sm:$0xff] }
 0x4a6   : > { %v2974_v28 = vpop.permute.xlu1 %2973 }
 0x4a7   : > { %6655 = vmatmul.mubr.msk.bf16.vlgmr.msra.gmra.mxu0 %vm1150_vm8, %v7417_v53  ;;  %v3942_v53 = vld [vmem:[#allocation6 + $0x68] sm:$0xff] }
 0x4a8   : > { %3292 = vmatprep.mubr.bf16.mxu0 %v7532_v26 }
 0x4aa   : > { %v8833_v10 = vpop.permute.xlu0 %2978  ;;  %v2964_v29 = vpop.permute.xlu1 %2963 }
 0x4ab   : > { %3240 = vmatmul.mubr.bf16.gmra.mxu1 %v7420_v55 }
 0x4ac   : > { %4302 = vmatprep.mubr.bf16.mxu1 %v7532_v26 }
 0x4ae   : > { %v2969_v60 = vpop.permute.xlu0 %2968 }
 0x4af   : > { %6656 = vmatmul.mubr.msk.bf16.gmra.mxu0 %vm1150_vm8, %v7421_v49 }
 0x4b0   : > { %4249 = vmatprep.mubr.bf16.mxu0 %v7424_v58 }
 0x563   : > { %v3231_v12 = vpop.f32.mrf.mxu1 }
 0x564   : > { %v3232_v33 = vadd.f32 %v3231_v12, %v2964_v29 }
 0x565   : > { %v3233_v61 = vpop.f32.mrf.mxu1 }
 0x566   : > { %v3234_v54 = vadd.f32 %v3233_v61, %v2964_v29 }
 0x567   : > { %v3235_v62 = vpop.f32.mrf.mxu1  ;;  %v3284_v18 = vpop.f32.mrf.mxu0 }
 0x568   : > { %v3285_v4 = vadd.f32 %v3284_v18, %v3232_v33  ;;  %v3236_v22 = vadd.f32 %v3235_v62, %v2969_v60 }
 0x569   : > { %v3286_v14 = vpop.f32.mrf.mxu0  ;;  %v3237_v35 = vpop.f32.mrf.mxu1 }
 0x56a   : > { %v8835_v20 = vmax.f32 %v3285_v4, 0.0  ;;  %v3287_v23 = vadd.f32 %v3286_v14, %v3234_v54  ;;  %v3238_v21 = vadd.f32 %v3237_v35, %v2969_v60 }
 0x56b   : > { %v3288_v41 = vpop.f32.mrf.mxu0  ;;  %v3241_v2 = vpop.f32.mrf.mxu1 }
 0x56c   : > { %v3289_v1 = vadd.f32 %v3288_v41, %v3236_v22  ;;  %3543 = vrot.lane.b32.xlu1 %v8835_v20, %s7524_s7  ;;  %v8857_v38 = vmax.f32 %v3287_v23, 0.0  ;;  %v3242_v11 = vadd.f32 %v3241_v2, %v2974_v28 }
 0x56d   : > { %v3290_v16 = vpop.f32.mrf.mxu0  ;;  %v3243_v42 = vpop.f32.mrf.mxu1 }
 0x56e   : > { %v8839_v46 = vmax.f32 %v3289_v1, 0.0  ;;  %v3291_v34 = vadd.f32 %v3290_v16, %v3238_v21  ;;  %v3244_v13 = vadd.f32 %v3243_v42, %v2974_v28  ;;  %v6671_v21 = vld [vmem:[%s10251_s3 + $0x6] sm:$0x3] }
 0x56f   : > { %v3294_v0 = vpop.f32.mrf.mxu0  ;;  %v3245_v48 = vpop.f32.mrf.mxu1  ;;  %v3576_v42 = vrot.slane %v6671_v21, %v7738_v9 }
 0x570   : > { %3545 = vrot.lane.b32.xlu0 %v8839_v46, %s7524_s7  ;;  %3471 = vrot.lane.b32.xlu1 %v8835_v20, %s7525_s12  ;;  %v8863_v45 = vmax.f32 %v3291_v34, 0.0  ;;  %v3295_v59 = vadd.f32 %v3294_v0, %v3242_v11  ;;  %v3246_v15 = vadd.f32 %v3245_v48, %v8833_v10  ;;  %v3572_v48 = vrot.slane %v6671_v21, %v7736_v8 }
 0x571   : > { %v3296_v3 = vpop.f32.mrf.mxu0  ;;  %v3247_v50 = vpop.f32.mrf.mxu1 }
 0x572   : > { %v8882_v63 = vmax.f32 %v3295_v59, 0.0  ;;  %v3297_v51 = vadd.f32 %v3296_v3, %v3244_v13  ;;  %v3248_v5 = vadd.f32 %v3247_v50, %v8833_v10 }
 0x573   : > { %v3298_v32 = vpop.f32.mrf.mxu0 }
 0x574   : > { %3473 = vrot.lane.b32.xlu0 %v8839_v46, %s7525_s12  ;;  %3399 = vrot.lane.b32.xlu1 %v8835_v20, %s7526_s13  ;;  %v3299_v30 = vadd.f32 %v3298_v32, %v3246_v15  ;;  %v8907_v27 = vmax.f32 %v3297_v51, 0.0 }
 0x575   : > { %v3300_v31 = vpop.f32.mrf.mxu0 }
 0x576   : > { %v8888_v52 = vmax.f32 %v3299_v30, 0.0  ;;  %v3301_v19 = vadd.f32 %v3300_v31, %v3248_v5 }
 0x578   : > { %3401 = vrot.lane.b32.xlu0 %v8839_v46, %s7526_s13  ;;  %3327 = vrot.lane.b32.xlu1 %v8835_v20, %s7527_s14  ;;  %v8913_v44 = vmax.f32 %v3301_v19, 0.0 }
 0x57c   : > { %3329 = vrot.lane.b32.xlu0 %v8839_v46, %s7527_s14  ;;  %3787 = vrot.lane.b32.xlu1 %v8835_v20, %s7528_s16 }
 0x580   : > { %3789 = vrot.lane.b32.xlu0 %v8839_v46, %s7528_s16  ;;  %3551 = vrot.lane.b32.xlu1 %v8857_v38, %s7524_s7 }
 0x584   : > { %3553 = vrot.lane.b32.xlu0 %v8863_v45, %s7524_s7  ;;  %3479 = vrot.lane.b32.xlu1 %v8857_v38, %s7525_s12 }
 0x588   : > { %3481 = vrot.lane.b32.xlu0 %v8863_v45, %s7525_s12  ;;  %3407 = vrot.lane.b32.xlu1 %v8857_v38, %s7526_s13 }
 0x58c   : > { %3409 = vrot.lane.b32.xlu0 %v8863_v45, %s7526_s13  ;;  %3335 = vrot.lane.b32.xlu1 %v8857_v38, %s7527_s14 }
 0x590   : > { %3337 = vrot.lane.b32.xlu0 %v8863_v45, %s7527_s14  ;;  %3795 = vrot.lane.b32.xlu1 %v8857_v38, %s7528_s16 }
 0x594   : > { %3797 = vrot.lane.b32.xlu0 %v8863_v45, %s7528_s16  ;;  %3547 = vrot.lane.b32.xlu1 %v8882_v63, %s7524_s7 }
 0x598   : > { %3549 = vrot.lane.b32.xlu0 %v8888_v52, %s7524_s7  ;;  %3475 = vrot.lane.b32.xlu1 %v8882_v63, %s7525_s12 }
 0x59c   : > { %3477 = vrot.lane.b32.xlu0 %v8888_v52, %s7525_s12  ;;  %3403 = vrot.lane.b32.xlu1 %v8882_v63, %s7526_s13 }
 0x5a0   : > { %3405 = vrot.lane.b32.xlu0 %v8888_v52, %s7526_s13  ;;  %3331 = vrot.lane.b32.xlu1 %v8882_v63, %s7527_s14 }
 0x5a4   : > { %3333 = vrot.lane.b32.xlu0 %v8888_v52, %s7527_s14  ;;  %3791 = vrot.lane.b32.xlu1 %v8882_v63, %s7528_s16 }
 0x5a8   : > { %3793 = vrot.lane.b32.xlu0 %v8888_v52, %s7528_s16  ;;  %3555 = vrot.lane.b32.xlu1 %v8907_v27, %s7524_s7 }
 0x5ac   : > { %3557 = vrot.lane.b32.xlu0 %v8913_v44, %s7524_s7  ;;  %3719 = vrot.lane.b32.xlu1 %v8882_v63, %s7529_s17 }
 0x5b0   : > { %3721 = vrot.lane.b32.xlu0 %v8888_v52, %s7529_s17  ;;  %3483 = vrot.lane.b32.xlu1 %v8907_v27, %s7525_s12 }
 0x5b4   : > { %3485 = vrot.lane.b32.xlu0 %v8913_v44, %s7525_s12  ;;  %3411 = vrot.lane.b32.xlu1 %v8907_v27, %s7526_s13 }
 0x5b8   : > { %3717 = vrot.lane.b32.xlu0 %v8839_v46, %s7529_s17  ;;  %3339 = vrot.lane.b32.xlu1 %v8907_v27, %s7527_s14 }
 0x5bc   : > { %3413 = vrot.lane.b32.xlu0 %v8913_v44, %s7526_s13  ;;  %3799 = vrot.lane.b32.xlu1 %v8907_v27, %s7528_s16 }
 0x5c0   : > { %3725 = vrot.lane.b32.xlu0 %v8863_v45, %s7529_s17  ;;  %3727 = vrot.lane.b32.xlu1 %v8907_v27, %s7529_s17 }
 0x5c4   : > { %3341 = vrot.lane.b32.xlu0 %v8913_v44, %s7527_s14  ;;  %3715 = vrot.lane.b32.xlu1 %v8835_v20, %s7529_s17 }
 0x5c8   : > { %3649 = vrot.lane.b32.xlu0 %v8888_v52, %s7530_s19  ;;  %3723 = vrot.lane.b32.xlu1 %v8857_v38, %s7529_s17 }
 0x5cc   : > { %3801 = vrot.lane.b32.xlu0 %v8913_v44, %s7528_s16  ;;  %3647 = vrot.lane.b32.xlu1 %v8882_v63, %s7530_s19 }
 0x5d0   : > { %3645 = vrot.lane.b32.xlu0 %v8839_v46, %s7530_s19  ;;  %3655 = vrot.lane.b32.xlu1 %v8907_v27, %s7530_s19 }
 0x5d4   : > { %3729 = vrot.lane.b32.xlu0 %v8913_v44, %s7529_s17  ;;  %3643 = vrot.lane.b32.xlu1 %v8835_v20, %s7530_s19 }
 0x5d8   : > { %3653 = vrot.lane.b32.xlu0 %v8863_v45, %s7530_s19  ;;  %3651 = vrot.lane.b32.xlu1 %v8857_v38, %s7530_s19 }
 0x5dc   : > { %3657 = vrot.lane.b32.xlu0 %v8913_v44, %s7530_s19  ;;  %3863 = vrot.lane.b32.xlu1 %v8882_v63, %s7531_s22 }
 0x5de   : > { %v8967_v43 = vpop.permute.xlu1 %3543 }
 0x5e0   : > { %3865 = vrot.lane.b32.xlu0 %v8888_v52, %s7531_s22  ;;  %3871 = vrot.lane.b32.xlu1 %v8907_v27, %s7531_s22 }
 0x5e2   : > { %v3546_v25 = vpop.permute.xlu0 %3545  ;;  %v8973_v57 = vpop.permute.xlu1 %3471 }
 0x5e4   : > { %3861 = vrot.lane.b32.xlu0 %v8839_v46, %s7531_s22  ;;  %3859 = vrot.lane.b32.xlu1 %v8835_v20, %s7531_s22 }
 0x5e6   : > { %v8979_v37 = vpop.permute.xlu0 %3473  ;;  %v8981_v40 = vpop.permute.xlu1 %3399 }
 0x5e8   : > { %3873 = vrot.lane.b32.xlu0 %v8913_v44, %s7531_s22  ;;  %3867 = vrot.lane.b32.xlu1 %v8857_v38, %s7531_s22 }
 0x5ea   : > { %v8987_v47 = vpop.permute.xlu0 %3401  ;;  %v8989_v24 = vpop.permute.xlu1 %3327 }
 0x5ec   : > { %3869 = vrot.lane.b32.xlu0 %v8863_v45, %s7531_s22  ;;  %3993 = vperm.xlu1 %7396, %v3943_v36  }
 0x5ee   : > { %v8993_v17 = vpop.permute.xlu0 %3329  ;;  %v8995_v6 = vpop.permute.xlu1 %3787 }
 0x5f0   : > { %3998 = vperm.xlu0 %7395, %v3944_v56   ;;  %3983 = vperm.xlu1 %7396, %v3941_v39  }
 0x5f2   : > { %v8997_v55 = vpop.permute.xlu0 %3789  ;;  %v3552_v49 = vpop.permute.xlu1 %3551 }
 0x5f3   : > { %v3559_v59 = vsel %vm490_vm0, %v8967_v43, %v3552_v49  ;;  %v3563_v36 = vsel %vm490_vm0, %v3552_v49, %v8967_v43 }
 0x5f4   : > { %3988 = vperm.xlu0 %7395, %v3942_v53   ;;  %v3580_v56 = vmul.f32 %v3576_v42, %v3559_v59 }
 0x5f6   : > { %v3554_v28 = vpop.permute.xlu0 %3553  ;;  %v8999_v10 = vpop.permute.xlu1 %3479 }
 0x5f7   : > { %v3560_v0 = vsel %vm490_vm0, %v3546_v25, %v3554_v28  ;;  %v3564_v30 = vsel %vm490_vm0, %v3554_v28, %v3546_v25  ;;  %v6666_v25 = vld [vmem:[%s10251_s3 + $0x4] sm:$0x3] }
 0x5f8   : > { %v3582_v13 = vmul.f32 %v3576_v42, %v3560_v0  ;;  %v3581_v39 = vmul.f32 %v3572_v48, %v3564_v30  ;;  %v3504_v43 = vrot.slane %v6666_v25, %v7738_v9 }
 0x5fa   : > { %v3482_v12 = vpop.permute.xlu0 %3481  ;;  %v9001_v29 = vpop.permute.xlu1 %3407  ;;  %v7257_v0 = vpack.c.bf16 %v3582_v13, %v3580_v56 }
 0x5fb   : > { %v3492_v30 = vsel %vm416_vm1, %v3482_v12, %v8979_v37 }
 0x5fe   : > { %v9003_v61 = vpop.permute.xlu0 %3409  ;;  %v9005_v33 = vpop.permute.xlu1 %3335 }
 0x602   : > { %v9007_v62 = vpop.permute.xlu0 %3337  ;;  %v9009_v18 = vpop.permute.xlu1 %3795 }
 0x606   : > { %v9011_v4 = vpop.permute.xlu0 %3797  ;;  %v3548_v60 = vpop.permute.xlu1 %3547 }
 0x60a   : > { %v3550_v14 = vpop.permute.xlu0 %3549  ;;  %v3476_v22 = vpop.permute.xlu1 %3475 }
 0x60e   : > { %v3478_v41 = vpop.permute.xlu0 %3477  ;;  %v9013_v1 = vpop.permute.xlu1 %3403 }
 0x612   : > { %v9015_v54 = vpop.permute.xlu0 %3405  ;;  %v9017_v35 = vpop.permute.xlu1 %3331 }
 0x616   : > { %v9019_v23 = vpop.permute.xlu0 %3333  ;;  %v9021_v16 = vpop.permute.xlu1 %3791 }
 0x61a   : > { %v9026_v34 = vpop.permute.xlu0 %3793  ;;  %v3556_v2 = vpop.permute.xlu1 %3555 }
 0x61b   : > { %v3561_v3 = vsel %vm490_vm0, %v3548_v60, %v3556_v2  ;;  %v3565_v11 = vsel %vm490_vm0, %v3556_v2, %v3548_v60  ;;  %v3488_v2 = vsel %vm416_vm1, %v8979_v37, %v3482_v12  ;;  %v6661_v37 = vld [vmem:[%s10251_s3 + $0x2] sm:$0x3] }
 0x61c   : > { %v3583_v31 = vmul.f32 %v3572_v48, %v3565_v11  ;;  %v3584_v5 = vmul.f32 %v3576_v42, %v3561_v3  ;;  %v3500_v11 = vrot.slane %v6666_v25, %v7736_v8  ;;  %v3510_v13 = vmul.f32 %v3504_v43, %v3488_v2 }
 0x61e   : > { %v3558_v32 = vpop.permute.xlu0 %3557  ;;  %v9039_v15 = vpop.permute.xlu1 %3719  ;;  %v3509_v56 = vmul.f32 %v3500_v11, %v3492_v30 }
 0x61f   : > { %v3562_v50 = vsel %vm490_vm0, %v3550_v14, %v3558_v32  ;;  %v3566_v51 = vsel %vm490_vm0, %v3558_v32, %v3550_v14  ;;  %v3579_v14 = vmul.f32 %v3572_v48, %v3563_v36 }
 0x620   : > { %v3585_v19 = vmul.f32 %v3572_v48, %v3566_v51  ;;  %v3586_v58 = vmul.f32 %v3576_v42, %v3562_v50  ;;  %v3487_v48 = vsel %vm416_vm1, %v8973_v57, %v8999_v10 }
 0x621   : > { %v7256_v3 = vpack.c.bf16 %v3581_v39, %v3579_v14  ;;  %v3508_v36 = vmul.f32 %v3504_v43, %v3487_v48 }
 0x622   : > { %v7258_v53 = vpack.c.bf16 %v3585_v19, %v3583_v31  ;;  %v9053_v28 = vpop.permute.xlu0 %3721  ;;  %v3484_v60 = vpop.permute.xlu1 %3483  ;;  %v7259_v21 = vpack.c.bf16 %v3586_v58, %v3584_v5  ;;  %v3491_v58 = vsel %vm416_vm1, %v8999_v10, %v8973_v57  ;;  %v3432_v10 = vrot.slane %v6661_v37, %v7738_v9 }
 0x623   : > { %v3489_v49 = vsel %vm416_vm1, %v3476_v22, %v3484_v60  ;;  %v3493_v42 = vsel %vm416_vm1, %v3484_v60, %v3476_v22  ;;  %v3416_v60 = vsel %vm342_vm2, %v8987_v47, %v9003_v61  ;;  %v7253_v57 = vpack.c.bf16 %v3510_v13, %v3508_v36 }
 0x624   : > { %4217 = vmatprep.subr.bf16.mxu0 %v7259_v21  ;;  %v3511_v51 = vmul.f32 %v3500_v11, %v3493_v42  ;;  %v3512_v31 = vmul.f32 %v3504_v43, %v3489_v49 }
 0x625   : > { %4218 = vmatpush1.bf16.msra.mxu0 %v7258_v53  ;;  %v3507_v53 = vmul.f32 %v3500_v11, %v3491_v58  ;;  %v3344_v58 = vsel %vm269_vm3, %v8993_v17, %v9007_v62 }
 0x626   : > { %v3486_v59 = vpop.permute.xlu0 %3485  ;;  %4219 = vmatprep.subr.bf16.mxu0 %v7257_v0  ;;  %v3412_v32 = vpop.permute.xlu1 %3411  ;;  %v3428_v0 = vrot.slane %v6661_v37, %v7736_v8 }
 0x627   : > { %v3490_v22 = vsel %vm416_vm1, %v3478_v41, %v3486_v59  ;;  %v3494_v50 = vsel %vm416_vm1, %v3486_v59, %v3478_v41  ;;  %v3417_v21 = vsel %vm342_vm2, %v9013_v1, %v3412_v32  ;;  %v3421_v14 = vsel %vm342_vm2, %v3412_v32, %v9013_v1 }
 0x628   : > { %v3513_v5 = vmul.f32 %v3500_v11, %v3494_v50  ;;  %v3514_v19 = vmul.f32 %v3504_v43, %v3490_v22  ;;  %v7252_v2 = vpack.c.bf16 %v3509_v56, %v3507_v53  ;;  %v3415_v43 = vsel %vm342_vm2, %v8981_v40, %v9001_v29  ;;  %v3351_v50 = vld [vmem:[%s10251_s3] sm:$0x3] }
 0x629   : > { %4220 = vmatpush1.bf16.msra.mxu0 %v7256_v3  ;;  %v3420_v3 = vsel %vm342_vm2, %v9003_v61, %v8987_v47  ;;  %v3438_v11 = vmul.f32 %v3432_v10, %v3416_v60  ;;  %v3439_v59 = vmul.f32 %v3428_v0, %v3421_v14  ;;  %v3440_v32 = vmul.f32 %v3432_v10, %v3417_v21 }
 0x62a   : > { %v7254_v12 = vpack.c.bf16 %v3513_v5, %v3511_v51  ;;  %v9082_v39 = vpop.permute.xlu0 %3717  ;;  %v3340_v41 = vpop.permute.xlu1 %3339  ;;  %v7255_v25 = vpack.c.bf16 %v3514_v19, %v3512_v31  ;;  %v3419_v22 = vsel %vm342_vm2, %v9001_v29, %v8981_v40  ;;  %v3436_v47 = vmul.f32 %v3432_v10, %v3415_v43 }
 0x62b   : > { %v3437_v61 = vmul.f32 %v3428_v0, %v3420_v3  ;;  %v3435_v19 = vmul.f32 %v3428_v0, %v3419_v22  ;;  %v3360_v29 = vrot.slane %v3351_v50, %v7738_v9  ;;  %v3345_v36 = vsel %vm269_vm3, %v9017_v35, %v3340_v41 }
 0x62c   : > { %4221 = vmatprep.subr.bf16.mxu0 %v7255_v25  ;;  %v7249_v40 = vpack.c.bf16 %v3438_v11, %v3436_v47  ;;  %v3349_v56 = vsel %vm269_vm3, %v3340_v41, %v9017_v35  ;;  %v3343_v25 = vsel %vm269_vm3, %v8989_v24, %v9005_v33  ;;  %v3347_v43 = vsel %vm269_vm3, %v9005_v33, %v8989_v24 }
 0x62d   : > { %4222 = vmatpush1.bf16.msra.mxu0 %v7254_v12  ;;  %v7248_v37 = vpack.c.bf16 %v3437_v61, %v3435_v19  ;;  %v3356_v12 = vrot.slane %v3351_v50, %v7736_v8  ;;  %v3368_v14 = vmul.f32 %v3360_v29, %v3345_v36  ;;  %v3807_v47 = vsel %vm740_vm4, %v9009_v18, %v8995_v6 }
 0x62e   : > { %v3414_v49 = vpop.permute.xlu0 %3413  ;;  %4223 = vmatprep.subr.bf16.mxu0 %v7253_v57  ;;  %v3800_v42 = vpop.permute.xlu1 %3799  ;;  %v3348_v57 = vsel %vm269_vm3, %v9007_v62, %v8993_v17  ;;  %v3364_v17 = vmul.f32 %v3360_v29, %v3343_v25 }
 0x62f   : > { %v3418_v1 = vsel %vm342_vm2, %v9015_v54, %v3414_v49  ;;  %v3422_v48 = vsel %vm342_vm2, %v3414_v49, %v9015_v54  ;;  %v3367_v21 = vmul.f32 %v3356_v12, %v3349_v56  ;;  %v3365_v62 = vmul.f32 %v3356_v12, %v3348_v57  ;;  %v6690_v49 = vld [vmem:[%s10251_s3 + $0xe] sm:$0x3] }
 0x630   : > { %v3441_v30 = vmul.f32 %v3428_v0, %v3422_v48  ;;  %v3442_v13 = vmul.f32 %v3432_v10, %v3418_v1  ;;  %v3366_v10 = vmul.f32 %v3360_v29, %v3344_v58  ;;  %v3363_v48 = vmul.f32 %v3356_v12, %v3347_v43 }
 0x631   : > { %4224 = vmatpush1.bf16.msra.mxu0 %v7252_v2  ;;  %v3820_v33 = vrot.slane %v6690_v49, %v7738_v9  ;;  %v3816_v22 = vrot.slane %v6690_v49, %v7736_v8 }
 0x632   : > { %v7250_v51 = vpack.c.bf16 %v3441_v30, %v3439_v59  ;;  %v9117_v31 = vpop.permute.xlu0 %3725  ;;  %v9119_v54 = vpop.permute.xlu1 %3727  ;;  %v7251_v5 = vpack.c.bf16 %v3442_v13, %v3440_v32  ;;  %v3808_v59 = vsel %vm740_vm4, %v9011_v4, %v8997_v55  ;;  %v7245_v24 = vpack.c.bf16 %v3366_v10, %v3364_v17 }
 0x633   : > { %v3805_v32 = vsel %vm740_vm4, %v9021_v16, %v3800_v42  ;;  %v3809_v30 = vsel %vm740_vm4, %v3800_v42, %v9021_v16  ;;  %v7244_v13 = vpack.c.bf16 %v3365_v62, %v3363_v48 }
 0x634   : > { %4225 = vmatprep.subr.bf16.mxu0 %v7251_v5  ;;  %v3826_v5 = vmul.f32 %v3820_v33, %v3808_v59  ;;  %v3827_v19 = vmul.f32 %v3816_v22, %v3805_v32  ;;  %v3828_v58 = vmul.f32 %v3820_v33, %v3809_v30  ;;  %v3732_v59 = vsel %vm666_vm5, %v9082_v39, %v9117_v31 }
 0x635   : > { %4226 = vmatpush1.bf16.msra.mxu0 %v7250_v51  ;;  %v3804_v51 = vsel %vm740_vm4, %v8997_v55, %v9011_v4  ;;  %v3803_v55 = vsel %vm740_vm4, %v8995_v6, %v9009_v18  ;;  %v3824_v4 = vmul.f32 %v3820_v33, %v3807_v47  ;;  %v3737_v6 = vsel %vm666_vm5, %v9119_v54, %v9039_v15 }
 0x636   : > { %v3342_v53 = vpop.permute.xlu0 %3341  ;;  %4227 = vmatprep.subr.bf16.mxu0 %v7249_v40  ;;  %v9137_v60 = vpop.permute.xlu1 %3715  ;;  %v6685_v40 = vld [vmem:[%s10251_s3 + $0xc] sm:$0x3]  ;;  %v3825_v56 = vmul.f32 %v3816_v22, %v3804_v51  ;;  %v3823_v57 = vmul.f32 %v3816_v22, %v3803_v55 }
 0x637   : > { %v3346_v35 = vsel %vm269_vm3, %v9019_v23, %v3342_v53  ;;  %v3350_v41 = vsel %vm269_vm3, %v3342_v53, %v9019_v23  ;;  %v3744_v53 = vrot.slane %v6685_v40, %v7736_v8  ;;  %v3748_v10 = vrot.slane %v6685_v40, %v7738_v9 }
 0x638   : > { %v3369_v2 = vmul.f32 %v3356_v12, %v3350_v41  ;;  %v3370_v0 = vmul.f32 %v3360_v29, %v3346_v35  ;;  %v3733_v35 = vsel %vm666_vm5, %v9039_v15, %v9119_v54  ;;  %v7273_v41 = vpack.c.bf16 %v3826_v5, %v3824_v4 }
 0x639   : > { %4228 = vmatpush1.bf16.msra.mxu0 %v7248_v37  ;;  %v3755_v17 = vmul.f32 %v3744_v53, %v3733_v35  ;;  %v3756_v49 = vmul.f32 %v3748_v10, %v3737_v6 }
 0x63a   : > { %v7246_v3 = vpack.c.bf16 %v3369_v2, %v3367_v21  ;;  %v9156_v11 = vpop.permute.xlu0 %3649  ;;  %v3724_v23 = vpop.permute.xlu1 %3723  ;;  %v7247_v1 = vpack.c.bf16 %v3370_v0, %v3368_v14  ;;  %v7272_v21 = vpack.c.bf16 %v3825_v56, %v3823_v57  ;;  %v3736_v14 = vsel %vm666_vm5, %v9117_v31, %v9082_v39  ;;  %v6680_v2 = vld [vmem:[%s10251_s3 + $0xa] sm:$0x3] }
 0x63b   : > { %v3735_v18 = vsel %vm666_vm5, %v3724_v23, %v9137_v60  ;;  %v3731_v15 = vsel %vm666_vm5, %v9137_v60, %v3724_v23  ;;  %v3676_v60 = vrot.slane %v6680_v2, %v7738_v9  ;;  %v3754_v23 = vmul.f32 %v3748_v10, %v3736_v14 }
 0x63c   : > { %4229 = vmatprep.subr.bf16.mxu0 %v7247_v1 }
 0x63d   : > { %4230 = vmatpush1.bf16.msra.mxu0 %v7246_v3  ;;  %v3752_v3 = vmul.f32 %v3748_v10, %v3735_v18 }
 0x63e   : > { %v3802_v61 = vpop.permute.xlu0 %3801  ;;  %4231 = vmatprep.subr.bf16.mxu0 %v7245_v24  ;;  %v3648_v50 = vpop.permute.xlu1 %3647  ;;  %v3672_v24 = vrot.slane %v6680_v2, %v7736_v8  ;;  %v7263_v2 = vpack.c.bf16 %v8913_v44, %v8907_v27  ;;  %v7261_v27 = vpack.c.bf16 %v8863_v45, %v8857_v38  ;;  %v7260_v45 = vpack.c.bf16 %v8839_v46, %v8835_v20  ;;  %v7429_v20 = vld [vmem:[#allocation4 + $0xb0] ss:$12 sps:$4 sm:$0xff]  }
 0x63f   : > { %v3806_v16 = vsel %vm740_vm4, %v9026_v34, %v3802_v61  ;;  %v3810_v42 = vsel %vm740_vm4, %v3802_v61, %v9026_v34  ;;  %v3753_v61 = vmul.f32 %v3744_v53, %v3732_v59  ;;  %v7269_v39 = vpack.c.bf16 %v3754_v23, %v3752_v3 }
 0x640   : > { %v3829_v29 = vmul.f32 %v3816_v22, %v3806_v16  ;;  %v3830_v36 = vmul.f32 %v3820_v33, %v3810_v42  ;;  %v3751_v33 = vmul.f32 %v3744_v53, %v3731_v15 }
 0x641   : > { %4232 = vmatpush1.bf16.msra.mxu0 %v7244_v13 }
 0x642   : > { %v7274_v37 = vpack.c.bf16 %v3829_v29, %v3827_v19  ;;  %v3646_v12 = vpop.permute.xlu0 %3645  ;;  %v3656_v25 = vpop.permute.xlu1 %3655  ;;  %v7275_v34 = vpack.c.bf16 %v3830_v36, %v3828_v58  ;;  %v7268_v5 = vpack.c.bf16 %v3753_v61, %v3751_v33 }
 0x643   : > { %v3661_v22 = vsel %vm592_vm6, %v3648_v50, %v3656_v25  ;;  %v3665_v47 = vsel %vm592_vm6, %v3656_v25, %v3648_v50 }
 0x644   : > { %4233 = vmatprep.subr.bf16.mxu0 %v7275_v34  ;;  %v3683_v16 = vmul.f32 %v3672_v24, %v3661_v22  ;;  %v3684_v42 = vmul.f32 %v3676_v60, %v3665_v47  ;;  %v7426_v22 = vld [vmem:[#allocation4 + $0xac] ss:$12 sps:$4 sm:$0xff]  }
 0x645   : > { %4234 = vmatpush2.bf16.msra.mxu0 %v7274_v37 }
 0x646   : > { %v3730_v0 = vpop.permute.xlu0 %3729  ;;  %4235 = vmatprep.subr.bf16.mxu0 %v7273_v41  ;;  %v3644_v43 = vpop.permute.xlu1 %3643  ;;  %v6695_v41 = vld [vmem:[%s10251_s3 + $0x10] sm:$0x3] }
 0x647   : > { %v3734_v54 = vsel %vm666_vm5, %v9053_v28, %v3730_v0  ;;  %v3738_v62 = vsel %vm666_vm5, %v3730_v0, %v9053_v28  ;;  %v3892_v14 = vrot.slane %v6695_v41, %v7738_v9 }
 0x648   : > { %v3757_v1 = vmul.f32 %v3744_v53, %v3734_v54  ;;  %v3758_v48 = vmul.f32 %v3748_v10, %v3738_v62 }
 0x649   : > { %4236 = vmatpush2.bf16.msra.mxu0 %v7272_v21  ;;  %v3888_v21 = vrot.slane %v6695_v41, %v7736_v8 }
 0x64a   : > { %v7270_v32 = vpack.c.bf16 %v3757_v1, %v3755_v17  ;;  %v3654_v30 = vpop.permute.xlu0 %3653  ;;  %v3652_v13 = vpop.permute.xlu1 %3651  ;;  %v7271_v28 = vpack.c.bf16 %v3758_v48, %v3756_v49  ;;  %v7262_v49 = vpack.c.bf16 %v8888_v52, %v8882_v63 }
 0x64b   : > { %v3664_v31 = vsel %vm592_vm6, %v3654_v30, %v3646_v12  ;;  %v3663_v51 = vsel %vm592_vm6, %v3652_v13, %v3644_v43  ;;  %v3660_v40 = vsel %vm592_vm6, %v3646_v12, %v3654_v30  ;;  %v3659_v50 = vsel %vm592_vm6, %v3644_v43, %v3652_v13 }
 0x64c   : > { %4237 = vmatprep.subr.bf16.mxu0 %v7271_v28  ;;  %v3682_v55 = vmul.f32 %v3676_v60, %v3664_v31  ;;  %v3680_v4 = vmul.f32 %v3676_v60, %v3663_v51  ;;  %v3681_v57 = vmul.f32 %v3672_v24, %v3660_v40  ;;  %v3679_v10 = vmul.f32 %v3672_v24, %v3659_v50  ;;  %v7422_v28 = vld [vmem:[#allocation4 + $0x90] ss:$12 sps:$4 sm:$0xff]   ;;  %v7428_v31 = vld [vmem:[#allocation4 + $0xa8] ss:$12 sps:$4 sm:$0xff]  }
 0x64d   : > { %4238 = vmatpush2.bf16.msra.mxu0 %v7270_v32 }
 0x64e   : > { %v3658_v19 = vpop.permute.xlu0 %3657  ;;  %4239 = vmatprep.subr.bf16.mxu0 %v7269_v39  ;;  %v3864_v58 = vpop.permute.xlu1 %3863  ;;  %v7265_v35 = vpack.c.bf16 %v3682_v55, %v3680_v4  ;;  %v7264_v18 = vpack.c.bf16 %v3681_v57, %v3679_v10  ;;  %v7425_v39 = vld [vmem:[#allocation4 + $0x98] ss:$12 sps:$4 sm:$0xff]  }
 0x64f   : > { %v3662_v29 = vsel %vm592_vm6, %v9156_v11, %v3658_v19  ;;  %v3666_v36 = vsel %vm592_vm6, %v3658_v19, %v9156_v11 }
 0x650   : > { %v3685_v56 = vmul.f32 %v3672_v24, %v3662_v29  ;;  %v3686_v37 = vmul.f32 %v3676_v60, %v3666_v36 }
 0x651   : > { %4240 = vmatpush2.bf16.msra.mxu0 %v7268_v5 }
 0x652   : > { %v7266_v25 = vpack.c.bf16 %v3685_v56, %v3683_v16  ;;  %v3866_v34 = vpop.permute.xlu0 %3865  ;;  %v3872_v53 = vpop.permute.xlu1 %3871  ;;  %v7267_v12 = vpack.c.bf16 %v3686_v37, %v3684_v42 }
 0x653   : > { %v3877_v0 = vsel %vm814_vm7, %v3864_v58, %v3872_v53  ;;  %v3881_v43 = vsel %vm814_vm7, %v3872_v53, %v3864_v58 }
 0x654   : > { %4241 = vmatprep.subr.bf16.mxu0 %v7267_v12  ;;  %v3899_v44 = vmul.f32 %v3888_v21, %v3877_v0  ;;  %v3900_v3 = vmul.f32 %v3892_v14, %v3881_v43 }
 0x655   : > { %4242 = vmatpush2.bf16.msra.mxu0 %v7266_v25 }
 0x656   : > { %v3862_v6 = vpop.permute.xlu0 %3861  ;;  %4243 = vmatprep.subr.bf16.mxu0 %v7265_v35  ;;  %v3860_v11 = vpop.permute.xlu1 %3859 }
 0x659   : > { %4244 = vmatpush2.bf16.msra.mxu0 %v7264_v18 }
 0x65a   : > { %v3874_v17 = vpop.permute.xlu0 %3873  ;;  %4245 = vmatprep.subr.bf16.mxu0 %v7263_v2  ;;  %v3868_v15 = vpop.permute.xlu1 %3867 }
 0x65b   : > { %v3878_v54 = vsel %vm814_vm7, %v3866_v34, %v3874_v17  ;;  %v3882_v62 = vsel %vm814_vm7, %v3874_v17, %v3866_v34  ;;  %v3875_v59 = vsel %vm814_vm7, %v3860_v11, %v3868_v15  ;;  %v3879_v24 = vsel %vm814_vm7, %v3868_v15, %v3860_v11 }
 0x65c   : > { %v3901_v1 = vmul.f32 %v3888_v21, %v3878_v54  ;;  %v3902_v48 = vmul.f32 %v3892_v14, %v3882_v62  ;;  %v3895_v52 = vmul.f32 %v3888_v21, %v3875_v59  ;;  %v3896_v32 = vmul.f32 %v3892_v14, %v3879_v24 }
 0x65d   : > { %4246 = vmatpush2.bf16.msra.mxu0 %v7262_v49 }
 0x65e   : > { %v7278_v60 = vpack.c.bf16 %v3901_v1, %v3899_v44  ;;  %v3870_v23 = vpop.permute.xlu0 %3869  ;;  %4247 = vmatprep.subr.bf16.mxu0 %v7261_v27  ;;  %v7279_v33 = vpack.c.bf16 %v3902_v48, %v3900_v3 }
 0x65f   : > { %v3876_v63 = vsel %vm814_vm7, %v3862_v6, %v3870_v23  ;;  %v3880_v38 = vsel %vm814_vm7, %v3870_v23, %v3862_v6 }
 0x660   : > { %v3897_v30 = vmul.f32 %v3888_v21, %v3876_v63  ;;  %v3898_v13 = vmul.f32 %v3892_v14, %v3880_v38  ;;  %4282 = vmatprep.subr.bf16.mxu1 %v7279_v33  ;;  %v7432_v38 = vld [vmem:[#allocation4 + $0xc4] ss:$12 sps:$4 sm:$0xff]  }
 0x661   : > { %4248 = vmatpush2.bf16.msra.mxu0 %v7260_v45  ;;  %4283 = vmatpush1.bf16.msra.mxu1 %v7278_v60 }
 0x662   : > { %v7276_v47 = vpack.c.bf16 %v3897_v30, %v3895_v52  ;;  %v7277_v61 = vpack.c.bf16 %v3898_v13, %v3896_v32  ;;  %v4963_v32 = vld [vmem:[#allocation6 + $0x90] sm:$0xff] }
 0x664   : > { %4250 = vmatmul.mubr.bf16.vlgmr.msra.gmra.mxu0 %v7422_v28  ;;  %4284 = vmatprep.subr.bf16.mxu1 %v7277_v61  ;;  %v4964_v28 = vld [vmem:[#allocation6 + $0x98] sm:$0xff] }
 0x665   : > { %4285 = vmatpush1.bf16.msra.mxu1 %v7276_v47  ;;  %4259 = vmatprep.mubr.bf16.mxu0 %v7426_v22  ;;  %v4961_v22 = vld [vmem:[#allocation6 + $0x80] sm:$0xff] }
 0x667   : > { %v3994_v46 = vpop.permute.xlu1 %3993 }
 0x668   : > { %6742 = vmatmul.mubr.msk.bf16.vlgmr.msra.gmra.mxu1 %vm1150_vm8, %v7425_v39  ;;  %v4962_v39 = vld [vmem:[#allocation6 + $0x88] sm:$0xff] }
 0x669   : > { %4312 = vmatprep.mubr.bf16.mxu1 %v7532_v26 }
 0x66b   : > { %v9277_v51 = vpop.permute.xlu0 %3998  ;;  %v3984_v16 = vpop.permute.xlu1 %3983 }
 0x66c   : > { %4260 = vmatmul.mubr.bf16.gmra.mxu0 %v7428_v31 }
 0x66d   : > { %5322 = vmatprep.mubr.bf16.mxu0 %v7532_v26 }
 0x66f   : > { %v3989_v29 = vpop.permute.xlu0 %3988 }
 0x670   : > { %6743 = vmatmul.mubr.msk.bf16.gmra.mxu1 %vm1150_vm8, %v7429_v20 }
 0x671   : > { %5269 = vmatprep.mubr.bf16.mxu1 %v7432_v38 }
 0x724   : > { %v4251_v5 = vpop.f32.mrf.mxu0 }
 0x725   : > { %v4252_v19 = vadd.f32 %v4251_v5, %v3984_v16 }
 0x726   : > { %v4253_v42 = vpop.f32.mrf.mxu0 }
 0x727   : > { %v4254_v34 = vadd.f32 %v4253_v42, %v3984_v16 }
 0x728   : > { %v4255_v58 = vpop.f32.mrf.mxu0  ;;  %v4304_v40 = vpop.f32.mrf.mxu1 }
 0x729   : > { %v4305_v50 = vadd.f32 %v4304_v40, %v4252_v19  ;;  %v4256_v55 = vadd.f32 %v4255_v58, %v3989_v29 }
 0x72a   : > { %v4306_v36 = vpop.f32.mrf.mxu1  ;;  %v4257_v53 = vpop.f32.mrf.mxu0 }
 0x72b   : > { %v9279_v4 = vmax.f32 %v4305_v50, 0.0  ;;  %v4307_v12 = vadd.f32 %v4306_v36, %v4254_v34  ;;  %v4258_v10 = vadd.f32 %v4257_v53, %v3989_v29 }
 0x72c   : > { %v4308_v56 = vpop.f32.mrf.mxu1  ;;  %v4261_v11 = vpop.f32.mrf.mxu0 }
 0x72d   : > { %v4309_v37 = vadd.f32 %v4308_v56, %v4256_v55  ;;  %4563 = vrot.lane.b32.xlu1 %v9279_v4, %s7524_s7  ;;  %v9301_v35 = vmax.f32 %v4307_v12, 0.0  ;;  %v4262_v2 = vadd.f32 %v4261_v11, %v3994_v46 }
 0x72e   : > { %v4310_v57 = vpop.f32.mrf.mxu1  ;;  %v4263_v21 = vpop.f32.mrf.mxu0 }
 0x72f   : > { %v9283_v25 = vmax.f32 %v4309_v37, 0.0  ;;  %v4311_v41 = vadd.f32 %v4310_v57, %v4258_v10  ;;  %v4264_v27 = vadd.f32 %v4263_v21, %v3994_v46  ;;  %v6758_v10 = vld [vmem:[%s10251_s3 + $0x6] sm:$0x3] }
 0x730   : > { %v4314_v18 = vpop.f32.mrf.mxu1  ;;  %v4265_v0 = vpop.f32.mrf.mxu0  ;;  %v4596_v21 = vrot.slane %v6758_v10, %v7738_v9 }
 0x731   : > { %4565 = vrot.lane.b32.xlu0 %v9283_v25, %s7524_s7  ;;  %4491 = vrot.lane.b32.xlu1 %v9279_v4, %s7525_s12  ;;  %v9307_v6 = vmax.f32 %v4311_v41, 0.0  ;;  %v4315_v43 = vadd.f32 %v4314_v18, %v4262_v2  ;;  %v4266_v15 = vadd.f32 %v4265_v0, %v9277_v51  ;;  %v4592_v0 = vrot.slane %v6758_v10, %v7736_v8 }
 0x732   : > { %v4316_v14 = vpop.f32.mrf.mxu1  ;;  %v4267_v44 = vpop.f32.mrf.mxu0 }
 0x733   : > { %v9326_v54 = vmax.f32 %v4315_v43, 0.0  ;;  %v4317_v3 = vadd.f32 %v4316_v14, %v4264_v27  ;;  %v4268_v48 = vadd.f32 %v4267_v44, %v9277_v51 }
 0x734   : > { %v4318_v17 = vpop.f32.mrf.mxu1 }
 0x735   : > { %4493 = vrot.lane.b32.xlu0 %v9283_v25, %s7525_s12  ;;  %4419 = vrot.lane.b32.xlu1 %v9279_v4, %s7526_s13  ;;  %v4319_v62 = vadd.f32 %v4318_v17, %v4266_v15  ;;  %v9351_v59 = vmax.f32 %v4317_v3, 0.0 }
 0x736   : > { %v4320_v1 = vpop.f32.mrf.mxu1 }
 0x737   : > { %v9332_v49 = vmax.f32 %v4319_v62, 0.0  ;;  %v4321_v24 = vadd.f32 %v4320_v1, %v4268_v48 }
 0x739   : > { %4421 = vrot.lane.b32.xlu0 %v9283_v25, %s7526_s13  ;;  %4347 = vrot.lane.b32.xlu1 %v9279_v4, %s7527_s14  ;;  %v9357_v60 = vmax.f32 %v4321_v24, 0.0 }
 0x73d   : > { %4349 = vrot.lane.b32.xlu0 %v9283_v25, %s7527_s14  ;;  %4807 = vrot.lane.b32.xlu1 %v9279_v4, %s7528_s16 }
 0x741   : > { %4809 = vrot.lane.b32.xlu0 %v9283_v25, %s7528_s16  ;;  %4571 = vrot.lane.b32.xlu1 %v9301_v35, %s7524_s7 }
 0x745   : > { %4573 = vrot.lane.b32.xlu0 %v9307_v6, %s7524_s7  ;;  %4499 = vrot.lane.b32.xlu1 %v9301_v35, %s7525_s12 }
 0x749   : > { %4501 = vrot.lane.b32.xlu0 %v9307_v6, %s7525_s12  ;;  %4427 = vrot.lane.b32.xlu1 %v9301_v35, %s7526_s13 }
 0x74d   : > { %4429 = vrot.lane.b32.xlu0 %v9307_v6, %s7526_s13  ;;  %4355 = vrot.lane.b32.xlu1 %v9301_v35, %s7527_s14 }
 0x751   : > { %4357 = vrot.lane.b32.xlu0 %v9307_v6, %s7527_s14  ;;  %4815 = vrot.lane.b32.xlu1 %v9301_v35, %s7528_s16 }
 0x755   : > { %4817 = vrot.lane.b32.xlu0 %v9307_v6, %s7528_s16  ;;  %4567 = vrot.lane.b32.xlu1 %v9326_v54, %s7524_s7 }
 0x759   : > { %4569 = vrot.lane.b32.xlu0 %v9332_v49, %s7524_s7  ;;  %4495 = vrot.lane.b32.xlu1 %v9326_v54, %s7525_s12 }
 0x75d   : > { %4497 = vrot.lane.b32.xlu0 %v9332_v49, %s7525_s12  ;;  %4423 = vrot.lane.b32.xlu1 %v9326_v54, %s7526_s13 }
 0x761   : > { %4425 = vrot.lane.b32.xlu0 %v9332_v49, %s7526_s13  ;;  %4351 = vrot.lane.b32.xlu1 %v9326_v54, %s7527_s14 }
 0x765   : > { %4353 = vrot.lane.b32.xlu0 %v9332_v49, %s7527_s14  ;;  %4811 = vrot.lane.b32.xlu1 %v9326_v54, %s7528_s16 }
 0x769   : > { %4813 = vrot.lane.b32.xlu0 %v9332_v49, %s7528_s16  ;;  %4575 = vrot.lane.b32.xlu1 %v9351_v59, %s7524_s7 }
 0x76d   : > { %4577 = vrot.lane.b32.xlu0 %v9357_v60, %s7524_s7  ;;  %4739 = vrot.lane.b32.xlu1 %v9326_v54, %s7529_s17 }
 0x771   : > { %4741 = vrot.lane.b32.xlu0 %v9332_v49, %s7529_s17  ;;  %4503 = vrot.lane.b32.xlu1 %v9351_v59, %s7525_s12 }
 0x775   : > { %4505 = vrot.lane.b32.xlu0 %v9357_v60, %s7525_s12  ;;  %4431 = vrot.lane.b32.xlu1 %v9351_v59, %s7526_s13 }
 0x779   : > { %4737 = vrot.lane.b32.xlu0 %v9283_v25, %s7529_s17  ;;  %4359 = vrot.lane.b32.xlu1 %v9351_v59, %s7527_s14 }
 0x77d   : > { %4433 = vrot.lane.b32.xlu0 %v9357_v60, %s7526_s13  ;;  %4819 = vrot.lane.b32.xlu1 %v9351_v59, %s7528_s16 }
 0x781   : > { %4745 = vrot.lane.b32.xlu0 %v9307_v6, %s7529_s17  ;;  %4747 = vrot.lane.b32.xlu1 %v9351_v59, %s7529_s17 }
 0x785   : > { %4361 = vrot.lane.b32.xlu0 %v9357_v60, %s7527_s14  ;;  %4735 = vrot.lane.b32.xlu1 %v9279_v4, %s7529_s17 }
 0x789   : > { %4669 = vrot.lane.b32.xlu0 %v9332_v49, %s7530_s19  ;;  %4743 = vrot.lane.b32.xlu1 %v9301_v35, %s7529_s17 }
 0x78d   : > { %4821 = vrot.lane.b32.xlu0 %v9357_v60, %s7528_s16  ;;  %4667 = vrot.lane.b32.xlu1 %v9326_v54, %s7530_s19 }
 0x791   : > { %4665 = vrot.lane.b32.xlu0 %v9283_v25, %s7530_s19  ;;  %4675 = vrot.lane.b32.xlu1 %v9351_v59, %s7530_s19 }
 0x795   : > { %4749 = vrot.lane.b32.xlu0 %v9357_v60, %s7529_s17  ;;  %4663 = vrot.lane.b32.xlu1 %v9279_v4, %s7530_s19 }
 0x799   : > { %4673 = vrot.lane.b32.xlu0 %v9307_v6, %s7530_s19  ;;  %4671 = vrot.lane.b32.xlu1 %v9301_v35, %s7530_s19 }
 0x79d   : > { %4677 = vrot.lane.b32.xlu0 %v9357_v60, %s7530_s19  ;;  %4883 = vrot.lane.b32.xlu1 %v9326_v54, %s7531_s22 }
 0x79f   : > { %v9411_v23 = vpop.permute.xlu1 %4563 }
 0x7a1   : > { %4885 = vrot.lane.b32.xlu0 %v9332_v49, %s7531_s22  ;;  %4891 = vrot.lane.b32.xlu1 %v9351_v59, %s7531_s22 }
 0x7a3   : > { %v4566_v33 = vpop.permute.xlu0 %4565  ;;  %v9417_v63 = vpop.permute.xlu1 %4491 }
 0x7a5   : > { %4881 = vrot.lane.b32.xlu0 %v9283_v25, %s7531_s22  ;;  %4879 = vrot.lane.b32.xlu1 %v9279_v4, %s7531_s22 }
 0x7a7   : > { %v9423_v45 = vpop.permute.xlu0 %4493  ;;  %v9425_v52 = vpop.permute.xlu1 %4419 }
 0x7a9   : > { %4893 = vrot.lane.b32.xlu0 %v9357_v60, %s7531_s22  ;;  %4887 = vrot.lane.b32.xlu1 %v9301_v35, %s7531_s22 }
 0x7ab   : > { %v9431_v30 = vpop.permute.xlu0 %4421  ;;  %v9433_v13 = vpop.permute.xlu1 %4347 }
 0x7ad   : > { %4889 = vrot.lane.b32.xlu0 %v9307_v6, %s7531_s22  ;;  %5013 = vperm.xlu1 %7396, %v4963_v32  }
 0x7af   : > { %v9437_v47 = vpop.permute.xlu0 %4349  ;;  %v9439_v61 = vpop.permute.xlu1 %4807 }
 0x7b1   : > { %5018 = vperm.xlu0 %7395, %v4964_v28   ;;  %5003 = vperm.xlu1 %7396, %v4961_v22  }
 0x7b3   : > { %v9441_v31 = vpop.permute.xlu0 %4809  ;;  %v4572_v20 = vpop.permute.xlu1 %4571 }
 0x7b4   : > { %v4579_v43 = vsel %vm490_vm0, %v9411_v23, %v4572_v20  ;;  %v4583_v32 = vsel %vm490_vm0, %v4572_v20, %v9411_v23 }
 0x7b5   : > { %5008 = vperm.xlu0 %7395, %v4962_v39   ;;  %v4600_v28 = vmul.f32 %v4596_v21, %v4579_v43 }
 0x7b7   : > { %v4574_v46 = vpop.permute.xlu0 %4573  ;;  %v9443_v51 = vpop.permute.xlu1 %4499 }
 0x7b8   : > { %v4580_v18 = vsel %vm490_vm0, %v4566_v33, %v4574_v46  ;;  %v4584_v62 = vsel %vm490_vm0, %v4574_v46, %v4566_v33  ;;  %v6753_v33 = vld [vmem:[%s10251_s3 + $0x4] sm:$0x3] }
 0x7b9   : > { %v4602_v27 = vmul.f32 %v4596_v21, %v4580_v18  ;;  %v4601_v22 = vmul.f32 %v4592_v0, %v4584_v62  ;;  %v4524_v23 = vrot.slane %v6753_v33, %v7738_v9 }
 0x7bb   : > { %v4502_v5 = vpop.permute.xlu0 %4501  ;;  %v9445_v16 = vpop.permute.xlu1 %4427  ;;  %v7293_v18 = vpack.c.bf16 %v4602_v27, %v4600_v28 }
 0x7bc   : > { %v4512_v62 = vsel %vm416_vm1, %v4502_v5, %v9423_v45 }
 0x7bf   : > { %v9447_v42 = vpop.permute.xlu0 %4429  ;;  %v9449_v19 = vpop.permute.xlu1 %4355 }
 0x7c3   : > { %v9451_v58 = vpop.permute.xlu0 %4357  ;;  %v9453_v40 = vpop.permute.xlu1 %4815 }
 0x7c7   : > { %v9455_v50 = vpop.permute.xlu0 %4817  ;;  %v4568_v29 = vpop.permute.xlu1 %4567 }
 0x7cb   : > { %v4570_v36 = vpop.permute.xlu0 %4569  ;;  %v4496_v55 = vpop.permute.xlu1 %4495 }
 0x7cf   : > { %v4498_v56 = vpop.permute.xlu0 %4497  ;;  %v9457_v37 = vpop.permute.xlu1 %4423 }
 0x7d3   : > { %v9459_v34 = vpop.permute.xlu0 %4425  ;;  %v9461_v53 = vpop.permute.xlu1 %4351 }
 0x7d7   : > { %v9463_v12 = vpop.permute.xlu0 %4353  ;;  %v9465_v57 = vpop.permute.xlu1 %4811 }
 0x7db   : > { %v9470_v41 = vpop.permute.xlu0 %4813  ;;  %v4576_v11 = vpop.permute.xlu1 %4575 }
 0x7dc   : > { %v4581_v14 = vsel %vm490_vm0, %v4568_v29, %v4576_v11  ;;  %v4585_v2 = vsel %vm490_vm0, %v4576_v11, %v4568_v29  ;;  %v4508_v11 = vsel %vm416_vm1, %v9423_v45, %v4502_v5  ;;  %v6748_v45 = vld [vmem:[%s10251_s3 + $0x2] sm:$0x3] }
 0x7dd   : > { %v4603_v1 = vmul.f32 %v4592_v0, %v4585_v2  ;;  %v4604_v48 = vmul.f32 %v4596_v21, %v4581_v14  ;;  %v4520_v2 = vrot.slane %v6753_v33, %v7736_v8  ;;  %v4530_v27 = vmul.f32 %v4524_v23, %v4508_v11 }
 0x7df   : > { %v4578_v17 = vpop.permute.xlu0 %4577  ;;  %v9483_v15 = vpop.permute.xlu1 %4739  ;;  %v4529_v28 = vmul.f32 %v4520_v2, %v4512_v62 }
 0x7e0   : > { %v4582_v44 = vsel %vm490_vm0, %v4570_v36, %v4578_v17  ;;  %v4586_v3 = vsel %vm490_vm0, %v4578_v17, %v4570_v36  ;;  %v4599_v36 = vmul.f32 %v4592_v0, %v4583_v32 }
 0x7e1   : > { %v4605_v24 = vmul.f32 %v4592_v0, %v4586_v3  ;;  %v4606_v38 = vmul.f32 %v4596_v21, %v4582_v44  ;;  %v4507_v0 = vsel %vm416_vm1, %v9417_v63, %v9443_v51 }
 0x7e2   : > { %v7292_v14 = vpack.c.bf16 %v4601_v22, %v4599_v36  ;;  %v4528_v32 = vmul.f32 %v4524_v23, %v4507_v0 }
 0x7e3   : > { %v7294_v39 = vpack.c.bf16 %v4605_v24, %v4603_v1  ;;  %v9497_v46 = vpop.permute.xlu0 %4741  ;;  %v4504_v29 = vpop.permute.xlu1 %4503  ;;  %v7295_v10 = vpack.c.bf16 %v4606_v38, %v4604_v48  ;;  %v4511_v38 = vsel %vm416_vm1, %v9443_v51, %v9417_v63  ;;  %v4452_v51 = vrot.slane %v6748_v45, %v7738_v9 }
 0x7e4   : > { %v4509_v20 = vsel %vm416_vm1, %v4496_v55, %v4504_v29  ;;  %v4513_v21 = vsel %vm416_vm1, %v4504_v29, %v4496_v55  ;;  %v4436_v29 = vsel %vm342_vm2, %v9431_v30, %v9447_v42  ;;  %v7289_v63 = vpack.c.bf16 %v4530_v27, %v4528_v32 }
 0x7e5   : > { %5237 = vmatprep.subr.bf16.mxu1 %v7295_v10  ;;  %v4531_v3 = vmul.f32 %v4520_v2, %v4513_v21  ;;  %v4532_v1 = vmul.f32 %v4524_v23, %v4509_v20 }
 0x7e6   : > { %5238 = vmatpush1.bf16.msra.mxu1 %v7294_v39  ;;  %v4527_v39 = vmul.f32 %v4520_v2, %v4511_v38  ;;  %v4364_v38 = vsel %vm269_vm3, %v9437_v47, %v9451_v58 }
 0x7e7   : > { %v4506_v43 = vpop.permute.xlu0 %4505  ;;  %5239 = vmatprep.subr.bf16.mxu1 %v7293_v18  ;;  %v4432_v17 = vpop.permute.xlu1 %4431  ;;  %v4448_v18 = vrot.slane %v6748_v45, %v7736_v8 }
 0x7e8   : > { %v4510_v55 = vsel %vm416_vm1, %v4498_v56, %v4506_v43  ;;  %v4514_v44 = vsel %vm416_vm1, %v4506_v43, %v4498_v56  ;;  %v4437_v10 = vsel %vm342_vm2, %v9457_v37, %v4432_v17  ;;  %v4441_v36 = vsel %vm342_vm2, %v4432_v17, %v9457_v37 }
 0x7e9   : > { %v4533_v48 = vmul.f32 %v4520_v2, %v4514_v44  ;;  %v4534_v24 = vmul.f32 %v4524_v23, %v4510_v55  ;;  %v7288_v11 = vpack.c.bf16 %v4529_v28, %v4527_v39  ;;  %v4435_v23 = vsel %vm342_vm2, %v9425_v52, %v9445_v16  ;;  %v4371_v44 = vld [vmem:[%s10251_s3] sm:$0x3] }
 0x7ea   : > { %5240 = vmatpush1.bf16.msra.mxu1 %v7292_v14  ;;  %v4440_v14 = vsel %vm342_vm2, %v9447_v42, %v9431_v30  ;;  %v4458_v2 = vmul.f32 %v4452_v51, %v4436_v29  ;;  %v4459_v43 = vmul.f32 %v4448_v18, %v4441_v36  ;;  %v4460_v17 = vmul.f32 %v4452_v51, %v4437_v10 }
 0x7eb   : > { %v7290_v5 = vpack.c.bf16 %v4533_v48, %v4531_v3  ;;  %v9526_v22 = vpop.permute.xlu0 %4737  ;;  %v4360_v56 = vpop.permute.xlu1 %4359  ;;  %v7291_v33 = vpack.c.bf16 %v4534_v24, %v4532_v1  ;;  %v4439_v55 = vsel %vm342_vm2, %v9445_v16, %v9425_v52  ;;  %v4456_v30 = vmul.f32 %v4452_v51, %v4435_v23 }
 0x7ec   : > { %v4457_v42 = vmul.f32 %v4448_v18, %v4440_v14  ;;  %v4455_v24 = vmul.f32 %v4448_v18, %v4439_v55  ;;  %v4380_v16 = vrot.slane %v4371_v44, %v7738_v9  ;;  %v4365_v32 = vsel %vm269_vm3, %v9461_v53, %v4360_v56 }
 0x7ed   : > { %5241 = vmatprep.subr.bf16.mxu1 %v7291_v33  ;;  %v7285_v52 = vpack.c.bf16 %v4458_v2, %v4456_v30  ;;  %v4369_v28 = vsel %vm269_vm3, %v4360_v56, %v9461_v53  ;;  %v4363_v33 = vsel %vm269_vm3, %v9433_v13, %v9449_v19  ;;  %v4367_v23 = vsel %vm269_vm3, %v9449_v19, %v9433_v13 }
 0x7ee   : > { %5242 = vmatpush1.bf16.msra.mxu1 %v7290_v5  ;;  %v7284_v45 = vpack.c.bf16 %v4457_v42, %v4455_v24  ;;  %v4376_v5 = vrot.slane %v4371_v44, %v7736_v8  ;;  %v4388_v36 = vmul.f32 %v4380_v16, %v4365_v32  ;;  %v4827_v30 = vsel %vm740_vm4, %v9453_v40, %v9439_v61 }
 0x7ef   : > { %v4434_v20 = vpop.permute.xlu0 %4433  ;;  %5243 = vmatprep.subr.bf16.mxu1 %v7289_v63  ;;  %v4820_v21 = vpop.permute.xlu1 %4819  ;;  %v4368_v63 = vsel %vm269_vm3, %v9451_v58, %v9437_v47  ;;  %v4384_v47 = vmul.f32 %v4380_v16, %v4363_v33 }
 0x7f0   : > { %v4438_v37 = vsel %vm342_vm2, %v9459_v34, %v4434_v20  ;;  %v4442_v0 = vsel %vm342_vm2, %v4434_v20, %v9459_v34  ;;  %v4387_v10 = vmul.f32 %v4376_v5, %v4369_v28  ;;  %v4385_v58 = vmul.f32 %v4376_v5, %v4368_v63  ;;  %v6777_v20 = vld [vmem:[%s10251_s3 + $0xe] sm:$0x3] }
 0x7f1   : > { %v4461_v62 = vmul.f32 %v4448_v18, %v4442_v0  ;;  %v4462_v27 = vmul.f32 %v4452_v51, %v4438_v37  ;;  %v4386_v51 = vmul.f32 %v4380_v16, %v4364_v38  ;;  %v4383_v0 = vmul.f32 %v4376_v5, %v4367_v23 }
 0x7f2   : > { %5244 = vmatpush1.bf16.msra.mxu1 %v7288_v11  ;;  %v4840_v19 = vrot.slane %v6777_v20, %v7738_v9  ;;  %v4836_v55 = vrot.slane %v6777_v20, %v7736_v8 }
 0x7f3   : > { %v7286_v3 = vpack.c.bf16 %v4461_v62, %v4459_v43  ;;  %v9561_v1 = vpop.permute.xlu0 %4745  ;;  %v9563_v34 = vpop.permute.xlu1 %4747  ;;  %v7287_v48 = vpack.c.bf16 %v4462_v27, %v4460_v17  ;;  %v4828_v43 = vsel %vm740_vm4, %v9455_v50, %v9441_v31  ;;  %v7281_v13 = vpack.c.bf16 %v4386_v51, %v4384_v47 }
 0x7f4   : > { %v4825_v17 = vsel %vm740_vm4, %v9465_v57, %v4820_v21  ;;  %v4829_v62 = vsel %vm740_vm4, %v4820_v21, %v9465_v57  ;;  %v7280_v27 = vpack.c.bf16 %v4385_v58, %v4383_v0 }
 0x7f5   : > { %5245 = vmatprep.subr.bf16.mxu1 %v7287_v48  ;;  %v4846_v48 = vmul.f32 %v4840_v19, %v4828_v43  ;;  %v4847_v24 = vmul.f32 %v4836_v55, %v4825_v17  ;;  %v4848_v38 = vmul.f32 %v4840_v19, %v4829_v62  ;;  %v4752_v43 = vsel %vm666_vm5, %v9526_v22, %v9561_v1 }
 0x7f6   : > { %5246 = vmatpush1.bf16.msra.mxu1 %v7286_v3  ;;  %v4824_v3 = vsel %vm740_vm4, %v9441_v31, %v9455_v50  ;;  %v4823_v31 = vsel %vm740_vm4, %v9439_v61, %v9453_v40  ;;  %v4844_v50 = vmul.f32 %v4840_v19, %v4827_v30  ;;  %v4757_v61 = vsel %vm666_vm5, %v9563_v34, %v9483_v15 }
 0x7f7   : > { %v4362_v39 = vpop.permute.xlu0 %4361  ;;  %5247 = vmatprep.subr.bf16.mxu1 %v7285_v52  ;;  %v9581_v29 = vpop.permute.xlu1 %4735  ;;  %v6772_v52 = vld [vmem:[%s10251_s3 + $0xc] sm:$0x3]  ;;  %v4845_v28 = vmul.f32 %v4836_v55, %v4824_v3  ;;  %v4843_v63 = vmul.f32 %v4836_v55, %v4823_v31 }
 0x7f8   : > { %v4366_v53 = vsel %vm269_vm3, %v9463_v12, %v4362_v39  ;;  %v4370_v56 = vsel %vm269_vm3, %v4362_v39, %v9463_v12  ;;  %v4764_v39 = vrot.slane %v6772_v52, %v7736_v8  ;;  %v4768_v51 = vrot.slane %v6772_v52, %v7738_v9 }
 0x7f9   : > { %v4389_v11 = vmul.f32 %v4376_v5, %v4370_v56  ;;  %v4390_v18 = vmul.f32 %v4380_v16, %v4366_v53  ;;  %v4753_v53 = vsel %vm666_vm5, %v9483_v15, %v9563_v34  ;;  %v7309_v56 = vpack.c.bf16 %v4846_v48, %v4844_v50 }
 0x7fa   : > { %5248 = vmatpush1.bf16.msra.mxu1 %v7284_v45  ;;  %v4775_v47 = vmul.f32 %v4764_v39, %v4753_v53  ;;  %v4776_v20 = vmul.f32 %v4768_v51, %v4757_v61 }
 0x7fb   : > { %v7282_v14 = vpack.c.bf16 %v4389_v11, %v4387_v10  ;;  %v9600_v2 = vpop.permute.xlu0 %4669  ;;  %v4744_v12 = vpop.permute.xlu1 %4743  ;;  %v7283_v37 = vpack.c.bf16 %v4390_v18, %v4388_v36  ;;  %v7308_v10 = vpack.c.bf16 %v4845_v28, %v4843_v63  ;;  %v4756_v36 = vsel %vm666_vm5, %v9561_v1, %v9526_v22  ;;  %v6767_v11 = vld [vmem:[%s10251_s3 + $0xa] sm:$0x3] }
 0x7fc   : > { %v4755_v40 = vsel %vm666_vm5, %v4744_v12, %v9581_v29  ;;  %v4751_v15 = vsel %vm666_vm5, %v9581_v29, %v4744_v12  ;;  %v4696_v29 = vrot.slane %v6767_v11, %v7738_v9  ;;  %v4774_v12 = vmul.f32 %v4768_v51, %v4756_v36 }
 0x7fd   : > { %5249 = vmatprep.subr.bf16.mxu1 %v7283_v37 }
 0x7fe   : > { %5250 = vmatpush1.bf16.msra.mxu1 %v7282_v14  ;;  %v4772_v14 = vmul.f32 %v4768_v51, %v4755_v40 }
 0x7ff   : > { %v4822_v42 = vpop.permute.xlu0 %4821  ;;  %5251 = vmatprep.subr.bf16.mxu1 %v7281_v13  ;;  %v4668_v44 = vpop.permute.xlu1 %4667  ;;  %v4692_v13 = vrot.slane %v6767_v11, %v7736_v8  ;;  %v7299_v11 = vpack.c.bf16 %v9357_v60, %v9351_v59  ;;  %v7297_v59 = vpack.c.bf16 %v9307_v6, %v9301_v35  ;;  %v7296_v6 = vpack.c.bf16 %v9283_v25, %v9279_v4  ;;  %v7437_v4 = vld [vmem:[#allocation4 + $0xe0] ss:$12 sps:$4 sm:$0xff]  }
 0x800   : > { %v4826_v57 = vsel %vm740_vm4, %v9470_v41, %v4822_v42  ;;  %v4830_v21 = vsel %vm740_vm4, %v4822_v42, %v9470_v41  ;;  %v4773_v42 = vmul.f32 %v4764_v39, %v4752_v43  ;;  %v7305_v22 = vpack.c.bf16 %v4774_v12, %v4772_v14 }
 0x801   : > { %v4849_v16 = vmul.f32 %v4836_v55, %v4826_v57  ;;  %v4850_v32 = vmul.f32 %v4840_v19, %v4830_v21  ;;  %v4771_v19 = vmul.f32 %v4764_v39, %v4751_v15 }
 0x802   : > { %5252 = vmatpush1.bf16.msra.mxu1 %v7280_v27 }
 0x803   : > { %v7310_v45 = vpack.c.bf16 %v4849_v16, %v4847_v24  ;;  %v4666_v5 = vpop.permute.xlu0 %4665  ;;  %v4676_v33 = vpop.permute.xlu1 %4675  ;;  %v7311_v41 = vpack.c.bf16 %v4850_v32, %v4848_v38  ;;  %v7304_v48 = vpack.c.bf16 %v4773_v42, %v4771_v19 }
 0x804   : > { %v4681_v55 = vsel %vm592_vm6, %v4668_v44, %v4676_v33  ;;  %v4685_v30 = vsel %vm592_vm6, %v4676_v33, %v4668_v44 }
 0x805   : > { %5253 = vmatprep.subr.bf16.mxu1 %v7311_v41  ;;  %v4703_v57 = vmul.f32 %v4692_v13, %v4681_v55  ;;  %v4704_v21 = vmul.f32 %v4696_v29, %v4685_v30  ;;  %v7434_v55 = vld [vmem:[#allocation4 + $0xdc] ss:$12 sps:$4 sm:$0xff]  }
 0x806   : > { %5254 = vmatpush2.bf16.msra.mxu1 %v7310_v45 }
 0x807   : > { %v4750_v18 = vpop.permute.xlu0 %4749  ;;  %5255 = vmatprep.subr.bf16.mxu1 %v7309_v56  ;;  %v4664_v23 = vpop.permute.xlu1 %4663  ;;  %v6782_v56 = vld [vmem:[%s10251_s3 + $0x10] sm:$0x3] }
 0x808   : > { %v4754_v34 = vsel %vm666_vm5, %v9497_v46, %v4750_v18  ;;  %v4758_v58 = vsel %vm666_vm5, %v4750_v18, %v9497_v46  ;;  %v4912_v36 = vrot.slane %v6782_v56, %v7738_v9 }
 0x809   : > { %v4777_v37 = vmul.f32 %v4764_v39, %v4754_v34  ;;  %v4778_v0 = vmul.f32 %v4768_v51, %v4758_v58 }
 0x80a   : > { %5256 = vmatpush2.bf16.msra.mxu1 %v7308_v10  ;;  %v4908_v10 = vrot.slane %v6782_v56, %v7736_v8 }
 0x80b   : > { %v7306_v17 = vpack.c.bf16 %v4777_v37, %v4775_v47  ;;  %v4674_v62 = vpop.permute.xlu0 %4673  ;;  %v4672_v27 = vpop.permute.xlu1 %4671  ;;  %v7307_v46 = vpack.c.bf16 %v4778_v0, %v4776_v20  ;;  %v7298_v20 = vpack.c.bf16 %v9332_v49, %v9326_v54 }
 0x80c   : > { %v4684_v1 = vsel %vm592_vm6, %v4674_v62, %v4666_v5  ;;  %v4683_v3 = vsel %vm592_vm6, %v4672_v27, %v4664_v23  ;;  %v4680_v52 = vsel %vm592_vm6, %v4666_v5, %v4674_v62  ;;  %v4679_v44 = vsel %vm592_vm6, %v4664_v23, %v4672_v27 }
 0x80d   : > { %5257 = vmatprep.subr.bf16.mxu1 %v7307_v46  ;;  %v4702_v31 = vmul.f32 %v4696_v29, %v4684_v1  ;;  %v4700_v50 = vmul.f32 %v4696_v29, %v4683_v3  ;;  %v4701_v63 = vmul.f32 %v4692_v13, %v4680_v52  ;;  %v4699_v51 = vmul.f32 %v4692_v13, %v4679_v44  ;;  %v7430_v46 = vld [vmem:[#allocation4 + $0xc0] ss:$12 sps:$4 sm:$0xff]   ;;  %v7436_v1 = vld [vmem:[#allocation4 + $0xd8] ss:$12 sps:$4 sm:$0xff]  }
 0x80e   : > { %5258 = vmatpush2.bf16.msra.mxu1 %v7306_v17 }
 0x80f   : > { %v4678_v24 = vpop.permute.xlu0 %4677  ;;  %5259 = vmatprep.subr.bf16.mxu1 %v7305_v22  ;;  %v4884_v38 = vpop.permute.xlu1 %4883  ;;  %v7301_v53 = vpack.c.bf16 %v4702_v31, %v4700_v50  ;;  %v7300_v40 = vpack.c.bf16 %v4701_v63, %v4699_v51  ;;  %v7433_v22 = vld [vmem:[#allocation4 + $0xc8] ss:$12 sps:$4 sm:$0xff]  }
 0x810   : > { %v4682_v16 = vsel %vm592_vm6, %v9600_v2, %v4678_v24  ;;  %v4686_v32 = vsel %vm592_vm6, %v4678_v24, %v9600_v2 }
 0x811   : > { %v4705_v28 = vmul.f32 %v4692_v13, %v4682_v16  ;;  %v4706_v45 = vmul.f32 %v4696_v29, %v4686_v32 }
 0x812   : > { %5260 = vmatpush2.bf16.msra.mxu1 %v7304_v48 }
 0x813   : > { %v7302_v33 = vpack.c.bf16 %v4705_v28, %v4703_v57  ;;  %v4886_v41 = vpop.permute.xlu0 %4885  ;;  %v4892_v39 = vpop.permute.xlu1 %4891  ;;  %v7303_v5 = vpack.c.bf16 %v4706_v45, %v4704_v21 }
 0x814   : > { %v4897_v18 = vsel %vm814_vm7, %v4884_v38, %v4892_v39  ;;  %v4901_v23 = vsel %vm814_vm7, %v4892_v39, %v4884_v38 }
 0x815   : > { %5261 = vmatprep.subr.bf16.mxu1 %v7303_v5  ;;  %v4919_v60 = vmul.f32 %v4908_v10, %v4897_v18  ;;  %v4920_v14 = vmul.f32 %v4912_v36, %v4901_v23 }
 0x816   : > { %5262 = vmatpush2.bf16.msra.mxu1 %v7302_v33 }
 0x817   : > { %v4882_v61 = vpop.permute.xlu0 %4881  ;;  %5263 = vmatprep.subr.bf16.mxu1 %v7301_v53  ;;  %v4880_v2 = vpop.permute.xlu1 %4879 }
 0x81a   : > { %5264 = vmatpush2.bf16.msra.mxu1 %v7300_v40 }
 0x81b   : > { %v4894_v47 = vpop.permute.xlu0 %4893  ;;  %5265 = vmatprep.subr.bf16.mxu1 %v7299_v11  ;;  %v4888_v15 = vpop.permute.xlu1 %4887 }
 0x81c   : > { %v4898_v34 = vsel %vm814_vm7, %v4886_v41, %v4894_v47  ;;  %v4902_v58 = vsel %vm814_vm7, %v4894_v47, %v4886_v41  ;;  %v4895_v43 = vsel %vm814_vm7, %v4880_v2, %v4888_v15  ;;  %v4899_v13 = vsel %vm814_vm7, %v4888_v15, %v4880_v2 }
 0x81d   : > { %v4921_v37 = vmul.f32 %v4908_v10, %v4898_v34  ;;  %v4922_v0 = vmul.f32 %v4912_v36, %v4902_v58  ;;  %v4915_v49 = vmul.f32 %v4908_v10, %v4895_v43  ;;  %v4916_v17 = vmul.f32 %v4912_v36, %v4899_v13 }
 0x81e   : > { %5266 = vmatpush2.bf16.msra.mxu1 %v7298_v20 }
 0x81f   : > { %v7314_v29 = vpack.c.bf16 %v4921_v37, %v4919_v60  ;;  %v4890_v12 = vpop.permute.xlu0 %4889  ;;  %5267 = vmatprep.subr.bf16.mxu1 %v7297_v59  ;;  %v7315_v19 = vpack.c.bf16 %v4922_v0, %v4920_v14 }
 0x820   : > { %v4896_v54 = vsel %vm814_vm7, %v4882_v61, %v4890_v12  ;;  %v4900_v35 = vsel %vm814_vm7, %v4890_v12, %v4882_v61  ;;  %v9859_v12 = vld [vmem:[#allocation4 + $0xf0] sm:$0xff] }
 0x821   : > { %v4917_v62 = vmul.f32 %v4908_v10, %v4896_v54  ;;  %v4918_v27 = vmul.f32 %v4912_v36, %v4900_v35  ;;  %5302 = vmatprep.subr.bf16.mxu0 %v7315_v19  ;;  %10264 = vst [vmem:[#allocation14_spill] sm:$0xff] %v9859_v12  ;;  %v6875_v35 = vcombine.high %v9859_v12, %v9859_v12 }
 0x822   : > { %5268 = vmatpush2.bf16.msra.mxu1 %v7296_v6  ;;  %5303 = vmatpush1.bf16.msra.mxu0 %v7314_v29 }
 0x823   : > { %v7312_v30 = vpack.c.bf16 %v4917_v62, %v4915_v49  ;;  %v7313_v42 = vpack.c.bf16 %v4918_v27, %v4916_v17  ;;  %v5975_v17 = vld [vmem:[#allocation6 + $0xa0] sm:$0xff] }
 0x825   : > { %5270 = vmatmul.mubr.bf16.vlgmr.msra.gmra.mxu1 %v7430_v46  ;;  %5304 = vmatprep.subr.bf16.mxu0 %v7313_v42 }
 0x826   : > { %5305 = vmatpush1.bf16.msra.mxu0 %v7312_v30  ;;  %5279 = vmatprep.mubr.bf16.mxu1 %v7434_v55  ;;  %v9878_v30 = vld [vmem:[%s10251_s3 + $0x6] sm:$0x3] }
 0x828   : > { %v5014_v25 = vpop.permute.xlu1 %5013 }
 0x829   : > { %6829 = vmatmul.mubr.msk.bf16.vlgmr.msra.gmra.mxu0 %vm1150_vm8, %v7433_v22 }
 0x82a   : > { %5332 = vmatprep.mubr.bf16.mxu0 %v7532_v26 }
 0x82c   : > { %v5019_v3 = vpop.permute.xlu0 %5018  ;;  %v5004_v57 = vpop.permute.xlu1 %5003 }
 0x82d   : > { %5280 = vmatmul.mubr.bf16.gmra.mxu1 %v7436_v1  ;;  %v9886_v1 = vrot.slane %v9878_v30, %v7736_v8 }
 0x82e   : > { %6283 = vmatprep.mubr.bf16.mxu1 %v7532_v26 }
 0x830   : > { %v5009_v44 = vpop.permute.xlu0 %5008 }
 0x831   : > { %6830 = vmatmul.mubr.msk.bf16.gmra.mxu0 %vm1150_vm8, %v7437_v4 }
 0x832   : > { %6242 = vmatprep.mubr.bf16.mxu0 %v6875_v35  ;;  %v6864_v35 = vld [vmem:[%s10251_s3 + $0xe] sm:$0x3] }
 0x8e5   : > { %v5271_v48 = vpop.f32.mrf.mxu1 }
 0x8e6   : > { %v5272_v24 = vadd.f32 %v5271_v48, %v5004_v57 }
 0x8e7   : > { %v5273_v21 = vpop.f32.mrf.mxu1 }
 0x8e8   : > { %v5274_v16 = vadd.f32 %v5273_v21, %v5004_v57 }
 0x8e9   : > { %v5275_v38 = vpop.f32.mrf.mxu1  ;;  %v5324_v52 = vpop.f32.mrf.mxu0 }
 0x8ea   : > { %v5325_v32 = vadd.f32 %v5324_v52, %v5272_v24  ;;  %v5276_v28 = vadd.f32 %v5275_v38, %v5009_v44 }
 0x8eb   : > { %v5277_v31 = vpop.f32.mrf.mxu1  ;;  %v5326_v50 = vpop.f32.mrf.mxu0 }
 0x8ec   : > { %v9721_v45 = vmax.f32 %v5325_v32, 0.0  ;;  %v5327_v33 = vadd.f32 %v5326_v50, %v5274_v16  ;;  %v5278_v39 = vadd.f32 %v5277_v31, %v5009_v44  ;;  %v6835_v44 = vld [vmem:[%s10251_s3 + $0x2] sm:$0x3] }
 0x8ed   : > { %v5281_v26 = vpop.f32.mrf.mxu1  ;;  %v5328_v41 = vpop.f32.mrf.mxu0 }
 0x8ee   : > { %10260 = vst [vmem:[#allocation10_spill] sm:$0xff] %v9721_v45  ;;  %5351 = vst [vmem:[#allocation2 + $0x30] sm:$0xff] %v9721_v45  ;;  %v9724_v5 = vmax.f32 %v5327_v33, 0.0  ;;  %v5329_v63 = vadd.f32 %v5328_v41, %v5276_v28  ;;  %5583 = vrot.lane.b32.xlu1 %v9721_v45, %s7524_s7  ;;  %v5282_v56 = vadd.f32 %v5281_v26, %v5014_v25 }
 0x8ef   : > { %v5283_v51 = vpop.f32.mrf.mxu1  ;;  %v5330_v53 = vpop.f32.mrf.mxu0  ;;  %v9927_v41 = vrot.slane %v6835_v44, %v7736_v8 }
 0x8f0   : > { %10261 = vst [vmem:[#allocation11_spill] sm:$0xff] %v9724_v5  ;;  %5352 = vst [vmem:[#allocation2] sm:$0xff] %v9724_v5  ;;  %v9729_v61 = vmax.f32 %v5329_v63, 0.0  ;;  %v5331_v2 = vadd.f32 %v5330_v53, %v5278_v39  ;;  %v5284_v36 = vadd.f32 %v5283_v51, %v5014_v25  ;;  %v6840_v25 = vld [vmem:[%s10251_s3 + $0x4] sm:$0x3]  ;;  %v9930_v39 = vrot.slane %v6835_v44, %v7738_v9 }
 0x8f1   : > { %v5285_v40 = vpop.f32.mrf.mxu1  ;;  %v5334_v10 = vpop.f32.mrf.mxu0  ;;  %v9908_v38 = vrot.slane %v6840_v25, %v7736_v8  ;;  %v9911_v52 = vrot.slane %v6840_v25, %v7738_v9  ;;  %v9993_v44 = vrot.slane %v6864_v35, %v7736_v8 }
 0x8f2   : > { %10262 = vst [vmem:[#allocation12_spill] sm:$0xff] %v9729_v61  ;;  %v9731_v11 = vmax.f32 %v5331_v2, 0.0  ;;  %v5335_v18 = vadd.f32 %v5334_v10, %v5282_v56  ;;  %5585 = vrot.lane.b32.xlu0 %v9729_v61, %s7524_s7  ;;  %5511 = vrot.lane.b32.xlu1 %v9721_v45, %s7525_s12  ;;  %v5286_v15 = vadd.f32 %v5285_v40, %v5019_v3  ;;  %v5391_v2 = vld [vmem:[%s10251_s3] sm:$0x3] }
 0x8f3   : > { %v5287_v23 = vpop.f32.mrf.mxu1  ;;  %v5336_v47 = vpop.f32.mrf.mxu0 }
 0x8f4   : > { %10263 = vst [vmem:[#allocation13_spill] sm:$0xff] %v9731_v11  ;;  %v9737_v34 = vmax.f32 %v5335_v18, 0.0  ;;  %v5337_v58 = vadd.f32 %v5336_v47, %v5284_v36  ;;  %v5288_v59 = vadd.f32 %v5287_v23, %v5019_v3 }
 0x8f5   : > { %v5338_v20 = vpop.f32.mrf.mxu0 }
 0x8f6   : > { %v9739_v60 = vmax.f32 %v5337_v58, 0.0  ;;  %v5339_v14 = vadd.f32 %v5338_v20, %v5286_v15  ;;  %5513 = vrot.lane.b32.xlu0 %v9729_v61, %s7525_s12  ;;  %5439 = vrot.lane.b32.xlu1 %v9721_v45, %s7526_s13  ;;  %v9960_v20 = vrot.slane %v5391_v2, %v7736_v8 }
 0x8f7   : > { %v5340_v37 = vpop.f32.mrf.mxu0 }
 0x8f8   : > { %v9745_v0 = vmax.f32 %v5339_v14, 0.0  ;;  %v5341_v43 = vadd.f32 %v5340_v37, %v5288_v59  ;;  %v9963_v59 = vrot.slane %v5391_v2, %v7738_v9 }
 0x8fa   : > { %v9747_v13 = vmax.f32 %v5341_v43, 0.0  ;;  %5441 = vrot.lane.b32.xlu0 %v9729_v61, %s7526_s13  ;;  %5367 = vrot.lane.b32.xlu1 %v9721_v45, %s7527_s14 }
 0x8fe   : > { %5369 = vrot.lane.b32.xlu0 %v9729_v61, %s7527_s14  ;;  %5827 = vrot.lane.b32.xlu1 %v9721_v45, %s7528_s16 }
 0x902   : > { %5829 = vrot.lane.b32.xlu0 %v9729_v61, %s7528_s16  ;;  %5591 = vrot.lane.b32.xlu1 %v9724_v5, %s7524_s7 }
 0x906   : > { %5593 = vrot.lane.b32.xlu0 %v9731_v11, %s7524_s7  ;;  %5519 = vrot.lane.b32.xlu1 %v9724_v5, %s7525_s12 }
 0x90a   : > { %5521 = vrot.lane.b32.xlu0 %v9731_v11, %s7525_s12  ;;  %5447 = vrot.lane.b32.xlu1 %v9724_v5, %s7526_s13 }
 0x90e   : > { %5449 = vrot.lane.b32.xlu0 %v9731_v11, %s7526_s13  ;;  %5375 = vrot.lane.b32.xlu1 %v9724_v5, %s7527_s14 }
 0x912   : > { %5377 = vrot.lane.b32.xlu0 %v9731_v11, %s7527_s14  ;;  %5835 = vrot.lane.b32.xlu1 %v9724_v5, %s7528_s16 }
 0x916   : > { %5837 = vrot.lane.b32.xlu0 %v9731_v11, %s7528_s16  ;;  %5587 = vrot.lane.b32.xlu1 %v9737_v34, %s7524_s7 }
 0x91a   : > { %5589 = vrot.lane.b32.xlu0 %v9745_v0, %s7524_s7  ;;  %5515 = vrot.lane.b32.xlu1 %v9737_v34, %s7525_s12 }
 0x91e   : > { %5517 = vrot.lane.b32.xlu0 %v9745_v0, %s7525_s12  ;;  %5443 = vrot.lane.b32.xlu1 %v9737_v34, %s7526_s13 }
 0x922   : > { %5445 = vrot.lane.b32.xlu0 %v9745_v0, %s7526_s13  ;;  %5371 = vrot.lane.b32.xlu1 %v9737_v34, %s7527_s14 }
 0x926   : > { %5373 = vrot.lane.b32.xlu0 %v9745_v0, %s7527_s14  ;;  %5831 = vrot.lane.b32.xlu1 %v9737_v34, %s7528_s16 }
 0x92a   : > { %5833 = vrot.lane.b32.xlu0 %v9745_v0, %s7528_s16  ;;  %5595 = vrot.lane.b32.xlu1 %v9739_v60, %s7524_s7 }
 0x92e   : > { %5597 = vrot.lane.b32.xlu0 %v9747_v13, %s7524_s7  ;;  %5759 = vrot.lane.b32.xlu1 %v9737_v34, %s7529_s17 }
 0x932   : > { %5761 = vrot.lane.b32.xlu0 %v9745_v0, %s7529_s17  ;;  %5523 = vrot.lane.b32.xlu1 %v9739_v60, %s7525_s12 }
 0x936   : > { %5525 = vrot.lane.b32.xlu0 %v9747_v13, %s7525_s12  ;;  %5451 = vrot.lane.b32.xlu1 %v9739_v60, %s7526_s13 }
 0x93a   : > { %5757 = vrot.lane.b32.xlu0 %v9729_v61, %s7529_s17  ;;  %5379 = vrot.lane.b32.xlu1 %v9739_v60, %s7527_s14 }
 0x93e   : > { %5453 = vrot.lane.b32.xlu0 %v9747_v13, %s7526_s13  ;;  %5839 = vrot.lane.b32.xlu1 %v9739_v60, %s7528_s16 }
 0x942   : > { %5765 = vrot.lane.b32.xlu0 %v9731_v11, %s7529_s17  ;;  %5767 = vrot.lane.b32.xlu1 %v9739_v60, %s7529_s17 }
 0x946   : > { %5381 = vrot.lane.b32.xlu0 %v9747_v13, %s7527_s14  ;;  %5755 = vrot.lane.b32.xlu1 %v9721_v45, %s7529_s17 }
 0x94a   : > { %5689 = vrot.lane.b32.xlu0 %v9745_v0, %s7530_s19  ;;  %5763 = vrot.lane.b32.xlu1 %v9724_v5, %s7529_s17 }
 0x94e   : > { %5841 = vrot.lane.b32.xlu0 %v9747_v13, %s7528_s16  ;;  %5687 = vrot.lane.b32.xlu1 %v9737_v34, %s7530_s19 }
 0x952   : > { %5685 = vrot.lane.b32.xlu0 %v9729_v61, %s7530_s19  ;;  %5695 = vrot.lane.b32.xlu1 %v9739_v60, %s7530_s19 }
 0x956   : > { %5769 = vrot.lane.b32.xlu0 %v9747_v13, %s7529_s17  ;;  %5683 = vrot.lane.b32.xlu1 %v9721_v45, %s7530_s19 }
 0x95a   : > { %5693 = vrot.lane.b32.xlu0 %v9731_v11, %s7530_s19  ;;  %5691 = vrot.lane.b32.xlu1 %v9724_v5, %s7530_s19 }
 0x95e   : > { %5697 = vrot.lane.b32.xlu0 %v9747_v13, %s7530_s19  ;;  %5903 = vrot.lane.b32.xlu1 %v9737_v34, %s7531_s22 }
 0x960   : > { %v9853_v29 = vpop.permute.xlu1 %5583 }
 0x962   : > { %5905 = vrot.lane.b32.xlu0 %v9745_v0, %s7531_s22  ;;  %5911 = vrot.lane.b32.xlu1 %v9739_v60, %s7531_s22 }
 0x964   : > { %v9861_v19 = vpop.permute.xlu0 %5585  ;;  %v5512_v54 = vpop.permute.xlu1 %5511 }
 0x966   : > { %5901 = vrot.lane.b32.xlu0 %v9729_v61, %s7531_s22  ;;  %5899 = vrot.lane.b32.xlu1 %v9721_v45, %s7531_s22 }
 0x968   : > { %v5514_v6 = vpop.permute.xlu0 %5513  ;;  %v5440_v49 = vpop.permute.xlu1 %5439 }
 0x96a   : > { %5913 = vrot.lane.b32.xlu0 %v9747_v13, %s7531_s22  ;;  %5907 = vrot.lane.b32.xlu1 %v9724_v5, %s7531_s22 }
 0x96c   : > { %v5442_v62 = vpop.permute.xlu0 %5441  ;;  %v5368_v27 = vpop.permute.xlu1 %5367 }
 0x96e   : > { %5909 = vrot.lane.b32.xlu0 %v9731_v11, %s7531_s22  ;;  %6014 = vperm.xlu1 %7396, %v5975_v17  }
 0x970   : > { %v5370_v46 = vpop.permute.xlu0 %5369  ;;  %v5828_v55 = vpop.permute.xlu1 %5827 }
 0x974   : > { %v9880_v42 = vpop.permute.xlu0 %5829  ;;  %v9882_v22 = vpop.permute.xlu1 %5591 }
 0x975   : > { %v5603_v4 = vsel %vm490_vm0, %v9882_v22, %v9853_v29  ;;  %v5599_v36 = vsel %vm490_vm0, %v9853_v29, %v9882_v22 }
 0x976   : > { %v9902_v21 = vmul.f32 %v9886_v1, %v5603_v4 }
 0x978   : > { %v9895_v3 = vpop.permute.xlu0 %5593  ;;  %v5520_v48 = vpop.permute.xlu1 %5519 }
 0x979   : > { %v5604_v57 = vsel %vm490_vm0, %v9895_v3, %v9861_v19  ;;  %v5527_v16 = vsel %vm416_vm1, %v5512_v54, %v5520_v48  ;;  %v5531_v32 = vsel %vm416_vm1, %v5520_v48, %v5512_v54 }
 0x97a   : > { %v9905_v24 = vmul.f32 %v9886_v1, %v5604_v57  ;;  %v9933_v63 = vmul.f32 %v9908_v38, %v5531_v32  ;;  %v9936_v51 = vmul.f32 %v9911_v52, %v5527_v16  ;;  %v9996_v16 = vrot.slane %v6864_v35, %v7738_v9 }
 0x97c   : > { %v5522_v50 = vpop.permute.xlu0 %5521  ;;  %v5448_v28 = vpop.permute.xlu1 %5447 }
 0x97d   : > { %v5528_v33 = vsel %vm416_vm1, %v5514_v6, %v5522_v50  ;;  %v5532_v26 = vsel %vm416_vm1, %v5522_v50, %v5514_v6  ;;  %v5455_v40 = vsel %vm342_vm2, %v5440_v49, %v5448_v28  ;;  %v5459_v10 = vsel %vm342_vm2, %v5448_v28, %v5440_v49 }
 0x97e   : > { %v9939_v53 = vmul.f32 %v9908_v38, %v5532_v26  ;;  %v9942_v56 = vmul.f32 %v9911_v52, %v5528_v33  ;;  %v9966_v14 = vmul.f32 %v9927_v41, %v5459_v10  ;;  %v9969_v37 = vmul.f32 %v9930_v39, %v5455_v40 }
 0x980   : > { %v5450_v18 = vpop.permute.xlu0 %5449  ;;  %v5376_v23 = vpop.permute.xlu1 %5375 }
 0x981   : > { %v5456_v15 = vsel %vm342_vm2, %v5442_v62, %v5450_v18  ;;  %v5460_v58 = vsel %vm342_vm2, %v5450_v18, %v5442_v62  ;;  %v5383_v6 = vsel %vm269_vm3, %v5368_v27, %v5376_v23  ;;  %v5387_v49 = vsel %vm269_vm3, %v5376_v23, %v5368_v27 }
 0x982   : > { %v9972_v43 = vmul.f32 %v9927_v41, %v5460_v58  ;;  %v9975_v54 = vmul.f32 %v9930_v39, %v5456_v15  ;;  %v9999_v27 = vmul.f32 %v9960_v20, %v5387_v49  ;;  %v10002_v32 = vmul.f32 %v9963_v59, %v5383_v6 }
 0x983   : > { %v5600_v6 = vsel %vm490_vm0, %v9861_v19, %v9895_v3 }
 0x984   : > { %v5378_v62 = vpop.permute.xlu0 %5377  ;;  %v5836_v4 = vpop.permute.xlu1 %5835 }
 0x985   : > { %v5384_v48 = vsel %vm269_vm3, %v5370_v46, %v5378_v62  ;;  %v5388_v57 = vsel %vm269_vm3, %v5378_v62, %v5370_v46  ;;  %v5843_v46 = vsel %vm740_vm4, %v5828_v55, %v5836_v4  ;;  %v5847_v33 = vsel %vm740_vm4, %v5836_v4, %v5828_v55 }
 0x986   : > { %v10005_v50 = vmul.f32 %v9960_v20, %v5388_v57  ;;  %v10008_v28 = vmul.f32 %v9963_v59, %v5384_v48  ;;  %v10025_v15 = vmul.f32 %v9993_v44, %v5843_v46  ;;  %v10028_v55 = vmul.f32 %v9996_v16, %v5847_v33 }
 0x988   : > { %v5838_v2 = vpop.permute.xlu0 %5837  ;;  %v5588_v40 = vpop.permute.xlu1 %5587 }
 0x989   : > { %v5844_v18 = vsel %vm740_vm4, %v9880_v42, %v5838_v2  ;;  %v5848_v23 = vsel %vm740_vm4, %v5838_v2, %v9880_v42  ;;  %v5616_v42 = vrot.slane %v9878_v30, %v7738_v9 }
 0x98a   : > { %v10031_v58 = vmul.f32 %v9993_v44, %v5844_v18  ;;  %v10034_v35 = vmul.f32 %v9996_v16, %v5848_v23 }
 0x98b   : > { %v5622_v47 = vmul.f32 %v5616_v42, %v5600_v6  ;;  %v5620_v12 = vmul.f32 %v5616_v42, %v5599_v36 }
 0x98c   : > { %v5590_v49 = vpop.permute.xlu0 %5589  ;;  %v5516_v62 = vpop.permute.xlu1 %5515 }
 0x98d   : > { %v7329_v29 = vpack.c.bf16 %v5622_v47, %v5620_v12 }
 0x990   : > { %v5518_v4 = vpop.permute.xlu0 %5517  ;;  %v5444_v48 = vpop.permute.xlu1 %5443 }
 0x994   : > { %v5446_v57 = vpop.permute.xlu0 %5445  ;;  %v10040_v46 = vpop.permute.xlu1 %5371 }
 0x998   : > { %v10042_v33 = vpop.permute.xlu0 %5373  ;;  %v10044_v2 = vpop.permute.xlu1 %5831 }
 0x99c   : > { %v10046_v18 = vpop.permute.xlu0 %5833  ;;  %v5596_v23 = vpop.permute.xlu1 %5595 }
 0x99d   : > { %v5601_v26 = vsel %vm490_vm0, %v5588_v40, %v5596_v23  ;;  %v5605_v10 = vsel %vm490_vm0, %v5596_v23, %v5588_v40 }
 0x99e   : > { %v5623_v3 = vmul.f32 %v9886_v1, %v5605_v10  ;;  %v5624_v31 = vmul.f32 %v5616_v42, %v5601_v26 }
 0x9a0   : > { %v5598_v17 = vpop.permute.xlu0 %5597  ;;  %v10058_v25 = vpop.permute.xlu1 %5759 }
 0x9a1   : > { %v5602_v19 = vsel %vm490_vm0, %v5590_v49, %v5598_v17  ;;  %v5606_v30 = vsel %vm490_vm0, %v5598_v17, %v5590_v49 }
 0x9a2   : > { %v5625_v40 = vmul.f32 %v9886_v1, %v5606_v30  ;;  %v5626_v23 = vmul.f32 %v5616_v42, %v5602_v19 }
 0x9a4   : > { %v7330_v61 = vpack.c.bf16 %v5625_v40, %v5623_v3  ;;  %v10070_v45 = vpop.permute.xlu0 %5761  ;;  %v5524_v11 = vpop.permute.xlu1 %5523  ;;  %v7331_v5 = vpack.c.bf16 %v5626_v23, %v5624_v31  ;;  %v10267_v23 = vpack.c.bf16 %v9939_v53, %v9933_v63 }
 0x9a5   : > { %v5529_v22 = vsel %vm416_vm1, %v5516_v62, %v5524_v11  ;;  %v5533_v17 = vsel %vm416_vm1, %v5524_v11, %v5516_v62 }
 0x9a6   : > { %6210 = vmatprep.subr.bf16.mxu0 %v7331_v5  ;;  %v5551_v31 = vmul.f32 %v9908_v38, %v5533_v17  ;;  %v5552_v5 = vmul.f32 %v9911_v52, %v5529_v22 }
 0x9a7   : > { %6211 = vmatpush1.bf16.msra.mxu0 %v7330_v61  ;;  %v10265_v61 = vpack.c.bf16 %v9905_v24, %v9902_v21 }
 0x9a8   : > { %v5526_v10 = vpop.permute.xlu0 %5525  ;;  %6212 = vmatprep.subr.bf16.mxu0 %v7329_v29  ;;  %v5452_v26 = vpop.permute.xlu1 %5451 }
 0x9a9   : > { %v5530_v1 = vsel %vm416_vm1, %v5518_v4, %v5526_v10  ;;  %v5534_v36 = vsel %vm416_vm1, %v5526_v10, %v5518_v4  ;;  %v5457_v42 = vsel %vm342_vm2, %v5444_v48, %v5452_v26  ;;  %v5461_v4 = vsel %vm342_vm2, %v5452_v26, %v5444_v48 }
 0x9aa   : > { %v5553_v12 = vmul.f32 %v9908_v38, %v5534_v36  ;;  %v5554_v47 = vmul.f32 %v9911_v52, %v5530_v1  ;;  %v10266_v52 = vpack.c.bf16 %v9942_v56, %v9936_v51  ;;  %v5479_v30 = vmul.f32 %v9927_v41, %v5461_v4 }
 0x9ab   : > { %6213 = vmatpush1.bf16.msra.mxu0 %v10265_v61  ;;  %v5480_v3 = vmul.f32 %v9930_v39, %v5457_v42 }
 0x9ac   : > { %v7326_v11 = vpack.c.bf16 %v5553_v12, %v5551_v31  ;;  %v10087_v6 = vpop.permute.xlu0 %5757  ;;  %v5380_v49 = vpop.permute.xlu1 %5379  ;;  %v7327_v62 = vpack.c.bf16 %v5554_v47, %v5552_v5 }
 0x9ad   : > { %v5389_v17 = vsel %vm269_vm3, %v5380_v49, %v10040_v46 }
 0x9ae   : > { %6214 = vmatprep.subr.bf16.mxu0 %v7327_v62  ;;  %v5407_v26 = vmul.f32 %v9960_v20, %v5389_v17  ;;  %v10271_v62 = vpack.c.bf16 %v10005_v50, %v9999_v27  ;;  %v6854_v50 = vld [vmem:[%s10251_s3 + $0xa] sm:$0x3] }
 0x9af   : > { %6215 = vmatpush1.bf16.msra.mxu0 %v7326_v11  ;;  %v5716_v17 = vrot.slane %v6854_v50, %v7738_v9 }
 0x9b0   : > { %v5454_v38 = vpop.permute.xlu0 %5453  ;;  %6216 = vmatprep.subr.bf16.mxu0 %v10266_v52  ;;  %v5840_v21 = vpop.permute.xlu1 %5839 }
 0x9b1   : > { %v5458_v24 = vsel %vm342_vm2, %v5446_v57, %v5454_v38  ;;  %v5462_v19 = vsel %vm342_vm2, %v5454_v38, %v5446_v57  ;;  %v5385_v57 = vsel %vm269_vm3, %v10040_v46, %v5380_v49 }
 0x9b2   : > { %v5481_v40 = vmul.f32 %v9927_v41, %v5462_v19  ;;  %v5482_v48 = vmul.f32 %v9930_v39, %v5458_v24  ;;  %v10268_v39 = vpack.c.bf16 %v9975_v54, %v9969_v37  ;;  %v5408_v1 = vmul.f32 %v9963_v59, %v5385_v57 }
 0x9b3   : > { %6217 = vmatpush1.bf16.msra.mxu0 %v10267_v23  ;;  %v10269_v37 = vpack.c.bf16 %v9972_v43, %v9966_v14  ;;  %v10270_v14 = vpack.c.bf16 %v10008_v28, %v10002_v32 }
 0x9b4   : > { %v7322_v51 = vpack.c.bf16 %v5481_v40, %v5479_v30  ;;  %v5766_v56 = vpop.permute.xlu0 %5765  ;;  %v5768_v29 = vpop.permute.xlu1 %5767  ;;  %v7323_v22 = vpack.c.bf16 %v5482_v48, %v5480_v3  ;;  %v10272_v30 = vpack.c.bf16 %v10034_v35, %v10028_v55  ;;  %v5712_v35 = vrot.slane %v6854_v50, %v7736_v8 }
 0x9b5   : > { %v5773_v24 = vsel %vm666_vm5, %v10058_v25, %v5768_v29  ;;  %v5776_v27 = vsel %vm666_vm5, %v5766_v56, %v10087_v6  ;;  %v5772_v55 = vsel %vm666_vm5, %v10087_v6, %v5766_v56 }
 0x9b6   : > { %6218 = vmatprep.subr.bf16.mxu0 %v7323_v22 }
 0x9b7   : > { %6219 = vmatpush1.bf16.msra.mxu0 %v7322_v51 }
 0x9b8   : > { %v5382_v41 = vpop.permute.xlu0 %5381  ;;  %6220 = vmatprep.subr.bf16.mxu0 %v10268_v39  ;;  %v5756_v63 = vpop.permute.xlu1 %5755 }
 0x9b9   : > { %v5386_v53 = vsel %vm269_vm3, %v10042_v33, %v5382_v41  ;;  %v5390_v10 = vsel %vm269_vm3, %v5382_v41, %v10042_v33  ;;  %v5845_v33 = vsel %vm740_vm4, %v10044_v2, %v5840_v21  ;;  %v10273_v41 = vpack.c.bf16 %v10031_v58, %v10025_v15 }
 0x9ba   : > { %v5409_v46 = vmul.f32 %v9960_v20, %v5390_v10  ;;  %v5410_v36 = vmul.f32 %v9963_v59, %v5386_v53  ;;  %v5849_v20 = vsel %vm740_vm4, %v5840_v21, %v10044_v2  ;;  %v5867_v11 = vmul.f32 %v9993_v44, %v5845_v33  ;;  %v6859_v2 = vld [vmem:[%s10251_s3 + $0xc] sm:$0x3] }
 0x9bb   : > { %6221 = vmatpush1.bf16.msra.mxu0 %v10269_v37  ;;  %v5868_v49 = vmul.f32 %v9996_v16, %v5849_v20  ;;  %v5784_v52 = vrot.slane %v6859_v2, %v7736_v8  ;;  %v5788_v21 = vrot.slane %v6859_v2, %v7738_v9 }
 0x9bc   : > { %v7318_v54 = vpack.c.bf16 %v5409_v46, %v5407_v26  ;;  %v10129_v31 = vpop.permute.xlu0 %5689  ;;  %v5764_v5 = vpop.permute.xlu1 %5763  ;;  %v7319_v12 = vpack.c.bf16 %v5410_v36, %v5408_v1 }
 0x9bd   : > { %v5795_v40 = vmul.f32 %v5784_v52, %v5773_v24  ;;  %v5794_v39 = vmul.f32 %v5788_v21, %v5776_v27  ;;  %v5793_v56 = vmul.f32 %v5784_v52, %v5772_v55 }
 0x9be   : > { %6222 = vmatprep.subr.bf16.mxu0 %v7319_v12 }
 0x9bf   : > { %6223 = vmatpush1.bf16.msra.mxu0 %v7318_v54 }
 0x9c0   : > { %v5842_v59 = vpop.permute.xlu0 %5841  ;;  %6224 = vmatprep.subr.bf16.mxu0 %v10270_v14  ;;  %v5688_v43 = vpop.permute.xlu1 %5687 }
 0x9c1   : > { %v5846_v47 = vsel %vm740_vm4, %v10046_v18, %v5842_v59  ;;  %v5850_v61 = vsel %vm740_vm4, %v5842_v59, %v10046_v18 }
 0x9c2   : > { %v5869_v32 = vmul.f32 %v9993_v44, %v5846_v47  ;;  %v5870_v28 = vmul.f32 %v9996_v16, %v5850_v61  ;;  %v5777_v44 = vsel %vm666_vm5, %v5768_v29, %v10058_v25  ;;  %v5775_v16 = vsel %vm666_vm5, %v5764_v5, %v5756_v63 }
 0x9c3   : > { %6225 = vmatpush1.bf16.msra.mxu0 %v10271_v62  ;;  %v5771_v25 = vsel %vm666_vm5, %v5756_v63, %v5764_v5  ;;  %v5796_v51 = vmul.f32 %v5788_v21, %v5777_v44  ;;  %v5792_v29 = vmul.f32 %v5788_v21, %v5775_v16  ;;  %v7335_v44 = vpack.c.bf16 %v9747_v13, %v9739_v60  ;;  %v10274_v60 = vld [vmem:[#allocation11_spill] sm:$0xff]  ;;  %v10275_v13 = vld [vmem:[#allocation13_spill] sm:$0xff] }
 0x9c4   : > { %v7346_v42 = vpack.c.bf16 %v5869_v32, %v5867_v11  ;;  %v5686_v4 = vpop.permute.xlu0 %5685  ;;  %v5696_v38 = vpop.permute.xlu1 %5695  ;;  %v7347_v18 = vpack.c.bf16 %v5870_v28, %v5868_v49  ;;  %v5791_v63 = vmul.f32 %v5784_v52, %v5771_v25 }
 0x9c5   : > { %v5701_v1 = vsel %vm592_vm6, %v5688_v43, %v5696_v38  ;;  %v5705_v6 = vsel %vm592_vm6, %v5696_v38, %v5688_v43  ;;  %v7341_v46 = vpack.c.bf16 %v5794_v39, %v5792_v29  ;;  %v6869_v38 = vld [vmem:[%s10251_s3 + $0x10] sm:$0x3]  ;;  %v10278_v39 = vld [vmem:[#allocation14_spill] sm:$0xff] }
 0x9c6   : > { %6226 = vmatprep.subr.bf16.mxu0 %v7347_v18  ;;  %v7340_v58 = vpack.c.bf16 %v5793_v56, %v5791_v63  ;;  %v5723_v37 = vmul.f32 %v5712_v35, %v5701_v1  ;;  %v5724_v54 = vmul.f32 %v5716_v17, %v5705_v6  ;;  %v5932_v24 = vrot.slane %v6869_v38, %v7738_v9  ;;  %v7440_v56 = vld [vmem:[#allocation4 + $0xf8] ss:$0 sps:$4 sm:$0xff]  }
 0x9c7   : > { %6227 = vmatpush2.bf16.msra.mxu0 %v7346_v42  ;;  %v7334_v9 = vpack.c.bf16 %v9745_v0, %v9737_v34  ;;  %v6874_v63 = vcombine.low %v10278_v39, %v10278_v39 }
 0x9c8   : > { %v5770_v19 = vpop.permute.xlu0 %5769  ;;  %6228 = vmatprep.subr.bf16.mxu0 %v10272_v30  ;;  %v5684_v3 = vpop.permute.xlu1 %5683 }
 0x9c9   : > { %v5774_v48 = vsel %vm666_vm5, %v10070_v45, %v5770_v19  ;;  %v5778_v23 = vsel %vm666_vm5, %v5770_v19, %v10070_v45 }
 0x9ca   : > { %v5797_v22 = vmul.f32 %v5784_v52, %v5774_v48  ;;  %v5798_v57 = vmul.f32 %v5788_v21, %v5778_v23  ;;  %v5928_v21 = vrot.slane %v6869_v38, %v7736_v8 }
 0x9cb   : > { %6229 = vmatpush2.bf16.msra.mxu0 %v10273_v41 }
 0x9cc   : > { %v7342_v53 = vpack.c.bf16 %v5797_v22, %v5795_v40  ;;  %v5694_v45 = vpop.permute.xlu0 %5693  ;;  %v5692_v10 = vpop.permute.xlu1 %5691  ;;  %v7343_v26 = vpack.c.bf16 %v5798_v57, %v5796_v51 }
 0x9cd   : > { %v5704_v36 = vsel %vm592_vm6, %v5694_v45, %v5686_v4  ;;  %v5703_v15 = vsel %vm592_vm6, %v5692_v10, %v5684_v3  ;;  %v5700_v33 = vsel %vm592_vm6, %v5686_v4, %v5694_v45  ;;  %v5699_v20 = vsel %vm592_vm6, %v5684_v3, %v5692_v10 }
 0x9ce   : > { %6230 = vmatprep.subr.bf16.mxu0 %v7343_v26  ;;  %v5722_v43 = vmul.f32 %v5716_v17, %v5704_v36  ;;  %v5720_v47 = vmul.f32 %v5716_v17, %v5703_v15  ;;  %v5721_v62 = vmul.f32 %v5712_v35, %v5700_v33  ;;  %v5719_v42 = vmul.f32 %v5712_v35, %v5699_v20 }
 0x9cf   : > { %6231 = vmatpush2.bf16.msra.mxu0 %v7342_v53  ;;  %v7333_v3 = vpack.c.bf16 %v10275_v13, %v10274_v60 }
 0x9d0   : > { %v5698_v5 = vpop.permute.xlu0 %5697  ;;  %6232 = vmatprep.subr.bf16.mxu0 %v7341_v46  ;;  %v5904_v12 = vpop.permute.xlu1 %5903  ;;  %v7337_v4 = vpack.c.bf16 %v5722_v43, %v5720_v47  ;;  %v7336_v52 = vpack.c.bf16 %v5721_v62, %v5719_v42 }
 0x9d1   : > { %v5702_v59 = vsel %vm592_vm6, %v10129_v31, %v5698_v5  ;;  %v5706_v14 = vsel %vm592_vm6, %v5698_v5, %v10129_v31 }
 0x9d2   : > { %v5725_v61 = vmul.f32 %v5712_v35, %v5702_v59  ;;  %v5726_v11 = vmul.f32 %v5716_v17, %v5706_v14  ;;  %v10276_v35 = vld [vmem:[#allocation10_spill] sm:$0xff]  ;;  %v10277_v17 = vld [vmem:[#allocation12_spill] sm:$0xff] }
 0x9d3   : > { %6233 = vmatpush2.bf16.msra.mxu0 %v7340_v58  ;;  %v7332_v41 = vpack.c.bf16 %v10277_v17, %v10276_v35 }
 0x9d4   : > { %v7338_v49 = vpack.c.bf16 %v5725_v61, %v5723_v37  ;;  %v5906_v2 = vpop.permute.xlu0 %5905  ;;  %v5912_v32 = vpop.permute.xlu1 %5911  ;;  %v7339_v28 = vpack.c.bf16 %v5726_v11, %v5724_v54 }
 0x9d5   : > { %v5917_v16 = vsel %vm814_vm7, %v5904_v12, %v5912_v32  ;;  %v5921_v27 = vsel %vm814_vm7, %v5912_v32, %v5904_v12 }
 0x9d6   : > { %6234 = vmatprep.subr.bf16.mxu0 %v7339_v28  ;;  %v5939_v40 = vmul.f32 %v5928_v21, %v5917_v16  ;;  %v5940_v25 = vmul.f32 %v5932_v24, %v5921_v27 }
 0x9d7   : > { %6235 = vmatpush2.bf16.msra.mxu0 %v7338_v49 }
 0x9d8   : > { %v5902_v18 = vpop.permute.xlu0 %5901  ;;  %6236 = vmatprep.subr.bf16.mxu0 %v7337_v4  ;;  %v5900_v31 = vpop.permute.xlu1 %5899 }
 0x9db   : > { %6237 = vmatpush2.bf16.msra.mxu0 %v7336_v52 }
 0x9dc   : > { %v5914_v50 = vpop.permute.xlu0 %5913  ;;  %6238 = vmatprep.subr.bf16.mxu0 %v7335_v44  ;;  %v5908_v19 = vpop.permute.xlu1 %5907 }
 0x9dd   : > { %v5918_v30 = vsel %vm814_vm7, %v5906_v2, %v5914_v50  ;;  %v5922_v8 = vsel %vm814_vm7, %v5914_v50, %v5906_v2  ;;  %v5915_v51 = vsel %vm814_vm7, %v5900_v31, %v5908_v19  ;;  %v5919_v29 = vsel %vm814_vm7, %v5908_v19, %v5900_v31 }
 0x9de   : > { %v5941_v48 = vmul.f32 %v5928_v21, %v5918_v30  ;;  %v5942_v23 = vmul.f32 %v5932_v24, %v5922_v8  ;;  %v5935_v53 = vmul.f32 %v5928_v21, %v5915_v51  ;;  %v5936_v45 = vmul.f32 %v5932_v24, %v5919_v29 }
 0x9df   : > { %6239 = vmatpush2.bf16.msra.mxu0 %v7334_v9 }
 0x9e0   : > { %v7350_v22 = vpack.c.bf16 %v5941_v48, %v5939_v40  ;;  %v5910_v57 = vpop.permute.xlu0 %5909  ;;  %6240 = vmatprep.subr.bf16.mxu0 %v7333_v3  ;;  %v7351_v55 = vpack.c.bf16 %v5942_v23, %v5940_v25 }
 0x9e1   : > { %v5916_v34 = vsel %vm814_vm7, %v5902_v18, %v5910_v57  ;;  %v5920_v0 = vsel %vm814_vm7, %v5910_v57, %v5902_v18 }
 0x9e2   : > { %v5937_v10 = vmul.f32 %v5928_v21, %v5916_v34  ;;  %v5938_v26 = vmul.f32 %v5932_v24, %v5920_v0  ;;  %6263 = vmatprep.subr.bf16.mxu1 %v7351_v55 }
 0x9e3   : > { %6241 = vmatpush2.bf16.msra.mxu0 %v7332_v41  ;;  %6264 = vmatpush1.bf16.msra.mxu1 %v7350_v22 }
 0x9e4   : > { %v7348_v1 = vpack.c.bf16 %v5937_v10, %v5935_v53  ;;  %v7349_v6 = vpack.c.bf16 %v5938_v26, %v5936_v45 }
 0x9e6   : > { %6243 = vmatmul.mubr.bf16.vlgmr.msra.gmra.mxu0 %v6874_v63  ;;  %6265 = vmatprep.subr.bf16.mxu1 %v7349_v6 }
 0x9e7   : > { %6266 = vmatpush1.bf16.msra.mxu1 %v7348_v1 }
 0x9e9   : > { %v6015_v46 = vpop.permute.xlu1 %6014 }
 0x9ea   : > { %6913 = vmatmul.mubr.msk.bf16.vlgmr.msra.gmra.mxu1 %vm1150_vm8, %v7440_v56 }
 0xaa6   : > { %v6244_v7 = vpop.f32.mrf.mxu0 }
 0xaa7   : > { %v6245_v15 = vadd.f32 %v6244_v7, %v6015_v46 }
 0xaa8   : > { %v6246_v36 = vpop.f32.mrf.mxu0 }
 0xaa9   : > { %v6247_v54 = vadd.f32 %v6246_v36, %v6015_v46 }
 0xaaa   : > { %v6285_v58 = vpop.f32.mrf.mxu1  ;;  %v6248_v37 = vpop.f32.mrf.mxu0 }
 0xaab   : > { %v6286_v5 = vadd.f32 %v6285_v58, %v6245_v15 }
 0xaac   : > { %v6287_v12 = vpop.f32.mrf.mxu1  ;;  %v6249_v33 = vpop.f32.mrf.mxu0 }
 0xaad   : > { %v6914_v20 = vmul.f32 -1.442695, %v6286_v5  ;;  %v6288_v59 = vadd.f32 %v6287_v12, %v6247_v54 }
 0xaae   : > { %v6289_v14 = vpop.f32.mrf.mxu1 }
 0xaaf   : > { %7441 = vpow2.f32 %v6914_v20  ;;  %v6915_v43 = vmul.f32 -1.442695, %v6288_v59 }
 0xab0   : > { %v6290_v47 = vpop.f32.mrf.mxu1 }
 0xab1   : > { %7443 = vpow2.f32 %v6915_v43 }
 0xabc   : > { %v7442_v61 = vpop.eup %7441 }
 0xabd   : > { %v6298_v11 = vadd.f32 1.0, %v7442_v61 }
 0xabe   : > { %v7444_v49 = vpop.eup %7443 }
 0xabf   : > { %7445 = vrcp.f32 %v6298_v11  ;;  %v6299_v2 = vadd.f32 1.0, %v7444_v49 }
 0xac1   : > { %7447 = vrcp.f32 %v6299_v2 }
 0xacc   : > { %v7446_v32 = vpop.eup %7445 }
 0xacd   : > { %6304 = vst [vmem:[%s227_s6] sm:$0xff] %v7446_v32 }
 0xace   : > { %v7448_v28 = vpop.eup %7447 }
 0xacf   : > { %6305 = vst [vmem:[%s227_s6 + $0x8] sm:$0xff] %v7448_v28 }
 0xad0 PF: > { %s16_s15 = sadd.s32 1, %s7515_s15  }
 0xad1   : > { %p13_p3 = scmp.ge.s32.totalorder %s16_s15, 4  }
 0xad3   :  { %15 = sbr.rel (!%p13_p3) target bundleno = 2 (0x2), region = 92 }
 0xad8   :  { %6327 = vsyncpa [#allocation5], 1 }
 0xad9   :  { %6329 = vsyncpa [#allocation5 + $0x1], 1 }
 0xada   :  { %6330 = vsyncpa [#allocation7], 1 }

</bundles_post_ra>
